<compile_context>
chip_gen: v7x
topology: tpu7x:2x2x1
jax: 0.10.0
libtpu: 0.0.40
codegen_flags: <defaults>
</compile_context>

<pallas_src>
import functools

import jax
import jax.numpy as jnp
from jax.experimental import pallas as pl
from jax.experimental.pallas import tpu as pltpu

DIM = 32           # hidden size (dim = 32 in the PyTorch script)
EDGE_TILE = 128    # edges per grid step (lane-aligned)


# ----------------------------------------------------------------------------
# Fused forward kernel: grid = (3 layers, num_edge_tiles)
# ----------------------------------------------------------------------------
def _net_kernel(n_layers, n_etiles, dim,
                ea_ref, src_ref, tgt_ref,
                x_ref, deginv_ref, mask_ref,
                lin0_w_ref, lin0_b_ref,
                enn1_w_ref, enn1_b_ref,
                enn2_w_ref, enn2_b_ref,
                expand_ref, reduce_ref,
                root_ref, conv_b_ref,
                gru_wi_ref, gru_wh_ref, gru_bi_ref, gru_bh_ref,
                s2s_wa_ref, s2s_wb_ref, s2s_b_ref,
                lin1_wh_ref, lin1_wr_ref, lin1_b_ref,
                lin2_w_ref, lin2_b_ref,
                o_ref,
                out_s, h_s, agg_s):
    f32 = jnp.float32
    bf16 = jnp.bfloat16
    dot = functools.partial(jnp.dot, preferred_element_type=f32)

    layer = pl.program_id(0)
    et = pl.program_id(1)
    n_nodes = out_s.shape[0]
    te = ea_ref.shape[0]

    # ---- first grid step: out = relu(lin0(x)); h = out -----------------------
    @pl.when((layer == 0) & (et == 0))
    def _init():
        v = jnp.maximum(dot(x_ref[...], lin0_w_ref[...]) + lin0_b_ref[...], 0.0)
        out_s[...] = v
        h_s[...] = v

    # ---- start of every layer: clear the message accumulator -----------------
    @pl.when(et == 0)
    def _clear():
        agg_s[...] = jnp.zeros_like(agg_s)

    # ---- per edge tile: edge-net -> gather -> message -> scatter-add ---------
    # Edge network recomputed per (layer, tile): cheaper than streaming an
    # (E, 1024) tensor from HBM three times.
    eh = jnp.maximum(dot(ea_ref[...], enn1_w_ref[...]) + enn1_b_ref[...], 0.0)
    we = dot(eh.astype(bf16), enn2_w_ref[...]) + enn2_b_ref[...]   # (TE, dim*dim) f32

    # 0/1 gather/scatter selectors built in VMEM from the index tiles.
    # Padded edges carry index -1 -> all-zero row/column -> no contribution.
    iota_src = jax.lax.broadcasted_iota(jnp.int32, (te, n_nodes), 1)
    src1h = (src_ref[...] == iota_src).astype(bf16)                # (TE, N)
    iota_tgt = jax.lax.broadcasted_iota(jnp.int32, (n_nodes, te), 0)
    tgt1h_t = (tgt_ref[...] == iota_tgt).astype(bf16)              # (N, TE)

    xs = dot(src1h, out_s[...].astype(bf16))                       # (TE, dim) gather
    # msg[e, k] = sum_d xs[e, d] * we[e, d*dim + k]  (lane-dense, no (E,32,32))
    prod = dot(xs.astype(bf16), expand_ref[...]) * we              # (TE, dim*dim)
    msg = dot(prod.astype(bf16), reduce_ref[...])                  # (TE, dim)
    agg_s[...] += dot(tgt1h_t, msg.astype(bf16))                   # scatter-add (N, dim)

    # ---- last edge tile of the layer: NNConv finalize + GRU ------------------
    @pl.when(et == n_etiles - 1)
    def _finalize():
        h = h_s[...]
        out_prev = out_s[...]
        m = jnp.maximum(agg_s[...] * deginv_ref[...]               # mean aggregation
                        + dot(out_prev.astype(bf16), root_ref[...])
                        + conv_b_ref[...], 0.0)

        # GRU (gate order r, z, n): two matmuls, no concat.
        gi = dot(m.astype(bf16), gru_wi_ref[...]) + gru_bi_ref[...]   # (N, 3*dim)
        gh = dot(h.astype(bf16), gru_wh_ref[...]) + gru_bh_ref[...]
        rz = jax.nn.sigmoid(gi[:, :2 * dim] + gh[:, :2 * dim])        # 64-lane block
        r = rz[:, :dim]
        z = rz[:, dim:]
        n = jnp.tanh(gi[:, 2 * dim:] + r * gh[:, 2 * dim:])
        h_new = (1.0 - z) * n + z * h
        out_s[...] = h_new
        h_s[...] = h_new

        # ---- after the last layer: Set2Set(3) + lin1 + lin2 ------------------
        @pl.when(layer == n_layers - 1)
        def _readout():
            xf_bf = h_new.astype(bf16)              # hoisted out of the step loop
            mask = mask_ref[...]                    # (B, N) graph membership
            neg = jnp.where(mask > 0.0, 0.0, -1e30)
            nb = mask.shape[0]
            s2s_b = jnp.broadcast_to(s2s_b_ref[...], (nb, 4 * dim))   # hoisted
            hh = jnp.zeros((nb, dim), f32)
            cc = jnp.zeros((nb, dim), f32)
            rr = jnp.zeros((nb, dim), f32)
            for _ in range(3):
                # LSTM(2*dim, dim), gate order i, f, g, o.  q_star = [hh, rr];
                # W_ih[:, :dim] was folded into W_hh at init -> no concat.
                gates = (dot(hh.astype(bf16), s2s_wa_ref[...])
                         + dot(rr.astype(bf16), s2s_wb_ref[...]) + s2s_b)
                i_f = jax.nn.sigmoid(gates[:, :2 * dim])              # 64-lane block
                g_g = jnp.tanh(gates[:, 2 * dim:3 * dim])
                o_g = jax.nn.sigmoid(gates[:, 3 * dim:])
                cc = i_f[:, dim:] * cc + i_f[:, :dim] * g_g
                hh = o_g * jnp.tanh(cc)
                # scores s[b, n] = hh[b] . x[n]  (MXU-native q @ k^T contraction)
                s = jax.lax.dot_general(hh.astype(bf16), xf_bf,
                                        (((1,), (1,)), ((), ())),
                                        preferred_element_type=f32) + neg
                ex = jnp.exp(s - jnp.max(s, axis=1, keepdims=True)) * mask
                den = jnp.maximum(jnp.sum(ex, axis=1, keepdims=True), 1e-20)
                a = ex / den   # exact; pl.reciprocal(approx=True) after validation
                rr = dot(a.astype(bf16), xf_bf)                       # (B, dim)
            # lin2(relu(lin1([hh, rr]))) with lin1 split into its two halves
            y = jnp.maximum(dot(hh.astype(bf16), lin1_wh_ref[...])
                            + dot(rr.astype(bf16), lin1_wr_ref[...])
                            + lin1_b_ref[...], 0.0)
            o_ref[...] = dot(y.astype(bf16), lin2_w_ref[...]) + lin2_b_ref[...]


# ----------------------------------------------------------------------------
# Parameters (deterministic synthetic init matching the module's shapes)
# ----------------------------------------------------------------------------
def _uniform(key, shape, bound):
    return jax.random.uniform(key, shape, jnp.float32, -bound, bound)


def init_params(key, num_features):
    ks = iter(jax.random.split(key, 32))
    bf16 = jnp.bfloat16
    p = {}

    def lin(fan_in, fan_out):
        b = 1.0 / (fan_in ** 0.5)
        w = _uniform(next(ks), (fan_out, fan_in), b)       # PyTorch layout (out, in)
        bias = _uniform(next(ks), (1, fan_out), b)
        return w.T.astype(bf16), bias                      # kernel wants (in, out)

    p['lin0_w'], p['lin0_b'] = lin(num_features, DIM)       # Linear(F, 32)
    p['enn1_w'], p['enn1_b'] = lin(5, 128)                  # Linear(5, 128)
    p['enn2_w'], p['enn2_b'] = lin(128, DIM * DIM)          # Linear(128, 1024)

    b = 1.0 / (DIM ** 0.5)
    p['root'] = _uniform(next(ks), (DIM, DIM), b).astype(bf16)   # NNConv root (in,out)
    p['conv_b'] = _uniform(next(ks), (1, DIM), b)

    # GRU(dim, dim), gate order r, z, n; biases kept separate (n-gate needs both)
    p['gru_wi'] = _uniform(next(ks), (3 * DIM, DIM), b).T.astype(bf16)   # (dim, 3*dim)
    p['gru_wh'] = _uniform(next(ks), (3 * DIM, DIM), b).T.astype(bf16)
    p['gru_bi'] = _uniform(next(ks), (1, 3 * DIM), b)
    p['gru_bh'] = _uniform(next(ks), (1, 3 * DIM), b)

    # Set2Set LSTM(2*dim -> dim), gate order i, f, g, o.
    s_wih = _uniform(next(ks), (4 * DIM, 2 * DIM), b)
    s_whh = _uniform(next(ks), (4 * DIM, DIM), b)
    s_bih = _uniform(next(ks), (1, 4 * DIM), b)
    s_bhh = _uniform(next(ks), (1, 4 * DIM), b)
    # q_star = [hh, r] and its hh half IS the LSTM hidden -> fold W_ih[:, :dim]
    # into W_hh so each recurrent step is two concat-free matmuls.
    p['s2s_wa'] = (s_wih[:, :DIM] + s_whh).T.astype(bf16)   # (dim, 4*dim)
    p['s2s_wb'] = s_wih[:, DIM:].T.astype(bf16)             # (dim, 4*dim)
    p['s2s_b'] = s_bih + s_bhh

    # lin1 (Linear(2*dim, dim)) split into its [h | r] input halves
    b1 = 1.0 / ((2 * DIM) ** 0.5)
    w1 = _uniform(next(ks), (DIM, 2 * DIM), b1)             # (out, in)
    p['lin1_wh'] = w1[:, :DIM].T.astype(bf16)
    p['lin1_wr'] = w1[:, DIM:].T.astype(bf16)
    p['lin1_b'] = _uniform(next(ks), (1, DIM), b1)

    p['lin2_w'], p['lin2_b'] = lin(DIM, 1)                  # Linear(32, 1)

    # Constant 0/1 selectors for the per-edge (dim,dim) matmul; column layout
    # c = d*dim + k (exact in bf16).
    cols = jnp.arange(DIM * DIM)
    p['expand'] = (jnp.arange(DIM)[:, None] == (cols // DIM)[None, :]).astype(bf16)
    p['reduce'] = ((cols % DIM)[:, None] == jnp.arange(DIM)[None, :]).astype(bf16)
    return p


# ----------------------------------------------------------------------------
# Forward pass (mirrors Net.forward) — one edge-tiled pallas_call
# ----------------------------------------------------------------------------
def net_forward(params, x, edge_index, edge_attr, batch, num_graphs):
    f32 = jnp.float32
    bf16 = jnp.bfloat16
    n, _ = x.shape
    e = edge_attr.shape[0]

    # -- pad nodes to a sublane multiple; padded nodes belong to no graph ------
    n_pad = (-n) % 8
    if n_pad:
        x = jnp.pad(x, ((0, n_pad), (0, 0)))
        batch = jnp.concatenate(
            [batch, jnp.full((n_pad,), num_graphs, batch.dtype)])
    n_tot = n + n_pad

    # -- pad edges to a tile multiple; padded edges get index -1 (no-op) -------
    src = edge_index[0].astype(jnp.int32)
    tgt = edge_index[1].astype(jnp.int32)
    deg = jnp.zeros((n_tot,), f32).at[tgt].add(1.0)          # in-degree (real edges)
    e_pad = (-e) % EDGE_TILE
    if e_pad:
        edge_attr = jnp.pad(edge_attr, ((0, e_pad), (0, 0)))
        src = jnp.pad(src, (0, e_pad), constant_values=-1)
        tgt = jnp.pad(tgt, (0, e_pad), constant_values=-1)
    e_tot = e + e_pad
    n_et = e_tot // EDGE_TILE

    deg_inv = (1.0 / jnp.maximum(deg, 1.0)).reshape(n_tot, 1)           # f32, exact
    mask = (jnp.arange(num_graphs)[:, None] == batch[None, :]).astype(f32)  # (B, N)

    ea = edge_attr.astype(bf16)          # streamed bf16 MXU operand
    x_bf = x.astype(bf16)
    src_c = src.reshape(e_tot, 1)
    tgt_r = tgt.reshape(1, e_tot)

    n_layers = 3
    edge_spec = pl.BlockSpec((EDGE_TILE, edge_attr.shape[1]), lambda l, t: (t, 0))
    src_spec = pl.BlockSpec((EDGE_TILE, 1), lambda l, t: (t, 0))
    tgt_spec = pl.BlockSpec((1, EDGE_TILE), lambda l, t: (0, t))

    def res(a):  # resident: full-array block, constant index map -> DMA'd once
        return pl.BlockSpec(a.shape, lambda l, t: (0,) * a.ndim)

    resident_args = (
        x_bf, deg_inv, mask,
        params['lin0_w'], params['lin0_b'],
        params['enn1_w'], params['enn1_b'],
        params['enn2_w'], params['enn2_b'],
        params['expand'], params['reduce'],
        params['root'], params['conv_b'],
        params['gru_wi'], params['gru_wh'], params['gru_bi'], params['gru_bh'],
        params['s2s_wa'], params['s2s_wb'], params['s2s_b'],
        params['lin1_wh'], params['lin1_wr'], params['lin1_b'],
        params['lin2_w'], params['lin2_b'],
    )

    grid_spec = pltpu.PrefetchScalarGridSpec(
        num_scalar_prefetch=0,
        grid=(n_layers, n_et),
        in_specs=[edge_spec, src_spec, tgt_spec] + [res(a) for a in resident_args],
        out_specs=pl.BlockSpec((num_graphs, 1), lambda l, t: (0, 0)),
        scratch_shapes=[pltpu.VMEM((n_tot, DIM), f32)] * 3,   # out, h, agg
    )

    out = pl.pallas_call(
        functools.partial(_net_kernel, n_layers, n_et, DIM),
        out_shape=jax.ShapeDtypeStruct((num_graphs, 1), f32),
        grid_spec=grid_spec,
        compiler_params=pltpu.CompilerParams(
            # Layer axis carries state; edge axis reduces into VMEM scratch.
            # TODO(synk): v7x core-parallel edge split needs per-core partial
            # accumulators + combine, so both axes stay "arbitrary" for now.
            dimension_semantics=("arbitrary", "arbitrary"),
            vmem_limit_bytes=48 * 1024 * 1024,
        ),
    )(ea, src_c, tgt_r, *resident_args)
    return out.reshape(-1)                                    # out.view(-1)


# TODO(synk): training-side methods (Adam optimizer, langevin_gradient,
# evaluate_proposal, noise/copy of state_dict) are host-side utilities, not part
# of the forward pass, and are not translated to kernels.

if __name__ == "__main__":
    key = jax.random.PRNGKey(0)
    k_param, k_x, k_e = jax.random.split(key, 3)

    num_features = 11          # QM9 node features
    nodes_per_graph = 12
    num_graphs = 2
    n = nodes_per_graph * num_graphs

    # Complete graphs without self-loops (the `Complete` transform)
    rows, cols = [], []
    for g in range(num_graphs):
        off = g * nodes_per_graph
        for i in range(nodes_per_graph):
            for j in range(nodes_per_graph):
                if i != j:
                    rows.append(off + i)
                    cols.append(off + j)
    edge_index = jnp.array([rows, cols], dtype=jnp.int32)
    e = edge_index.shape[1]            # 264 edges -> 3 edge tiles of 128 (padded)

    x = jax.random.normal(k_x, (n, num_features), jnp.float32)
    edge_attr = jax.random.uniform(k_e, (e, 5), jnp.float32)   # 4 bond feats + dist
    batch = jnp.repeat(jnp.arange(num_graphs, dtype=jnp.int32), nodes_per_graph)

    params = init_params(k_param, num_features)
    fwd = jax.jit(functools.partial(net_forward, num_graphs=num_graphs))
    y = fwd(params, x, edge_index, edge_attr, batch)
    y = jax.block_until_ready(y)
    assert y.shape == (num_graphs,) and y.dtype == jnp.float32
    print("KERNEL_OK")
</pallas_src>

<mosaic_0001>
module attributes {stable_mosaic.version = 11 : i64} {
  func.func @_net_kernel(%arg0: i32, %arg1: i32, %arg2: memref<128x5xbf16, #tpu.memory_space<vmem>>, %arg3: memref<128x1xi32, #tpu.memory_space<vmem>>, %arg4: memref<1x128xi32, #tpu.memory_space<vmem>>, %arg5: memref<24x11xbf16, #tpu.memory_space<vmem>>, %arg6: memref<24x1xf32, #tpu.memory_space<vmem>>, %arg7: memref<2x24xf32, #tpu.memory_space<vmem>>, %arg8: memref<11x32xbf16, #tpu.memory_space<vmem>>, %arg9: memref<1x32xf32, #tpu.memory_space<vmem>>, %arg10: memref<5x128xbf16, #tpu.memory_space<vmem>>, %arg11: memref<1x128xf32, #tpu.memory_space<vmem>>, %arg12: memref<128x1024xbf16, #tpu.memory_space<vmem>>, %arg13: memref<1x1024xf32, #tpu.memory_space<vmem>>, %arg14: memref<32x1024xbf16, #tpu.memory_space<vmem>>, %arg15: memref<1024x32xbf16, #tpu.memory_space<vmem>>, %arg16: memref<32x32xbf16, #tpu.memory_space<vmem>>, %arg17: memref<1x32xf32, #tpu.memory_space<vmem>>, %arg18: memref<32x96xbf16, #tpu.memory_space<vmem>>, %arg19: memref<32x96xbf16, #tpu.memory_space<vmem>>, %arg20: memref<1x96xf32, #tpu.memory_space<vmem>>, %arg21: memref<1x96xf32, #tpu.memory_space<vmem>>, %arg22: memref<32x128xbf16, #tpu.memory_space<vmem>>, %arg23: memref<32x128xbf16, #tpu.memory_space<vmem>>, %arg24: memref<1x128xf32, #tpu.memory_space<vmem>>, %arg25: memref<32x32xbf16, #tpu.memory_space<vmem>>, %arg26: memref<32x32xbf16, #tpu.memory_space<vmem>>, %arg27: memref<1x32xf32, #tpu.memory_space<vmem>>, %arg28: memref<32x1xbf16, #tpu.memory_space<vmem>>, %arg29: memref<1x1xf32, #tpu.memory_space<vmem>>, %arg30: memref<2x1xf32, #tpu.memory_space<vmem>>, %arg31: memref<24x32xf32, #tpu.memory_space<vmem>>, %arg32: memref<24x32xf32, #tpu.memory_space<vmem>>, %arg33: memref<24x32xf32, #tpu.memory_space<vmem>>) attributes {dimension_semantics = [#tpu.dimension_semantics<arbitrary>, #tpu.dimension_semantics<arbitrary>], iteration_bounds = array<i64: 3, 3>, scalar_prefetch = 0 : i64, scratch_operands = 3 : i64, tpu.core_type = #tpu.core_type<tc>, window_params = [{transform_indices = @transform_0, window_bounds = array<i64: 128, 5>}, {transform_indices = @transform_1, window_bounds = array<i64: 128, 1>}, {transform_indices = @transform_2, window_bounds = array<i64: 1, 128>}, {pipeline_mode = #tpu.pipeline_mode<synchronous>, transform_indices = @transform_3, window_bounds = array<i64: 24, 11>}, {pipeline_mode = #tpu.pipeline_mode<synchronous>, transform_indices = @transform_4, window_bounds = array<i64: 24, 1>}, {pipeline_mode = #tpu.pipeline_mode<synchronous>, transform_indices = @transform_5, window_bounds = array<i64: 2, 24>}, {pipeline_mode = #tpu.pipeline_mode<synchronous>, transform_indices = @transform_6, window_bounds = array<i64: 11, 32>}, {pipeline_mode = #tpu.pipeline_mode<synchronous>, transform_indices = @transform_7, window_bounds = array<i64: 1, 32>}, {pipeline_mode = #tpu.pipeline_mode<synchronous>, transform_indices = @transform_8, window_bounds = array<i64: 5, 128>}, {pipeline_mode = #tpu.pipeline_mode<synchronous>, transform_indices = @transform_9, window_bounds = array<i64: 1, 128>}, {pipeline_mode = #tpu.pipeline_mode<synchronous>, transform_indices = @transform_10, window_bounds = array<i64: 128, 1024>}, {pipeline_mode = #tpu.pipeline_mode<synchronous>, transform_indices = @transform_11, window_bounds = array<i64: 1, 1024>}, {pipeline_mode = #tpu.pipeline_mode<synchronous>, transform_indices = @transform_12, window_bounds = array<i64: 32, 1024>}, {pipeline_mode = #tpu.pipeline_mode<synchronous>, transform_indices = @transform_13, window_bounds = array<i64: 1024, 32>}, {pipeline_mode = #tpu.pipeline_mode<synchronous>, transform_indices = @transform_14, window_bounds = array<i64: 32, 32>}, {pipeline_mode = #tpu.pipeline_mode<synchronous>, transform_indices = @transform_15, window_bounds = array<i64: 1, 32>}, {pipeline_mode = #tpu.pipeline_mode<synchronous>, transform_indices = @transform_16, window_bounds = array<i64: 32, 96>}, {pipeline_mode = #tpu.pipeline_mode<synchronous>, transform_indices = @transform_17, window_bounds = array<i64: 32, 96>}, {pipeline_mode = #tpu.pipeline_mode<synchronous>, transform_indices = @transform_18, window_bounds = array<i64: 1, 96>}, {pipeline_mode = #tpu.pipeline_mode<synchronous>, transform_indices = @transform_19, window_bounds = array<i64: 1, 96>}, {pipeline_mode = #tpu.pipeline_mode<synchronous>, transform_indices = @transform_20, window_bounds = array<i64: 32, 128>}, {pipeline_mode = #tpu.pipeline_mode<synchronous>, transform_indices = @transform_21, window_bounds = array<i64: 32, 128>}, {pipeline_mode = #tpu.pipeline_mode<synchronous>, transform_indices = @transform_22, window_bounds = array<i64: 1, 128>}, {pipeline_mode = #tpu.pipeline_mode<synchronous>, transform_indices = @transform_23, window_bounds = array<i64: 32, 32>}, {pipeline_mode = #tpu.pipeline_mode<synchronous>, transform_indices = @transform_24, window_bounds = array<i64: 32, 32>}, {pipeline_mode = #tpu.pipeline_mode<synchronous>, transform_indices = @transform_25, window_bounds = array<i64: 1, 32>}, {pipeline_mode = #tpu.pipeline_mode<synchronous>, transform_indices = @transform_26, window_bounds = array<i64: 32, 1>}, {pipeline_mode = #tpu.pipeline_mode<synchronous>, transform_indices = @transform_27, window_bounds = array<i64: 1, 1>}, {pipeline_mode = #tpu.pipeline_mode<synchronous>, transform_indices = @transform_28, window_bounds = array<i64: 2, 1>}]} {
    %c0_i32 = arith.constant 0 : i32
    %0 = arith.cmpi eq, %arg0, %c0_i32 : i32
    %c0_i32_0 = arith.constant 0 : i32
    %1 = arith.cmpi eq, %arg1, %c0_i32_0 : i32
    %2 = arith.andi %0, %1 : i1
    %3 = arith.extui %2 : i1 to i32
    %c0_i32_1 = arith.constant 0 : i32
    %4 = arith.cmpi ne, %3, %c0_i32_1 : i32
    scf.if %4 {
      %c0_34 = arith.constant 0 : index
      %c0_35 = arith.constant 0 : index
      %54 = vector.load %arg5[%c0_34, %c0_35] : memref<24x11xbf16, #tpu.memory_space<vmem>>, vector<24x11xbf16>
      %c0_36 = arith.constant 0 : index
      %c0_37 = arith.constant 0 : index
      %55 = vector.load %arg8[%c0_36, %c0_37] : memref<11x32xbf16, #tpu.memory_space<vmem>>, vector<11x32xbf16>
      %cst_38 = arith.constant dense<0.000000e+00> : vector<24x32xf32>
      %56 = tpu.matmul %54, %55, %cst_38 {dimension_numbers = #tpu.dot_dimension_numbers<[1], [0], [0], [1], [0, 0, 1, 1], [], []>} : vector<24x11xbf16>, vector<11x32xbf16>, vector<24x32xf32> -> vector<24x32xf32>
      %c0_39 = arith.constant 0 : index
      %c0_40 = arith.constant 0 : index
      %57 = vector.load %arg9[%c0_39, %c0_40] : memref<1x32xf32, #tpu.memory_space<vmem>>, vector<1x32xf32>
      %58 = vector.broadcast %57 : vector<1x32xf32> to vector<24x32xf32>
      %59 = arith.addf %56, %58 : vector<24x32xf32>
      %cst_41 = arith.constant 0.000000e+00 : f32
      %60 = vector.broadcast %cst_41 : f32 to vector<24x32xf32>
      %61 = arith.maximumf %59, %60 : vector<24x32xf32>
      %c0_42 = arith.constant 0 : index
      %c0_43 = arith.constant 0 : index
      %62 = vector.load %arg31[%c0_42, %c0_43] : memref<24x32xf32, #tpu.memory_space<vmem>>, vector<24x32xf32>
      tpu.vector_store %arg31[%c0_42, %c0_43], %61 {strides = array<i32>} : memref<24x32xf32, #tpu.memory_space<vmem>>, vector<24x32xf32>,
      %c0_44 = arith.constant 0 : index
      %c0_45 = arith.constant 0 : index
      %63 = vector.load %arg32[%c0_44, %c0_45] : memref<24x32xf32, #tpu.memory_space<vmem>>, vector<24x32xf32>
      tpu.vector_store %arg32[%c0_44, %c0_45], %61 {strides = array<i32>} : memref<24x32xf32, #tpu.memory_space<vmem>>, vector<24x32xf32>,
    } else {
    }
    %c0_i32_2 = arith.constant 0 : i32
    %5 = arith.cmpi eq, %arg1, %c0_i32_2 : i32
    %6 = arith.extui %5 : i1 to i32
    %c0_i32_3 = arith.constant 0 : i32
    %7 = arith.cmpi ne, %6, %c0_i32_3 : i32
    scf.if %7 {
      %cst_34 = arith.constant 0.000000e+00 : f32
      %54 = vector.broadcast %cst_34 : f32 to vector<24x32xf32>
      %c0_35 = arith.constant 0 : index
      %c0_36 = arith.constant 0 : index
      %55 = vector.load %arg33[%c0_35, %c0_36] : memref<24x32xf32, #tpu.memory_space<vmem>>, vector<24x32xf32>
      tpu.vector_store %arg33[%c0_35, %c0_36], %54 {strides = array<i32>} : memref<24x32xf32, #tpu.memory_space<vmem>>, vector<24x32xf32>,
    } else {
    }
    %c0 = arith.constant 0 : index
    %c0_4 = arith.constant 0 : index
    %8 = vector.load %arg2[%c0, %c0_4] : memref<128x5xbf16, #tpu.memory_space<vmem>>, vector<128x5xbf16>
    %c0_5 = arith.constant 0 : index
    %c0_6 = arith.constant 0 : index
    %9 = vector.load %arg10[%c0_5, %c0_6] : memref<5x128xbf16, #tpu.memory_space<vmem>>, vector<5x128xbf16>
    %cst = arith.constant dense<0.000000e+00> : vector<128x128xf32>
    %10 = tpu.matmul %8, %9, %cst {dimension_numbers = #tpu.dot_dimension_numbers<[1], [0], [0], [1], [0, 0, 1, 1], [], []>} : vector<128x5xbf16>, vector<5x128xbf16>, vector<128x128xf32> -> vector<128x128xf32>
    %c0_7 = arith.constant 0 : index
    %c0_8 = arith.constant 0 : index
    %11 = vector.load %arg11[%c0_7, %c0_8] : memref<1x128xf32, #tpu.memory_space<vmem>>, vector<1x128xf32>
    %12 = vector.broadcast %11 : vector<1x128xf32> to vector<128x128xf32>
    %13 = arith.addf %10, %12 : vector<128x128xf32>
    %cst_9 = arith.constant 0.000000e+00 : f32
    %14 = vector.broadcast %cst_9 : f32 to vector<128x128xf32>
    %15 = arith.maximumf %13, %14 : vector<128x128xf32>
    %16 = arith.truncf %15 : vector<128x128xf32> to vector<128x128xbf16>
    %c0_10 = arith.constant 0 : index
    %c0_11 = arith.constant 0 : index
    %17 = vector.load %arg12[%c0_10, %c0_11] : memref<128x1024xbf16, #tpu.memory_space<vmem>>, vector<128x1024xbf16>
    %cst_12 = arith.constant dense<0.000000e+00> : vector<128x1024xf32>
    %18 = tpu.matmul %16, %17, %cst_12 {dimension_numbers = #tpu.dot_dimension_numbers<[1], [0], [0], [1], [0, 0, 1, 1], [], []>} : vector<128x128xbf16>, vector<128x1024xbf16>, vector<128x1024xf32> -> vector<128x1024xf32>
    %c0_13 = arith.constant 0 : index
    %c0_14 = arith.constant 0 : index
    %19 = vector.load %arg13[%c0_13, %c0_14] : memref<1x1024xf32, #tpu.memory_space<vmem>>, vector<1x1024xf32>
    %20 = vector.broadcast %19 : vector<1x1024xf32> to vector<128x1024xf32>
    %21 = arith.addf %18, %20 : vector<128x1024xf32>
    %22 = tpu.iota {dimensions = array<i32: 1>} : vector<128x24xi32>
    %c0_15 = arith.constant 0 : index
    %c0_16 = arith.constant 0 : index
    %23 = vector.load %arg3[%c0_15, %c0_16] : memref<128x1xi32, #tpu.memory_space<vmem>>, vector<128x1xi32>
    %24 = vector.broadcast %23 : vector<128x1xi32> to vector<128x24xi32>
    %25 = arith.cmpi eq, %24, %22 : vector<128x24xi32>
    %26 = arith.extui %25 : vector<128x24xi1> to vector<128x24xi32>
    %27 = arith.sitofp %26 : vector<128x24xi32> to vector<128x24xf32>
    %28 = arith.truncf %27 : vector<128x24xf32> to vector<128x24xbf16>
    %29 = tpu.iota {dimensions = array<i32: 0>} : vector<24x128xi32>
    %c0_17 = arith.constant 0 : index
    %c0_18 = arith.constant 0 : index
    %30 = vector.load %arg4[%c0_17, %c0_18] : memref<1x128xi32, #tpu.memory_space<vmem>>, vector<1x128xi32>
    %31 = vector.broadcast %30 : vector<1x128xi32> to vector<24x128xi32>
    %32 = arith.cmpi eq, %31, %29 : vector<24x128xi32>
    %33 = arith.extui %32 : vector<24x128xi1> to vector<24x128xi32>
    %34 = arith.sitofp %33 : vector<24x128xi32> to vector<24x128xf32>
    %35 = arith.truncf %34 : vector<24x128xf32> to vector<24x128xbf16>
    %c0_19 = arith.constant 0 : index
    %c0_20 = arith.constant 0 : index
    %36 = vector.load %arg31[%c0_19, %c0_20] : memref<24x32xf32, #tpu.memory_space<vmem>>, vector<24x32xf32>
    %37 = arith.truncf %36 : vector<24x32xf32> to vector<24x32xbf16>
    %cst_21 = arith.constant dense<0.000000e+00> : vector<128x32xf32>
    %38 = tpu.matmul %28, %37, %cst_21 {dimension_numbers = #tpu.dot_dimension_numbers<[1], [0], [0], [1], [0, 0, 1, 1], [], []>} : vector<128x24xbf16>, vector<24x32xbf16>, vector<128x32xf32> -> vector<128x32xf32>
    %39 = arith.truncf %38 : vector<128x32xf32> to vector<128x32xbf16>
    %c0_22 = arith.constant 0 : index
    %c0_23 = arith.constant 0 : index
    %40 = vector.load %arg14[%c0_22, %c0_23] : memref<32x1024xbf16, #tpu.memory_space<vmem>>, vector<32x1024xbf16>
    %cst_24 = arith.constant dense<0.000000e+00> : vector<128x1024xf32>
    %41 = tpu.matmul %39, %40, %cst_24 {dimension_numbers = #tpu.dot_dimension_numbers<[1], [0], [0], [1], [0, 0, 1, 1], [], []>} : vector<128x32xbf16>, vector<32x1024xbf16>, vector<128x1024xf32> -> vector<128x1024xf32>
    %42 = arith.mulf %41, %21 : vector<128x1024xf32>
    %43 = arith.truncf %42 : vector<128x1024xf32> to vector<128x1024xbf16>
    %c0_25 = arith.constant 0 : index
    %c0_26 = arith.constant 0 : index
    %44 = vector.load %arg15[%c0_25, %c0_26] : memref<1024x32xbf16, #tpu.memory_space<vmem>>, vector<1024x32xbf16>
    %cst_27 = arith.constant dense<0.000000e+00> : vector<128x32xf32>
    %45 = tpu.matmul %43, %44, %cst_27 {dimension_numbers = #tpu.dot_dimension_numbers<[1], [0], [0], [1], [0, 0, 1, 1], [], []>} : vector<128x1024xbf16>, vector<1024x32xbf16>, vector<128x32xf32> -> vector<128x32xf32>
    %c0_28 = arith.constant 0 : index
    %c0_29 = arith.constant 0 : index
    %46 = vector.load %arg33[%c0_28, %c0_29] : memref<24x32xf32, #tpu.memory_space<vmem>>, vector<24x32xf32>
    %47 = arith.truncf %45 : vector<128x32xf32> to vector<128x32xbf16>
    %cst_30 = arith.constant dense<0.000000e+00> : vector<24x32xf32>
    %48 = tpu.matmul %35, %47, %cst_30 {dimension_numbers = #tpu.dot_dimension_numbers<[1], [0], [0], [1], [0, 0, 1, 1], [], []>} : vector<24x128xbf16>, vector<128x32xbf16>, vector<24x32xf32> -> vector<24x32xf32>
    %49 = arith.addf %46, %48 : vector<24x32xf32>
    %c0_31 = arith.constant 0 : index
    %c0_32 = arith.constant 0 : index
    %50 = vector.load %arg33[%c0_31, %c0_32] : memref<24x32xf32, #tpu.memory_space<vmem>>, vector<24x32xf32>
    tpu.vector_store %arg33[%c0_31, %c0_32], %49 {strides = array<i32>} : memref<24x32xf32, #tpu.memory_space<vmem>>, vector<24x32xf32>,
    %c2_i32 = arith.constant 2 : i32
    %51 = arith.cmpi eq, %arg1, %c2_i32 : i32
    %52 = arith.extui %51 : i1 to i32
    %c0_i32_33 = arith.constant 0 : i32
    %53 = arith.cmpi ne, %52, %c0_i32_33 : i32
    scf.if %53 {
      %c0_34 = arith.constant 0 : index
      %c0_35 = arith.constant 0 : index
      %54 = vector.load %arg32[%c0_34, %c0_35] : memref<24x32xf32, #tpu.memory_space<vmem>>, vector<24x32xf32>
      %c0_36 = arith.constant 0 : index
      %c0_37 = arith.constant 0 : index
      %55 = vector.load %arg31[%c0_36, %c0_37] : memref<24x32xf32, #tpu.memory_space<vmem>>, vector<24x32xf32>
      %c0_38 = arith.constant 0 : index
      %c0_39 = arith.constant 0 : index
      %56 = vector.load %arg33[%c0_38, %c0_39] : memref<24x32xf32, #tpu.memory_space<vmem>>, vector<24x32xf32>
      %c0_40 = arith.constant 0 : index
      %c0_41 = arith.constant 0 : index
      %57 = vector.load %arg6[%c0_40, %c0_41] : memref<24x1xf32, #tpu.memory_space<vmem>>, vector<24x1xf32>
      %58 = vector.broadcast %57 : vector<24x1xf32> to vector<24x32xf32>
      %59 = arith.mulf %56, %58 : vector<24x32xf32>
      %60 = arith.truncf %55 : vector<24x32xf32> to vector<24x32xbf16>
      %c0_42 = arith.constant 0 : index
      %c0_43 = arith.constant 0 : index
      %61 = vector.load %arg16[%c0_42, %c0_43] : memref<32x32xbf16, #tpu.memory_space<vmem>>, vector<32x32xbf16>
      %cst_44 = arith.constant dense<0.000000e+00> : vector<24x32xf32>
      %62 = tpu.matmul %60, %61, %cst_44 {dimension_numbers = #tpu.dot_dimension_numbers<[1], [0], [0], [1], [0, 0, 1, 1], [], []>} : vector<24x32xbf16>, vector<32x32xbf16>, vector<24x32xf32> -> vector<24x32xf32>
      %63 = arith.addf %59, %62 : vector<24x32xf32>
      %c0_45 = arith.constant 0 : index
      %c0_46 = arith.constant 0 : index
      %64 = vector.load %arg17[%c0_45, %c0_46] : memref<1x32xf32, #tpu.memory_space<vmem>>, vector<1x32xf32>
      %65 = vector.broadcast %64 : vector<1x32xf32> to vector<24x32xf32>
      %66 = arith.addf %63, %65 : vector<24x32xf32>
      %cst_47 = arith.constant 0.000000e+00 : f32
      %67 = vector.broadcast %cst_47 : f32 to vector<24x32xf32>
      %68 = arith.maximumf %66, %67 : vector<24x32xf32>
      %69 = arith.truncf %68 : vector<24x32xf32> to vector<24x32xbf16>
      %c0_48 = arith.constant 0 : index
      %c0_49 = arith.constant 0 : index
      %70 = vector.load %arg18[%c0_48, %c0_49] : memref<32x96xbf16, #tpu.memory_space<vmem>>, vector<32x96xbf16>
      %cst_50 = arith.constant dense<0.000000e+00> : vector<24x96xf32>
      %71 = tpu.matmul %69, %70, %cst_50 {dimension_numbers = #tpu.dot_dimension_numbers<[1], [0], [0], [1], [0, 0, 1, 1], [], []>} : vector<24x32xbf16>, vector<32x96xbf16>, vector<24x96xf32> -> vector<24x96xf32>
      %c0_51 = arith.constant 0 : index
      %c0_52 = arith.constant 0 : index
      %72 = vector.load %arg20[%c0_51, %c0_52] : memref<1x96xf32, #tpu.memory_space<vmem>>, vector<1x96xf32>
      %73 = vector.broadcast %72 : vector<1x96xf32> to vector<24x96xf32>
      %74 = arith.addf %71, %73 : vector<24x96xf32>
      %75 = arith.truncf %54 : vector<24x32xf32> to vector<24x32xbf16>
      %c0_53 = arith.constant 0 : index
      %c0_54 = arith.constant 0 : index
      %76 = vector.load %arg19[%c0_53, %c0_54] : memref<32x96xbf16, #tpu.memory_space<vmem>>, vector<32x96xbf16>
      %cst_55 = arith.constant dense<0.000000e+00> : vector<24x96xf32>
      %77 = tpu.matmul %75, %76, %cst_55 {dimension_numbers = #tpu.dot_dimension_numbers<[1], [0], [0], [1], [0, 0, 1, 1], [], []>} : vector<24x32xbf16>, vector<32x96xbf16>, vector<24x96xf32> -> vector<24x96xf32>
      %c0_56 = arith.constant 0 : index
      %c0_57 = arith.constant 0 : index
      %78 = vector.load %arg21[%c0_56, %c0_57] : memref<1x96xf32, #tpu.memory_space<vmem>>, vector<1x96xf32>
      %79 = vector.broadcast %78 : vector<1x96xf32> to vector<24x96xf32>
      %80 = arith.addf %77, %79 : vector<24x96xf32>
      %81 = vector.extract_strided_slice %74 {offsets = [0, 0], sizes = [24, 64], strides = [1, 1]} : vector<24x96xf32> to vector<24x64xf32>
      %82 = vector.extract_strided_slice %80 {offsets = [0, 0], sizes = [24, 64], strides = [1, 1]} : vector<24x96xf32> to vector<24x64xf32>
      %83 = arith.addf %81, %82 : vector<24x64xf32>
      %84 = arith.negf %83 : vector<24x64xf32>
      %85 = math.exp %84 : vector<24x64xf32>
      %cst_58 = arith.constant 1.000000e+00 : f32
      %86 = vector.broadcast %cst_58 : f32 to vector<24x64xf32>
      %87 = arith.addf %86, %85 : vector<24x64xf32>
      %88 = arith.divf %86, %87 : vector<24x64xf32>
      %89 = vector.extract_strided_slice %88 {offsets = [0, 0], sizes = [24, 32], strides = [1, 1]} : vector<24x64xf32> to vector<24x32xf32>
      %90 = vector.extract_strided_slice %88 {offsets = [0, 32], sizes = [24, 32], strides = [1, 1]} : vector<24x64xf32> to vector<24x32xf32>
      %91 = vector.extract_strided_slice %74 {offsets = [0, 64], sizes = [24, 32], strides = [1, 1]} : vector<24x96xf32> to vector<24x32xf32>
      %92 = vector.extract_strided_slice %80 {offsets = [0, 64], sizes = [24, 32], strides = [1, 1]} : vector<24x96xf32> to vector<24x32xf32>
      %93 = arith.mulf %89, %92 : vector<24x32xf32>
      %94 = arith.addf %91, %93 : vector<24x32xf32>
      %95 = math.tanh %94 : vector<24x32xf32>
      %cst_59 = arith.constant 1.000000e+00 : f32
      %96 = vector.broadcast %cst_59 : f32 to vector<24x32xf32>
      %97 = arith.subf %96, %90 : vector<24x32xf32>
      %98 = arith.mulf %97, %95 : vector<24x32xf32>
      %99 = arith.mulf %90, %54 : vector<24x32xf32>
      %100 = arith.addf %98, %99 : vector<24x32xf32>
      %c0_60 = arith.constant 0 : index
      %c0_61 = arith.constant 0 : index
      %101 = vector.load %arg31[%c0_60, %c0_61] : memref<24x32xf32, #tpu.memory_space<vmem>>, vector<24x32xf32>
      tpu.vector_store %arg31[%c0_60, %c0_61], %100 {strides = array<i32>} : memref<24x32xf32, #tpu.memory_space<vmem>>, vector<24x32xf32>,
      %c0_62 = arith.constant 0 : index
      %c0_63 = arith.constant 0 : index
      %102 = vector.load %arg32[%c0_62, %c0_63] : memref<24x32xf32, #tpu.memory_space<vmem>>, vector<24x32xf32>
      tpu.vector_store %arg32[%c0_62, %c0_63], %100 {strides = array<i32>} : memref<24x32xf32, #tpu.memory_space<vmem>>, vector<24x32xf32>,
      %c2_i32_64 = arith.constant 2 : i32
      %103 = arith.cmpi eq, %arg0, %c2_i32_64 : i32
      %104 = arith.extui %103 : i1 to i32
      %c0_i32_65 = arith.constant 0 : i32
      %105 = arith.cmpi ne, %104, %c0_i32_65 : i32
      scf.if %105 {
        %106 = arith.truncf %100 : vector<24x32xf32> to vector<24x32xbf16>
        %c0_66 = arith.constant 0 : index
        %c0_67 = arith.constant 0 : index
        %107 = vector.load %arg7[%c0_66, %c0_67] : memref<2x24xf32, #tpu.memory_space<vmem>>, vector<2x24xf32>
        %cst_68 = arith.constant 0.000000e+00 : f32
        %108 = vector.broadcast %cst_68 : f32 to vector<2x24xf32>
        %109 = arith.cmpf ogt, %107, %108 : vector<2x24xf32>
        %cst_69 = arith.constant 0.000000e+00 : f32
        %cst_70 = arith.constant -1.000000e+30 : f32
        %110 = vector.broadcast %cst_69 : f32 to vector<2x24xf32>
        %111 = vector.broadcast %cst_70 : f32 to vector<2x24xf32>
        %112 = arith.select %109, %110, %111 : vector<2x24xi1>, vector<2x24xf32>
        %c0_71 = arith.constant 0 : index
        %c0_72 = arith.constant 0 : index
        %113 = vector.load %arg24[%c0_71, %c0_72] : memref<1x128xf32, #tpu.memory_space<vmem>>, vector<1x128xf32>
        %114 = vector.shape_cast %113 : vector<1x128xf32> to vector<1x128xf32>
        %115 = vector.broadcast %114 : vector<1x128xf32> to vector<2x128xf32>
        %cst_73 = arith.constant 0.000000e+00 : f32
        %116 = vector.broadcast %cst_73 : f32 to vector<2x32xf32>
        %cst_74 = arith.constant 0.000000e+00 : f32
        %117 = vector.broadcast %cst_74 : f32 to vector<2x32xf32>
        %cst_75 = arith.constant 0.000000e+00 : f32
        %118 = vector.broadcast %cst_75 : f32 to vector<2x32xf32>
        %119 = arith.truncf %116 : vector<2x32xf32> to vector<2x32xbf16>
        %c0_76 = arith.constant 0 : index
        %c0_77 = arith.constant 0 : index
        %120 = vector.load %arg22[%c0_76, %c0_77] : memref<32x128xbf16, #tpu.memory_space<vmem>>, vector<32x128xbf16>
        %cst_78 = arith.constant dense<0.000000e+00> : vector<2x128xf32>
        %121 = tpu.matmul %119, %120, %cst_78 {dimension_numbers = #tpu.dot_dimension_numbers<[1], [0], [0], [1], [0, 0, 1, 1], [], []>} : vector<2x32xbf16>, vector<32x128xbf16>, vector<2x128xf32> -> vector<2x128xf32>
        %122 = arith.truncf %118 : vector<2x32xf32> to vector<2x32xbf16>
        %c0_79 = arith.constant 0 : index
        %c0_80 = arith.constant 0 : index
        %123 = vector.load %arg23[%c0_79, %c0_80] : memref<32x128xbf16, #tpu.memory_space<vmem>>, vector<32x128xbf16>
        %cst_81 = arith.constant dense<0.000000e+00> : vector<2x128xf32>
        %124 = tpu.matmul %122, %123, %cst_81 {dimension_numbers = #tpu.dot_dimension_numbers<[1], [0], [0], [1], [0, 0, 1, 1], [], []>} : vector<2x32xbf16>, vector<32x128xbf16>, vector<2x128xf32> -> vector<2x128xf32>
        %125 = arith.addf %121, %124 : vector<2x128xf32>
        %126 = arith.addf %125, %115 : vector<2x128xf32>
        %127 = vector.extract_strided_slice %126 {offsets = [0, 0], sizes = [2, 64], strides = [1, 1]} : vector<2x128xf32> to vector<2x64xf32>
        %128 = arith.negf %127 : vector<2x64xf32>
        %129 = math.exp %128 : vector<2x64xf32>
        %cst_82 = arith.constant 1.000000e+00 : f32
        %130 = vector.broadcast %cst_82 : f32 to vector<2x64xf32>
        %131 = arith.addf %130, %129 : vector<2x64xf32>
        %132 = arith.divf %130, %131 : vector<2x64xf32>
        %133 = vector.extract_strided_slice %126 {offsets = [0, 64], sizes = [2, 32], strides = [1, 1]} : vector<2x128xf32> to vector<2x32xf32>
        %134 = math.tanh %133 : vector<2x32xf32>
        %135 = vector.extract_strided_slice %126 {offsets = [0, 96], sizes = [2, 32], strides = [1, 1]} : vector<2x128xf32> to vector<2x32xf32>
        %136 = arith.negf %135 : vector<2x32xf32>
        %137 = math.exp %136 : vector<2x32xf32>
        %cst_83 = arith.constant 1.000000e+00 : f32
        %138 = vector.broadcast %cst_83 : f32 to vector<2x32xf32>
        %139 = arith.addf %138, %137 : vector<2x32xf32>
        %140 = arith.divf %138, %139 : vector<2x32xf32>
        %141 = vector.extract_strided_slice %132 {offsets = [0, 32], sizes = [2, 32], strides = [1, 1]} : vector<2x64xf32> to vector<2x32xf32>
        %142 = arith.mulf %141, %117 : vector<2x32xf32>
        %143 = vector.extract_strided_slice %132 {offsets = [0, 0], sizes = [2, 32], strides = [1, 1]} : vector<2x64xf32> to vector<2x32xf32>
        %144 = arith.mulf %143, %134 : vector<2x32xf32>
        %145 = arith.addf %142, %144 : vector<2x32xf32>
        %146 = math.tanh %145 : vector<2x32xf32>
        %147 = arith.mulf %140, %146 : vector<2x32xf32>
        %148 = arith.truncf %147 : vector<2x32xf32> to vector<2x32xbf16>
        %cst_84 = arith.constant dense<0.000000e+00> : vector<2x24xf32>
        %149 = tpu.matmul %148, %106, %cst_84 {dimension_numbers = #tpu.dot_dimension_numbers<[1], [1], [0], [0], [0, 0, 1, 0], [], []>} : vector<2x32xbf16>, vector<24x32xbf16>, vector<2x24xf32> -> vector<2x24xf32>
        %150 = arith.addf %149, %112 : vector<2x24xf32>
        %cst_85 = arith.constant dense<0xFF800000> : vector<2xf32>
        %151 = vector.multi_reduction <maximumf>, %150, %cst_85 [1] : vector<2x24xf32> to vector<2xf32>
        %152 = vector.shape_cast %151 : vector<2xf32> to vector<2x1xf32>
        %153 = vector.broadcast %152 : vector<2x1xf32> to vector<2x24xf32>
        %154 = arith.subf %150, %153 : vector<2x24xf32>
        %155 = math.exp %154 : vector<2x24xf32>
        %156 = arith.mulf %155, %107 : vector<2x24xf32>
        %cst_86 = arith.constant dense<0.000000e+00> : vector<2xf32>
        %157 = vector.multi_reduction <add>, %156, %cst_86 [1] : vector<2x24xf32> to vector<2xf32>
        %158 = vector.shape_cast %157 : vector<2xf32> to vector<2x1xf32>
        %cst_87 = arith.constant 9.99999968E-21 : f32
        %159 = vector.broadcast %cst_87 : f32 to vector<2x1xf32>
        %160 = arith.maximumf %158, %159 : vector<2x1xf32>
        %161 = vector.broadcast %160 : vector<2x1xf32> to vector<2x24xf32>
        %162 = arith.divf %156, %161 : vector<2x24xf32>
        %163 = arith.truncf %162 : vector<2x24xf32> to vector<2x24xbf16>
        %cst_88 = arith.constant dense<0.000000e+00> : vector<2x32xf32>
        %164 = tpu.matmul %163, %106, %cst_88 {dimension_numbers = #tpu.dot_dimension_numbers<[1], [0], [0], [1], [0, 0, 1, 1], [], []>} : vector<2x24xbf16>, vector<24x32xbf16>, vector<2x32xf32> -> vector<2x32xf32>
        %165 = arith.truncf %147 : vector<2x32xf32> to vector<2x32xbf16>
        %c0_89 = arith.constant 0 : index
        %c0_90 = arith.constant 0 : index
        %166 = vector.load %arg22[%c0_89, %c0_90] : memref<32x128xbf16, #tpu.memory_space<vmem>>, vector<32x128xbf16>
        %cst_91 = arith.constant dense<0.000000e+00> : vector<2x128xf32>
        %167 = tpu.matmul %165, %166, %cst_91 {dimension_numbers = #tpu.dot_dimension_numbers<[1], [0], [0], [1], [0, 0, 1, 1], [], []>} : vector<2x32xbf16>, vector<32x128xbf16>, vector<2x128xf32> -> vector<2x128xf32>
        %168 = arith.truncf %164 : vector<2x32xf32> to vector<2x32xbf16>
        %c0_92 = arith.constant 0 : index
        %c0_93 = arith.constant 0 : index
        %169 = vector.load %arg23[%c0_92, %c0_93] : memref<32x128xbf16, #tpu.memory_space<vmem>>, vector<32x128xbf16>
        %cst_94 = arith.constant dense<0.000000e+00> : vector<2x128xf32>
        %170 = tpu.matmul %168, %169, %cst_94 {dimension_numbers = #tpu.dot_dimension_numbers<[1], [0], [0], [1], [0, 0, 1, 1], [], []>} : vector<2x32xbf16>, vector<32x128xbf16>, vector<2x128xf32> -> vector<2x128xf32>
        %171 = arith.addf %167, %170 : vector<2x128xf32>
        %172 = arith.addf %171, %115 : vector<2x128xf32>
        %173 = vector.extract_strided_slice %172 {offsets = [0, 0], sizes = [2, 64], strides = [1, 1]} : vector<2x128xf32> to vector<2x64xf32>
        %174 = arith.negf %173 : vector<2x64xf32>
        %175 = math.exp %174 : vector<2x64xf32>
        %cst_95 = arith.constant 1.000000e+00 : f32
        %176 = vector.broadcast %cst_95 : f32 to vector<2x64xf32>
        %177 = arith.addf %176, %175 : vector<2x64xf32>
        %178 = arith.divf %176, %177 : vector<2x64xf32>
        %179 = vector.extract_strided_slice %172 {offsets = [0, 64], sizes = [2, 32], strides = [1, 1]} : vector<2x128xf32> to vector<2x32xf32>
        %180 = math.tanh %179 : vector<2x32xf32>
        %181 = vector.extract_strided_slice %172 {offsets = [0, 96], sizes = [2, 32], strides = [1, 1]} : vector<2x128xf32> to vector<2x32xf32>
        %182 = arith.negf %181 : vector<2x32xf32>
        %183 = math.exp %182 : vector<2x32xf32>
        %cst_96 = arith.constant 1.000000e+00 : f32
        %184 = vector.broadcast %cst_96 : f32 to vector<2x32xf32>
        %185 = arith.addf %184, %183 : vector<2x32xf32>
        %186 = arith.divf %184, %185 : vector<2x32xf32>
        %187 = vector.extract_strided_slice %178 {offsets = [0, 32], sizes = [2, 32], strides = [1, 1]} : vector<2x64xf32> to vector<2x32xf32>
        %188 = arith.mulf %187, %145 : vector<2x32xf32>
        %189 = vector.extract_strided_slice %178 {offsets = [0, 0], sizes = [2, 32], strides = [1, 1]} : vector<2x64xf32> to vector<2x32xf32>
        %190 = arith.mulf %189, %180 : vector<2x32xf32>
        %191 = arith.addf %188, %190 : vector<2x32xf32>
        %192 = math.tanh %191 : vector<2x32xf32>
        %193 = arith.mulf %186, %192 : vector<2x32xf32>
        %194 = arith.truncf %193 : vector<2x32xf32> to vector<2x32xbf16>
        %cst_97 = arith.constant dense<0.000000e+00> : vector<2x24xf32>
        %195 = tpu.matmul %194, %106, %cst_97 {dimension_numbers = #tpu.dot_dimension_numbers<[1], [1], [0], [0], [0, 0, 1, 0], [], []>} : vector<2x32xbf16>, vector<24x32xbf16>, vector<2x24xf32> -> vector<2x24xf32>
        %196 = arith.addf %195, %112 : vector<2x24xf32>
        %cst_98 = arith.constant dense<0xFF800000> : vector<2xf32>
        %197 = vector.multi_reduction <maximumf>, %196, %cst_98 [1] : vector<2x24xf32> to vector<2xf32>
        %198 = vector.shape_cast %197 : vector<2xf32> to vector<2x1xf32>
        %199 = vector.broadcast %198 : vector<2x1xf32> to vector<2x24xf32>
        %200 = arith.subf %196, %199 : vector<2x24xf32>
        %201 = math.exp %200 : vector<2x24xf32>
        %202 = arith.mulf %201, %107 : vector<2x24xf32>
        %cst_99 = arith.constant dense<0.000000e+00> : vector<2xf32>
        %203 = vector.multi_reduction <add>, %202, %cst_99 [1] : vector<2x24xf32> to vector<2xf32>
        %204 = vector.shape_cast %203 : vector<2xf32> to vector<2x1xf32>
        %cst_100 = arith.constant 9.99999968E-21 : f32
        %205 = vector.broadcast %cst_100 : f32 to vector<2x1xf32>
        %206 = arith.maximumf %204, %205 : vector<2x1xf32>
        %207 = vector.broadcast %206 : vector<2x1xf32> to vector<2x24xf32>
        %208 = arith.divf %202, %207 : vector<2x24xf32>
        %209 = arith.truncf %208 : vector<2x24xf32> to vector<2x24xbf16>
        %cst_101 = arith.constant dense<0.000000e+00> : vector<2x32xf32>
        %210 = tpu.matmul %209, %106, %cst_101 {dimension_numbers = #tpu.dot_dimension_numbers<[1], [0], [0], [1], [0, 0, 1, 1], [], []>} : vector<2x24xbf16>, vector<24x32xbf16>, vector<2x32xf32> -> vector<2x32xf32>
        %211 = arith.truncf %193 : vector<2x32xf32> to vector<2x32xbf16>
        %c0_102 = arith.constant 0 : index
        %c0_103 = arith.constant 0 : index
        %212 = vector.load %arg22[%c0_102, %c0_103] : memref<32x128xbf16, #tpu.memory_space<vmem>>, vector<32x128xbf16>
        %cst_104 = arith.constant dense<0.000000e+00> : vector<2x128xf32>
        %213 = tpu.matmul %211, %212, %cst_104 {dimension_numbers = #tpu.dot_dimension_numbers<[1], [0], [0], [1], [0, 0, 1, 1], [], []>} : vector<2x32xbf16>, vector<32x128xbf16>, vector<2x128xf32> -> vector<2x128xf32>
        %214 = arith.truncf %210 : vector<2x32xf32> to vector<2x32xbf16>
        %c0_105 = arith.constant 0 : index
        %c0_106 = arith.constant 0 : index
        %215 = vector.load %arg23[%c0_105, %c0_106] : memref<32x128xbf16, #tpu.memory_space<vmem>>, vector<32x128xbf16>
        %cst_107 = arith.constant dense<0.000000e+00> : vector<2x128xf32>
        %216 = tpu.matmul %214, %215, %cst_107 {dimension_numbers = #tpu.dot_dimension_numbers<[1], [0], [0], [1], [0, 0, 1, 1], [], []>} : vector<2x32xbf16>, vector<32x128xbf16>, vector<2x128xf32> -> vector<2x128xf32>
        %217 = arith.addf %213, %216 : vector<2x128xf32>
        %218 = arith.addf %217, %115 : vector<2x128xf32>
        %219 = vector.extract_strided_slice %218 {offsets = [0, 0], sizes = [2, 64], strides = [1, 1]} : vector<2x128xf32> to vector<2x64xf32>
        %220 = arith.negf %219 : vector<2x64xf32>
        %221 = math.exp %220 : vector<2x64xf32>
        %cst_108 = arith.constant 1.000000e+00 : f32
        %222 = vector.broadcast %cst_108 : f32 to vector<2x64xf32>
        %223 = arith.addf %222, %221 : vector<2x64xf32>
        %224 = arith.divf %222, %223 : vector<2x64xf32>
        %225 = vector.extract_strided_slice %218 {offsets = [0, 64], sizes = [2, 32], strides = [1, 1]} : vector<2x128xf32> to vector<2x32xf32>
        %226 = math.tanh %225 : vector<2x32xf32>
        %227 = vector.extract_strided_slice %218 {offsets = [0, 96], sizes = [2, 32], strides = [1, 1]} : vector<2x128xf32> to vector<2x32xf32>
        %228 = arith.negf %227 : vector<2x32xf32>
        %229 = math.exp %228 : vector<2x32xf32>
        %cst_109 = arith.constant 1.000000e+00 : f32
        %230 = vector.broadcast %cst_109 : f32 to vector<2x32xf32>
        %231 = arith.addf %230, %229 : vector<2x32xf32>
        %232 = arith.divf %230, %231 : vector<2x32xf32>
        %233 = vector.extract_strided_slice %224 {offsets = [0, 32], sizes = [2, 32], strides = [1, 1]} : vector<2x64xf32> to vector<2x32xf32>
        %234 = arith.mulf %233, %191 : vector<2x32xf32>
        %235 = vector.extract_strided_slice %224 {offsets = [0, 0], sizes = [2, 32], strides = [1, 1]} : vector<2x64xf32> to vector<2x32xf32>
        %236 = arith.mulf %235, %226 : vector<2x32xf32>
        %237 = arith.addf %234, %236 : vector<2x32xf32>
        %238 = math.tanh %237 : vector<2x32xf32>
        %239 = arith.mulf %232, %238 : vector<2x32xf32>
        %240 = arith.truncf %239 : vector<2x32xf32> to vector<2x32xbf16>
        %cst_110 = arith.constant dense<0.000000e+00> : vector<2x24xf32>
        %241 = tpu.matmul %240, %106, %cst_110 {dimension_numbers = #tpu.dot_dimension_numbers<[1], [1], [0], [0], [0, 0, 1, 0], [], []>} : vector<2x32xbf16>, vector<24x32xbf16>, vector<2x24xf32> -> vector<2x24xf32>
        %242 = arith.addf %241, %112 : vector<2x24xf32>
        %cst_111 = arith.constant dense<0xFF800000> : vector<2xf32>
        %243 = vector.multi_reduction <maximumf>, %242, %cst_111 [1] : vector<2x24xf32> to vector<2xf32>
        %244 = vector.shape_cast %243 : vector<2xf32> to vector<2x1xf32>
        %245 = vector.broadcast %244 : vector<2x1xf32> to vector<2x24xf32>
        %246 = arith.subf %242, %245 : vector<2x24xf32>
        %247 = math.exp %246 : vector<2x24xf32>
        %248 = arith.mulf %247, %107 : vector<2x24xf32>
        %cst_112 = arith.constant dense<0.000000e+00> : vector<2xf32>
        %249 = vector.multi_reduction <add>, %248, %cst_112 [1] : vector<2x24xf32> to vector<2xf32>
        %250 = vector.shape_cast %249 : vector<2xf32> to vector<2x1xf32>
        %cst_113 = arith.constant 9.99999968E-21 : f32
        %251 = vector.broadcast %cst_113 : f32 to vector<2x1xf32>
        %252 = arith.maximumf %250, %251 : vector<2x1xf32>
        %253 = vector.broadcast %252 : vector<2x1xf32> to vector<2x24xf32>
        %254 = arith.divf %248, %253 : vector<2x24xf32>
        %255 = arith.truncf %254 : vector<2x24xf32> to vector<2x24xbf16>
        %cst_114 = arith.constant dense<0.000000e+00> : vector<2x32xf32>
        %256 = tpu.matmul %255, %106, %cst_114 {dimension_numbers = #tpu.dot_dimension_numbers<[1], [0], [0], [1], [0, 0, 1, 1], [], []>} : vector<2x24xbf16>, vector<24x32xbf16>, vector<2x32xf32> -> vector<2x32xf32>
        %257 = arith.truncf %239 : vector<2x32xf32> to vector<2x32xbf16>
        %c0_115 = arith.constant 0 : index
        %c0_116 = arith.constant 0 : index
        %258 = vector.load %arg25[%c0_115, %c0_116] : memref<32x32xbf16, #tpu.memory_space<vmem>>, vector<32x32xbf16>
        %cst_117 = arith.constant dense<0.000000e+00> : vector<2x32xf32>
        %259 = tpu.matmul %257, %258, %cst_117 {dimension_numbers = #tpu.dot_dimension_numbers<[1], [0], [0], [1], [0, 0, 1, 1], [], []>} : vector<2x32xbf16>, vector<32x32xbf16>, vector<2x32xf32> -> vector<2x32xf32>
        %260 = arith.truncf %256 : vector<2x32xf32> to vector<2x32xbf16>
        %c0_118 = arith.constant 0 : index
        %c0_119 = arith.constant 0 : index
        %261 = vector.load %arg26[%c0_118, %c0_119] : memref<32x32xbf16, #tpu.memory_space<vmem>>, vector<32x32xbf16>
        %cst_120 = arith.constant dense<0.000000e+00> : vector<2x32xf32>
        %262 = tpu.matmul %260, %261, %cst_120 {dimension_numbers = #tpu.dot_dimension_numbers<[1], [0], [0], [1], [0, 0, 1, 1], [], []>} : vector<2x32xbf16>, vector<32x32xbf16>, vector<2x32xf32> -> vector<2x32xf32>
        %263 = arith.addf %259, %262 : vector<2x32xf32>
        %c0_121 = arith.constant 0 : index
        %c0_122 = arith.constant 0 : index
        %264 = vector.load %arg27[%c0_121, %c0_122] : memref<1x32xf32, #tpu.memory_space<vmem>>, vector<1x32xf32>
        %265 = vector.broadcast %264 : vector<1x32xf32> to vector<2x32xf32>
        %266 = arith.addf %263, %265 : vector<2x32xf32>
        %cst_123 = arith.constant 0.000000e+00 : f32
        %267 = vector.broadcast %cst_123 : f32 to vector<2x32xf32>
        %268 = arith.maximumf %266, %267 : vector<2x32xf32>
        %269 = arith.truncf %268 : vector<2x32xf32> to vector<2x32xbf16>
        %c0_124 = arith.constant 0 : index
        %c0_125 = arith.constant 0 : index
        %270 = vector.load %arg28[%c0_124, %c0_125] : memref<32x1xbf16, #tpu.memory_space<vmem>>, vector<32x1xbf16>
        %cst_126 = arith.constant dense<0.000000e+00> : vector<2x1xf32>
        %271 = tpu.matmul %269, %270, %cst_126 {dimension_numbers = #tpu.dot_dimension_numbers<[1], [0], [0], [1], [0, 0, 1, 1], [], []>} : vector<2x32xbf16>, vector<32x1xbf16>, vector<2x1xf32> -> vector<2x1xf32>
        %c0_127 = arith.constant 0 : index
        %c0_128 = arith.constant 0 : index
        %272 = vector.load %arg29[%c0_127, %c0_128] : memref<1x1xf32, #tpu.memory_space<vmem>>, vector<1x1xf32>
        %273 = vector.broadcast %272 : vector<1x1xf32> to vector<2x1xf32>
        %274 = arith.addf %271, %273 : vector<2x1xf32>
        %c0_129 = arith.constant 0 : index
        %c0_130 = arith.constant 0 : index
        %275 = vector.load %arg30[%c0_129, %c0_130] : memref<2x1xf32, #tpu.memory_space<vmem>>, vector<2x1xf32>
        tpu.vector_store %arg30[%c0_129, %c0_130], %274 {strides = array<i32>} : memref<2x1xf32, #tpu.memory_space<vmem>>, vector<2x1xf32>,
      } else {
      }
    } else {
    }
    return
  }
  func.func @transform_0(%arg0: i32, %arg1: i32) -> (i32, i32) {
    %c0_i32 = arith.constant 0 : i32
    %c0_i32_0 = arith.constant 0 : i32
    return %arg1, %c0_i32 : i32, i32
  }
  func.func @transform_1(%arg0: i32, %arg1: i32) -> (i32, i32) {
    %c0_i32 = arith.constant 0 : i32
    %c0_i32_0 = arith.constant 0 : i32
    return %arg1, %c0_i32 : i32, i32
  }
  func.func @transform_2(%arg0: i32, %arg1: i32) -> (i32, i32) {
    %c0_i32 = arith.constant 0 : i32
    %c0_i32_0 = arith.constant 0 : i32
    return %c0_i32, %arg1 : i32, i32
  }
  func.func @transform_3(%arg0: i32, %arg1: i32) -> (i32, i32) {
    %c0_i32 = arith.constant 0 : i32
    %c0_i32_0 = arith.constant 0 : i32
    %c0_i32_1 = arith.constant 0 : i32
    return %c0_i32, %c0_i32_0 : i32, i32
  }
  func.func @transform_4(%arg0: i32, %arg1: i32) -> (i32, i32) {
    %c0_i32 = arith.constant 0 : i32
    %c0_i32_0 = arith.constant 0 : i32
    %c0_i32_1 = arith.constant 0 : i32
    return %c0_i32, %c0_i32_0 : i32, i32
  }
  func.func @transform_5(%arg0: i32, %arg1: i32) -> (i32, i32) {
    %c0_i32 = arith.constant 0 : i32
    %c0_i32_0 = arith.constant 0 : i32
    %c0_i32_1 = arith.constant 0 : i32
    return %c0_i32, %c0_i32_0 : i32, i32
  }
  func.func @transform_6(%arg0: i32, %arg1: i32) -> (i32, i32) {
    %c0_i32 = arith.constant 0 : i32
    %c0_i32_0 = arith.constant 0 : i32
    %c0_i32_1 = arith.constant 0 : i32
    return %c0_i32, %c0_i32_0 : i32, i32
  }
  func.func @transform_7(%arg0: i32, %arg1: i32) -> (i32, i32) {
    %c0_i32 = arith.constant 0 : i32
    %c0_i32_0 = arith.constant 0 : i32
    %c0_i32_1 = arith.constant 0 : i32
    return %c0_i32, %c0_i32_0 : i32, i32
  }
  func.func @transform_8(%arg0: i32, %arg1: i32) -> (i32, i32) {
    %c0_i32 = arith.constant 0 : i32
    %c0_i32_0 = arith.constant 0 : i32
    %c0_i32_1 = arith.constant 0 : i32
    return %c0_i32, %c0_i32_0 : i32, i32
  }
  func.func @transform_9(%arg0: i32, %arg1: i32) -> (i32, i32) {
    %c0_i32 = arith.constant 0 : i32
    %c0_i32_0 = arith.constant 0 : i32
    %c0_i32_1 = arith.constant 0 : i32
    return %c0_i32, %c0_i32_0 : i32, i32
  }
  func.func @transform_10(%arg0: i32, %arg1: i32) -> (i32, i32) {
    %c0_i32 = arith.constant 0 : i32
    %c0_i32_0 = arith.constant 0 : i32
    %c0_i32_1 = arith.constant 0 : i32
    return %c0_i32, %c0_i32_0 : i32, i32
  }
  func.func @transform_11(%arg0: i32, %arg1: i32) -> (i32, i32) {
    %c0_i32 = arith.constant 0 : i32
    %c0_i32_0 = arith.constant 0 : i32
    %c0_i32_1 = arith.constant 0 : i32
    return %c0_i32, %c0_i32_0 : i32, i32
  }
  func.func @transform_12(%arg0: i32, %arg1: i32) -> (i32, i32) {
    %c0_i32 = arith.constant 0 : i32
    %c0_i32_0 = arith.constant 0 : i32
    %c0_i32_1 = arith.constant 0 : i32
    return %c0_i32, %c0_i32_0 : i32, i32
  }
  func.func @transform_13(%arg0: i32, %arg1: i32) -> (i32, i32) {
    %c0_i32 = arith.constant 0 : i32
    %c0_i32_0 = arith.constant 0 : i32
    %c0_i32_1 = arith.constant 0 : i32
    return %c0_i32, %c0_i32_0 : i32, i32
  }
  func.func @transform_14(%arg0: i32, %arg1: i32) -> (i32, i32) {
    %c0_i32 = arith.constant 0 : i32
    %c0_i32_0 = arith.constant 0 : i32
    %c0_i32_1 = arith.constant 0 : i32
    return %c0_i32, %c0_i32_0 : i32, i32
  }
  func.func @transform_15(%arg0: i32, %arg1: i32) -> (i32, i32) {
    %c0_i32 = arith.constant 0 : i32
    %c0_i32_0 = arith.constant 0 : i32
    %c0_i32_1 = arith.constant 0 : i32
    return %c0_i32, %c0_i32_0 : i32, i32
  }
  func.func @transform_16(%arg0: i32, %arg1: i32) -> (i32, i32) {
    %c0_i32 = arith.constant 0 : i32
    %c0_i32_0 = arith.constant 0 : i32
    %c0_i32_1 = arith.constant 0 : i32
    return %c0_i32, %c0_i32_0 : i32, i32
  }
  func.func @transform_17(%arg0: i32, %arg1: i32) -> (i32, i32) {
    %c0_i32 = arith.constant 0 : i32
    %c0_i32_0 = arith.constant 0 : i32
    %c0_i32_1 = arith.constant 0 : i32
    return %c0_i32, %c0_i32_0 : i32, i32
  }
  func.func @transform_18(%arg0: i32, %arg1: i32) -> (i32, i32) {
    %c0_i32 = arith.constant 0 : i32
    %c0_i32_0 = arith.constant 0 : i32
    %c0_i32_1 = arith.constant 0 : i32
    return %c0_i32, %c0_i32_0 : i32, i32
  }
  func.func @transform_19(%arg0: i32, %arg1: i32) -> (i32, i32) {
    %c0_i32 = arith.constant 0 : i32
    %c0_i32_0 = arith.constant 0 : i32
    %c0_i32_1 = arith.constant 0 : i32
    return %c0_i32, %c0_i32_0 : i32, i32
  }
  func.func @transform_20(%arg0: i32, %arg1: i32) -> (i32, i32) {
    %c0_i32 = arith.constant 0 : i32
    %c0_i32_0 = arith.constant 0 : i32
    %c0_i32_1 = arith.constant 0 : i32
    return %c0_i32, %c0_i32_0 : i32, i32
  }
  func.func @transform_21(%arg0: i32, %arg1: i32) -> (i32, i32) {
    %c0_i32 = arith.constant 0 : i32
    %c0_i32_0 = arith.constant 0 : i32
    %c0_i32_1 = arith.constant 0 : i32
    return %c0_i32, %c0_i32_0 : i32, i32
  }
  func.func @transform_22(%arg0: i32, %arg1: i32) -> (i32, i32) {
    %c0_i32 = arith.constant 0 : i32
    %c0_i32_0 = arith.constant 0 : i32
    %c0_i32_1 = arith.constant 0 : i32
    return %c0_i32, %c0_i32_0 : i32, i32
  }
  func.func @transform_23(%arg0: i32, %arg1: i32) -> (i32, i32) {
    %c0_i32 = arith.constant 0 : i32
    %c0_i32_0 = arith.constant 0 : i32
    %c0_i32_1 = arith.constant 0 : i32
    return %c0_i32, %c0_i32_0 : i32, i32
  }
  func.func @transform_24(%arg0: i32, %arg1: i32) -> (i32, i32) {
    %c0_i32 = arith.constant 0 : i32
    %c0_i32_0 = arith.constant 0 : i32
    %c0_i32_1 = arith.constant 0 : i32
    return %c0_i32, %c0_i32_0 : i32, i32
  }
  func.func @transform_25(%arg0: i32, %arg1: i32) -> (i32, i32) {
    %c0_i32 = arith.constant 0 : i32
    %c0_i32_0 = arith.constant 0 : i32
    %c0_i32_1 = arith.constant 0 : i32
    return %c0_i32, %c0_i32_0 : i32, i32
  }
  func.func @transform_26(%arg0: i32, %arg1: i32) -> (i32, i32) {
    %c0_i32 = arith.constant 0 : i32
    %c0_i32_0 = arith.constant 0 : i32
    %c0_i32_1 = arith.constant 0 : i32
    return %c0_i32, %c0_i32_0 : i32, i32
  }
  func.func @transform_27(%arg0: i32, %arg1: i32) -> (i32, i32) {
    %c0_i32 = arith.constant 0 : i32
    %c0_i32_0 = arith.constant 0 : i32
    %c0_i32_1 = arith.constant 0 : i32
    return %c0_i32, %c0_i32_0 : i32, i32
  }
  func.func @transform_28(%arg0: i32, %arg1: i32) -> (i32, i32) {
    %c0_i32 = arith.constant 0 : i32
    %c0_i32_0 = arith.constant 0 : i32
    %c0_i32_1 = arith.constant 0 : i32
    return %c0_i32, %c0_i32_0 : i32, i32
  }
}

</mosaic_0001>

<bundles_post_ra>
// kernel: net_forward.1
= control target key start
LH: loop header
LB: loop body
LE: loop exit
PB: predicated region body
PF: predicated region fallthrough
CT: control target
= control target key end

     0   :  { %s6707_s30 = smov 0   ;;  %s8423_s0 = inlined_call_operand.vmem [shape: bf16[384,5], index: 0, kind: input, shape index: {}]   ;;  %s8424_s1 = inlined_call_operand.vmem [shape: s32[384,1], index: 1, kind: input, shape index: {}]   ;;  %s8425_s2 = inlined_call_operand.vmem [shape: s32[1,384], index: 2, kind: input, shape index: {}]   ;;  %s8426_s3 = inlined_call_operand.vmem [shape: bf16[24,11], index: 3, kind: input, shape index: {}]   ;;  %s8427_s4 = inlined_call_operand.vmem [shape: f32[24,1], index: 4, kind: input, shape index: {}]   ;;  %s8428_s5 = inlined_call_operand.vmem [shape: f32[2,24], index: 5, kind: input, shape index: {}]   ;;  %s8429_s6 = inlined_call_operand.vmem [shape: bf16[11,32], index: 6, kind: input, shape index: {}]   ;;  %s8430_s7 = inlined_call_operand.vmem [shape: f32[1,32], index: 7, kind: input, shape index: {}]   ;;  %s8431_s8 = inlined_call_operand.vmem [shape: bf16[5,128], index: 8, kind: input, shape index: {}]   ;;  %s8432_s9 = inlined_call_operand.vmem [shape: f32[1,128], index: 9, kind: input, shape index: {}]   ;;  %s8433_s10 = inlined_call_operand.vmem [shape: bf16[128,1024], index: 10, kind: input, shape index: {}]   ;;  %s8434_s11 = inlined_call_operand.vmem [shape: f32[1,1024], index: 11, kind: input, shape index: {}]   ;;  %s8435_s12 = inlined_call_operand.vmem [shape: bf16[32,1024], index: 12, kind: input, shape index: {}]   ;;  %s8436_s13 = inlined_call_operand.vmem [shape: bf16[1024,32], index: 13, kind: input, shape index: {}]   ;;  %s8437_s14 = inlined_call_operand.vmem [shape: bf16[32,32], index: 14, kind: input, shape index: {}]   ;;  %s8438_s15 = inlined_call_operand.vmem [shape: f32[1,32], index: 15, kind: input, shape index: {}]   ;;  %s8439_s16 = inlined_call_operand.vmem [shape: bf16[32,96], index: 16, kind: input, shape index: {}]   ;;  %s8440_s17 = inlined_call_operand.vmem [shape: bf16[32,96], index: 17, kind: input, shape index: {}]   ;;  %s8441_s18 = inlined_call_operand.vmem [shape: f32[1,96], index: 18, kind: input, shape index: {}]   ;;  %s8442_s19 = inlined_call_operand.vmem [shape: f32[1,96], index: 19, kind: input, shape index: {}]   ;;  %s8443_s20 = inlined_call_operand.vmem [shape: bf16[32,128], index: 20, kind: input, shape index: {}]   ;;  %s8444_s21 = inlined_call_operand.vmem [shape: bf16[32,128], index: 21, kind: input, shape index: {}]   ;;  %s8445_s22 = inlined_call_operand.vmem [shape: f32[1,128], index: 22, kind: input, shape index: {}]   ;;  %s8446_s23 = inlined_call_operand.vmem [shape: bf16[32,32], index: 23, kind: input, shape index: {}]   ;;  %s8447_s24 = inlined_call_operand.vmem [shape: bf16[32,32], index: 24, kind: input, shape index: {}]   ;;  %s8448_s25 = inlined_call_operand.vmem [shape: f32[1,32], index: 25, kind: input, shape index: {}]   ;;  %s8449_s26 = inlined_call_operand.vmem [shape: bf16[32,1], index: 26, kind: input, shape index: {}]   ;;  %s8450_s27 = inlined_call_operand.<no memory space> [shape: f32[1,1], index: 27, kind: input, shape index: {}]   ;;  %s8451_s28 = inlined_call_operand.vmem [shape: f32[2,1], index: 28, kind: output, shape index: {}]  }
   0x1   :  { %8469 = sst [smem:[#allocation99_spill]] %s8423_s0  ;;  %v33_v0 = vstv %s8450_s27 }
   0x2   :  { %8470 = sst [smem:[#allocation100_spill]] %s8424_s1  ;;  %34 = vst [vmem:[#allocation5] sm:$0x1] %v33_v0 }
   0x3   :  { %8471 = sst [smem:[#allocation101_spill]] %s8425_s2 }
   0x4   :  { %8472 = sst [smem:[#allocation102_spill]] %s8426_s3  ;;  %s6709_s3 = smov 0  }
   0x5   :  { %8473 = sst [smem:[#allocation103_spill]] %s8427_s4 }
   0x6   :  { %8474 = sst [smem:[#allocation104_spill]] %s8428_s5 }
   0x7   :  { %8475 = sst [smem:[#allocation105_spill]] %s8429_s6  ;;  %s6711_s6 = smov 0  }
   0x8   :  { %8476 = sst [smem:[#allocation106_spill]] %s8430_s7 }
   0x9   :  { %8477 = sst [smem:[#allocation107_spill]] %s8431_s8 }
   0xa   :  { %8478 = sst [smem:[#allocation108_spill]] %s8432_s9  ;;  %s6705_s9 = smov 0  }
   0xb   :  { %8479 = sst [smem:[#allocation109_spill]] %s8433_s10  ;;  %s6713_s10 = smov 0  }
   0xc   :  { %8480 = sst [smem:[#allocation110_spill]] %s8434_s11 }
   0xd   :  { %8481 = sst [smem:[#allocation111_spill]] %s8435_s12 }
   0xe   :  { %8482 = sst [smem:[#allocation112_spill]] %s8446_s23 }
   0xf   :  { %8483 = sst [smem:[#allocation113_spill]] %s8447_s24 }
  0x10   :  { %8484 = sst [smem:[#allocation114_spill]] %s8448_s25 }
  0x11   :  { %8485 = sst [smem:[#allocation115_spill]] %s8449_s26 }
  0x12   :  { %8486 = sst [smem:[#allocation116_spill]] %s8451_s28 }
  0x13 LB: > { %8487 = sst [smem:[#allocation6_spill]] %s6530_s3  ;;  %s49_s27 = sadd.s32 1, %s6530_s3  ;;  %s6538_s10 = sphi %s6713_s10, %s40_s10   ;;  %s6534_s6 = sphi %s6711_s6, %s8697_s6   ;;  %s6530_s3 = sphi %s6709_s3, %s8696_s3   ;;  %s6526_s30 = sphi %s6707_s30, %s8695_s30   ;;  %s6522_s9 = sphi %s6705_s9, %s8694_s9  }
  0x14   : > { %8488 = sst [smem:[#allocation7_spill]] %s6534_s6  ;;  %s52_s0 = sadd.s32 1, %s6534_s6 }
  0x15   : > { %8489 = sst [smem:[#allocation8_spill]] %s6538_s10  ;;  %p50_p0 = scmp.ge.s32.totalorder %s49_s27, 3 }
  0x16   : > { %p5447_p1 = scmp.ge.s32.totalorder %s6538_s10, 1  ;;  %p791_p2 = scmp.lt.s32.totalorder %s6538_s10, 10 }
  0x17   : > { %s8699_s27 = smov (%p50_p0, %s49_s27), 0  ;;  %s8701_s0 = smov (!%p50_p0, %s52_s0), %s6534_s6 }
  0x18   : > { %8490 = sst [smem:[#allocation9_spill]] %s8699_s27  ;;  %p792_p3 = pnand %p5447_p1, %p791_p2 }
  0x19   : > { %p54_p4 = scmp.ge.s32.totalorder %s8701_s0, 3 }
  0x1a   : > { %795 = sbr.rel (%p792_p3) target bundleno = 6742 (0x1a56), region = 132 }
  0x1b   : > { %s8703_s0 = smov (%p54_p4, %s8701_s0), 0 }
  0x1c   : > { %8491 = sst [smem:[#allocation10_spill]] %s8703_s0 }
  0x21   : > { %s5448_s11 = sshll.u32 %s6522_s9, 4  ;;  %p880_p5 = scmp.lt.s32.totalorder %s6522_s9, 2 }
  0x22   : > { %p869_p6 = scmp.lt.s32.totalorder %s5448_s11, 47  ;;  %p884_p7 = scmp.eq.s32.totalorder %s6526_s30, 0 }
  0x23   : > { %s6743_s29 = scalar_select %p880_p5, %s6522_s9, 2 }
  0x24   : > { %s8705_s11 = smov (!%p869_p6, %s5448_s11), 47  ;;  %s8492_s12 = sld [smem:[#allocation101_spill]] }
  0x25   : > { %p885_p8 = scmp.eq.s32.totalorder %s6522_s9, 0  ;;  %s5449_s4 = sshll.u32 %s8705_s11, 2 }
  0x26   : > { %s5451_s8 = sshll.u32 %s8705_s11, 3  ;;  %s8493_s27 = sld [smem:[#allocation99_spill]] }
  0x27   : > { %s8494_s28 = sld [smem:[#allocation100_spill]]  ;;  %p886_p9 = pnand %p885_p8, %p884_p7 }
  0x28   : > { %s8495_s23 = sld [smem:[#allocation105_spill]] (!%p886_p9)  ;;  %vm922_vm0 = vcmask (!%p886_p9), 1044480   ;;  %vm923_vm1 = vcmask (!%p886_p9), 1045504   ;;  %s8496_s7 = sld [smem:[#allocation102_spill]] (!%p886_p9)  ;;  %v6540_v3 = vmov (!%p886_p9), 65535   ;;  %vm915_vm2 = vcmask (!%p886_p9), 89088  }
  0x29   : > { %889 = sbr.rel (%p886_p9) target bundleno = 273 (0x111), region = 136  ;;  %v924_v4 = vsel (!%p886_p9), %vm922_vm0, 4294967295, %v6540_v3  ;;  %s8497_s26 = sld [smem:[#allocation106_spill]] (!%p886_p9)  ;;  %vm980_vm3 = vcmask (!%p886_p9), 261120  }
  0x2a   : > { %s882_s1 = scalar_lea.vmem %s8492_s12, %s6743_s29  ;;  %v925_v5 = vsel (!%p886_p9), %vm923_vm1, %v924_v4, 0 }
  0x2c   : > { %s6753_s6 = scalar_lea.vmem %s8493_s27, %s5449_s4 }
  0x2d   : > { %s6758_s25 = scalar_lea.vmem %s8494_s28, %s5451_s8 }
  0x2e   : > { %v6351_v1 = vld [vmem:[%s8495_s23] sm:$0x3f] (!%p886_p9)   ;;  %v6353_v7 = vld [vmem:[%s8496_s7 + $0x8] ss:$0 sps:$4 sm:$0xff] (!%p886_p9)  }
  0x2f   : > { %v6352_v2 = vld [vmem:[%s8496_s7] sm:$0xff] (!%p886_p9)   ;;  %v927_v6 = vand.u32 (!%p886_p9), %v6351_v1, %v925_v5 }
  0x30   : > { %6082 = vmatprep.mubr.msk.bf16.mxu0 %vm915_vm2, %v6352_v2  ;;  %v5452_v8 = vld [vmem:[%s8497_s26] ss:$0 sm:$0xff] }
  0x31   : > { %6080 = vmatprep.subr.bf16.mxu0 %v927_v6 }
  0x32   : > { %6081 = vmatpush3.bf16.msra.mxu0 %v927_v6 }
  0x35   : > { %6083 = vmatmul.mubr.msk.bf16.vlgmr.msra.gmra.mrb[0].mxu0 %vm915_vm2, %v6353_v7 }
 0x108   : > { %v6084_v9 = vpop.f32.mrb[0].mxu0 }
 0x109   : > { %v972_v10 = vadd.f32 %v6084_v9, %v5452_v8  ;;  %v963_v11 = vpop.f32.mrb[1].mxu0 }
 0x10a   : > { %v964_v12 = vadd.f32 %v5452_v8, %v963_v11  ;;  %v6085_v13 = vpop.f32.mrb[2].mxu0 }
 0x10b   : > { %v979_v14 = vmax.f32 %v972_v10, 0.0  ;;  %v966_v15 = vpop.f32.mrb[3].mxu0 }
 0x10c   : > { %v977_v16 = vmax.f32 %v964_v12, 0.0  ;;  %v967_v17 = vadd.f32 %v5452_v8, %v966_v15 }
 0x10d   : > { %983 = vst.msk [vmem:[#allocation2 + $0x10] sm:$0xff] %vm980_vm3, %v979_v14  ;;  %986 = vst.msk [vmem:[#allocation3 + $0x10] sm:$0xff] %vm980_vm3, %v979_v14 }
 0x10e   : > { %981 = vst.msk [vmem:[#allocation2] sm:$0xff] %vm980_vm3, %v977_v16  ;;  %984 = vst.msk [vmem:[#allocation3] sm:$0xff] %vm980_vm3, %v977_v16  ;;  %v978_v18 = vmax.f32 %v967_v17, 0.0 }
 0x110   : > { %982 = vst.msk [vmem:[#allocation2 + $0x8] sm:$0xff] %vm980_vm3, %v978_v18  ;;  %985 = vst.msk [vmem:[#allocation3 + $0x8] sm:$0xff] %vm980_vm3, %v978_v18 }
 0x111 PF: > { %p5458_p10 = scmp.ne.s32.totalorder %s6522_s9, 0 }
 0x112   : > { %vm990_vm4 = vcmask (!%p5458_p10), 261120   ;;  %v6541_v19 = vmov (!%p5458_p10), 0.0  }
 0x113   : > { %989 = sbr.rel (%p5458_p10) target bundleno = 282 (0x11a), region = 140  ;;  %991 = vst.msk [vmem:[#allocation4] sm:$0xff] (!%p5458_p10), %vm990_vm4, %v6541_v19  ;;  %992 = vst.msk [vmem:[#allocation4 + $0x8] sm:$0xff] (!%p5458_p10), %vm990_vm4, %v6541_v19 }
 0x114   : > { %993 = vst.msk [vmem:[#allocation4 + $0x10] sm:$0xff] (!%p5458_p10), %vm990_vm4, %v6541_v19 }
 0x11a PF: > { %s8498_s0 = sld [smem:[#allocation107_spill]]  ;;  %vm1083_vm5 = vcmask 1041408   ;;  %vm1084_vm6 = vcmask 1042432   ;;  %v6356_v21 = vld [vmem:[%s6753_s6] sm:$0xff]   ;;  %v6542_v22 = vmov 65535   ;;  %vm1058_vm7 = vcmask 39936  }
 0x11b   : > { %v1085_v23 = vsel %vm1083_vm5, 4294967295, %v6542_v22  ;;  %6088 = vmatprep.mubr.msk.bf16.mxu0 %vm1058_vm7, %v6356_v21  ;;  %v8463_v26 = vmov 0   ;;  %v6357_v27 = vld [vmem:[%s6753_s6 + $0x8] sm:$0xff]   ;;  %v6358_v28 = vld [vmem:[%s6753_s6 + $0x10] sm:$0xff]   ;;  %v2091_v30 = vld [vmem:[%s6758_s25] sm:$0xff]  ;;  %s8499_s8 = sld [smem:[#allocation109_spill]] }
 0x11c   : > { %v1086_v24 = vsel %vm1084_vm6, %v1085_v23, 0  ;;  %6355 = vset.pattern.permute.xlu1 %v8463_v26  ;;  %6354 = vset.pattern.permute.xlu0 %v8463_v26  ;;  %v2093_v29 = vld [vmem:[%s6758_s25 + $0x10] sm:$0xff]  ;;  %v2094_v33 = vld [vmem:[%s6758_s25 + $0x18] sm:$0xff]  ;;  %v2092_v38 = vld [vmem:[%s6758_s25 + $0x8] sm:$0xff]  ;;  %s8500_s3 = sld [smem:[#allocation108_spill]]  ;;  %vm2261_vm8 = vcmask 1043456  }
 0x11d   : > { %1669 = vmatprep.mubr.bf16.mxu1 %v8463_v26  ;;  %2114 = vperm.xlu1 %6355, %v2093_v29   ;;  %v6359_v43 = vld [vmem:[%s6753_s6 + $0x18] sm:$0xff]   ;;  %v6360_v47 = vld [vmem:[%s6753_s6 + $0x20] sm:$0xff]   ;;  %v2096_v51 = vld [vmem:[%s6758_s25 + $0x28] sm:$0xff]  ;;  %vm2236_vm13 = vcmask 195584   ;;  %s8501_s28 = sld [smem:[#allocation111_spill]]  ;;  %s8593_s23 = sld [smem:[#allocation110_spill]] }
 0x11e   : > { %2108 = vperm.xlu0 %6354, %v2091_v30   ;;  %v2095_v55 = vld [vmem:[%s6758_s25 + $0x20] sm:$0xff]  ;;  %v6361_v63 = vld [vmem:[%s6753_s6 + $0x28] sm:$0xff]   ;;  %v2098_v0 = vld [vmem:[%s6758_s25 + $0x38] sm:$0xff]  ;;  %p5684_p11 = scmp.ne.s32.totalorder %s6522_s9, 2 }
 0x11f   : > { %v6362_v2 = vld [vmem:[%s6753_s6 + $0x30] sm:$0xff]   ;;  %v2100_v8 = vld [vmem:[%s6758_s25 + $0x48] sm:$0xff]  ;;  %v2099_v12 = vld [vmem:[%s6758_s25 + $0x40] sm:$0xff]  ;;  %s8684_s11 = sld [smem:[#allocation103_spill]] (!%p5684_p11)  ;;  %s6548_s24 = smov (!%p5684_p11), 32  }
 0x120   : > { %v1010_v20 = vld [vmem:[%s8498_s0] sm:$0x7]  ;;  %v2097_v3 = vld [vmem:[%s6758_s25 + $0x30] sm:$0xff]  ;;  %v6363_v23 = vld [vmem:[%s6753_s6 + $0x38] sm:$0xff]   ;;  %s6549_s6 = smov (!%p5684_p11), 96   ;;  %p5703_p12 = scmp.ne.s32.totalorder (!%p5684_p11), %s6526_s30, 2 }
 0x121   : > { %v1088_v25 = vand.u32 %v1086_v24, %v1010_v20  ;;  %v1211_v31 = vld [vmem:[%s8499_s8] sm:$0xff]  ;;  %v1212_v35 = vld [vmem:[%s8499_s8 + $0x8] sm:$0xff]  ;;  %2117 = vperm.xlu1 %6355, %v2094_v33   ;;  %v2102_v20 = vld [vmem:[%s6758_s25 + $0x58] sm:$0xff] }
 0x122   : > { %v1215_v32 = vld [vmem:[%s8499_s8 + $0x20] sm:$0xff]  ;;  %v1216_v36 = vld [vmem:[%s8499_s8 + $0x28] sm:$0xff]  ;;  %2111 = vperm.xlu0 %6354, %v2092_v38   ;;  %v2101_v22 = vld [vmem:[%s6758_s25 + $0x50] sm:$0xff] }
 0x123   : > { %6086 = vmatprep.subr.bf16.mxu0 %v1088_v25  ;;  %v5477_v34 = vcombine.high %v1211_v31, %v1215_v32  ;;  %v5476_v37 = vcombine.low %v1211_v31, %v1215_v32  ;;  %v5478_v39 = vcombine.low %v1212_v35, %v1216_v36  ;;  %v5479_v40 = vcombine.high %v1212_v35, %v1216_v36  ;;  %v1219_v41 = vld [vmem:[%s8499_s8 + $0x40] sm:$0xff]  ;;  %v1220_v45 = vld [vmem:[%s8499_s8 + $0x48] sm:$0xff]  ;;  %v2106_v36 = vld [vmem:[%s6758_s25 + $0x78] sm:$0xff] }
 0x124   : > { %6087 = vmatpush3.bf16.msra.mxu0 %v1088_v25  ;;  %v1223_v42 = vld [vmem:[%s8499_s8 + $0x60] sm:$0xff]  ;;  %v1224_v46 = vld [vmem:[%s8499_s8 + $0x68] sm:$0xff] }
 0x125   : > { %1637 = vmatprep.subr.bf16.mxu1 %v5477_v34  ;;  %v5485_v44 = vcombine.high %v1219_v41, %v1223_v42  ;;  %1750 = vmatprep.subr.bf16.mxu0 %v5479_v40  ;;  %v5487_v48 = vcombine.high %v1220_v45, %v1224_v46  ;;  %v1227_v49 = vld [vmem:[%s8499_s8 + $0x80] sm:$0xff]  ;;  %v5484_v52 = vcombine.low %v1219_v41, %v1223_v42  ;;  %v1228_v53 = vld [vmem:[%s8499_s8 + $0x88] sm:$0xff] }
 0x126   : > { %v1231_v50 = vld [vmem:[%s8499_s8 + $0xa0] sm:$0xff]  ;;  %1638 = vmatpush1.bf16.msra.mxu1 %v5476_v37  ;;  %v1232_v54 = vld [vmem:[%s8499_s8 + $0xa8] sm:$0xff]  ;;  %v5486_v56 = vcombine.low %v1220_v45, %v1224_v46  ;;  %2123 = vperm.xlu1 %6355, %v2096_v51   ;;  %v2105_v37 = vld [vmem:[%s6758_s25 + $0x70] sm:$0xff] }
 0x127   : > { %6089 = vmatmul.mubr.msk.bf16.vlgmr.msra.gmra.mrb[0].mxu0 %vm1058_vm7, %v6357_v27  ;;  %1639 = vmatprep.subr.bf16.mxu1 %v5485_v44  ;;  %v5493_v57 = vcombine.high %v1227_v49, %v1231_v50  ;;  %v5495_v58 = vcombine.high %v1228_v53, %v1232_v54  ;;  %v1235_v59 = vld [vmem:[%s8499_s8 + $0xc0] sm:$0xff]  ;;  %v1236_v61 = vld [vmem:[%s8499_s8 + $0xc8] sm:$0xff]  ;;  %v5492_v1 = vcombine.low %v1227_v49, %v1231_v50  ;;  %v1214_v51 = vld [vmem:[%s8499_s8 + $0x18] sm:$0xff] }
 0x128   : > { %6092 = vmatprep.mubr.msk.bf16.mxu0 %vm1058_vm7, %v6358_v28  ;;  %1751 = vmatpush1.bf16.msra.mxu0 %v5478_v39  ;;  %v1239_v60 = vld [vmem:[%s8499_s8 + $0xe0] sm:$0xff]  ;;  %v1240_v62 = vld [vmem:[%s8499_s8 + $0xe8] sm:$0xff]  ;;  %v5494_v4 = vcombine.low %v1228_v53, %v1232_v54 }
 0x129   : > { %1752 = vmatprep.subr.bf16.mxu0 %v5487_v48  ;;  %2120 = vperm.xlu0 %6354, %v2095_v55   ;;  %v5501_v5 = vcombine.high %v1235_v59, %v1239_v60  ;;  %v1243_v6 = vld [vmem:[%s8499_s8 + $0x100] sm:$0xff]  ;;  %v5503_v9 = vcombine.high %v1236_v61, %v1240_v62  ;;  %v1244_v10 = vld [vmem:[%s8499_s8 + $0x108] sm:$0xff]  ;;  %v5500_v13 = vcombine.low %v1235_v59, %v1239_v60  ;;  %v1213_v55 = vld [vmem:[%s8499_s8 + $0x10] sm:$0xff] }
 0x12a   : > { %1640 = vmatpush1.bf16.msra.mxu1 %v5484_v52  ;;  %v1247_v7 = vld [vmem:[%s8499_s8 + $0x120] sm:$0xff]  ;;  %v1248_v11 = vld [vmem:[%s8499_s8 + $0x128] sm:$0xff]  ;;  %2129 = vperm.xlu1 %6355, %v2098_v0   ;;  %v5502_v16 = vcombine.low %v1236_v61, %v1240_v62  ;;  %v1218_v52 = vld [vmem:[%s8499_s8 + $0x38] sm:$0xff] }
 0x12b   : > { %1641 = vmatprep.subr.bf16.mxu1 %v5493_v57  ;;  %v1251_v14 = vld [vmem:[%s8499_s8 + $0x140] sm:$0xff]  ;;  %v5509_v17 = vcombine.high %v1243_v6, %v1247_v7  ;;  %v1252_v18 = vld [vmem:[%s8499_s8 + $0x148] sm:$0xff]  ;;  %v5511_v21 = vcombine.high %v1244_v10, %v1248_v11  ;;  %v5508_v24 = vcombine.low %v1243_v6, %v1247_v7  ;;  %v5510_v25 = vcombine.low %v1244_v10, %v1248_v11  ;;  %v1222_v6 = vld [vmem:[%s8499_s8 + $0x58] sm:$0xff] }
 0x12c   : > { %1753 = vmatpush1.bf16.msra.mxu0 %v5486_v56  ;;  %v1255_v15 = vld [vmem:[%s8499_s8 + $0x160] sm:$0xff]  ;;  %v1256_v19 = vld [vmem:[%s8499_s8 + $0x168] sm:$0xff]  ;;  %v5482_v53 = vcombine.low %v1214_v51, %v1218_v52  ;;  %v5483_v54 = vcombine.high %v1214_v51, %v1218_v52  ;;  %v1217_v56 = vld [vmem:[%s8499_s8 + $0x30] sm:$0xff] }
 0x12d   : > { %1754 = vmatprep.subr.bf16.mxu0 %v5495_v58  ;;  %2126 = vperm.xlu0 %6354, %v2097_v3   ;;  %v5517_v27 = vcombine.high %v1251_v14, %v1255_v15  ;;  %v2104_v28 = vld [vmem:[%s6758_s25 + $0x68] sm:$0xff]  ;;  %v5519_v29 = vcombine.high %v1252_v18, %v1256_v19  ;;  %v2103_v30 = vld [vmem:[%s6758_s25 + $0x60] sm:$0xff]  ;;  %v5516_v31 = vcombine.low %v1251_v14, %v1255_v15  ;;  %v1226_v7 = vld [vmem:[%s8499_s8 + $0x78] sm:$0xff] }
 0x12e   : > { %1642 = vmatpush1.bf16.msra.mxu1 %v5492_v1  ;;  %2135 = vperm.xlu1 %6355, %v2100_v8   ;;  %v5518_v32 = vcombine.low %v1252_v18, %v1256_v19  ;;  %v1259_v33 = vld [vmem:[%s8499_s8 + $0x180] sm:$0xff]  ;;  %v1260_v35 = vld [vmem:[%s8499_s8 + $0x188] sm:$0xff]  ;;  %v5480_v57 = vcombine.low %v1213_v55, %v1217_v56  ;;  %v5481_v58 = vcombine.high %v1213_v55, %v1217_v56  ;;  %v1221_v11 = vld [vmem:[%s8499_s8 + $0x50] sm:$0xff] }
 0x12f   : > { %6093 = vmatmul.mubr.msk.bf16.gmra.mrb[4].mxu0 %vm1058_vm7, %v6359_v43  ;;  %1643 = vmatprep.subr.bf16.mxu1 %v5501_v5  ;;  %v1263_v34 = vld [vmem:[%s8499_s8 + $0x1a0] sm:$0xff]  ;;  %v1264_v39 = vld [vmem:[%s8499_s8 + $0x1a8] sm:$0xff]  ;;  %v5491_v15 = vcombine.high %v1222_v6, %v1226_v7  ;;  %v1230_v18 = vld [vmem:[%s8499_s8 + $0x98] sm:$0xff] }
 0x130   : > { %6096 = vmatprep.mubr.msk.bf16.mxu0 %vm1058_vm7, %v6360_v47  ;;  %1755 = vmatpush1.bf16.msra.mxu0 %v5494_v4  ;;  %v5525_v38 = vcombine.high %v1259_v33, %v1263_v34  ;;  %v5524_v40 = vcombine.low %v1259_v33, %v1263_v34  ;;  %v5526_v41 = vcombine.low %v1260_v35, %v1264_v39  ;;  %v1267_v43 = vld [vmem:[%s8499_s8 + $0x1c0] sm:$0xff]  ;;  %v1268_v45 = vld [vmem:[%s8499_s8 + $0x1c8] sm:$0xff]  ;;  %v1234_v19 = vld [vmem:[%s8499_s8 + $0xb8] sm:$0xff] }
 0x131   : > { %1756 = vmatprep.subr.bf16.mxu0 %v5503_v9  ;;  %2132 = vperm.xlu0 %6354, %v2099_v12   ;;  %v5527_v42 = vcombine.high %v1260_v35, %v1264_v39  ;;  %v1271_v44 = vld [vmem:[%s8499_s8 + $0x1e0] sm:$0xff]  ;;  %v1272_v47 = vld [vmem:[%s8499_s8 + $0x1e8] sm:$0xff]  ;;  %v1225_v12 = vld [vmem:[%s8499_s8 + $0x70] sm:$0xff] }
 0x132   : > { %1644 = vmatpush1.bf16.msra.mxu1 %v5500_v13  ;;  %2141 = vperm.xlu1 %6355, %v2102_v20   ;;  %v5533_v46 = vcombine.high %v1267_v43, %v1271_v44  ;;  %v5534_v48 = vcombine.low %v1268_v45, %v1272_v47  ;;  %v5535_v49 = vcombine.high %v1268_v45, %v1272_v47  ;;  %v6923_v59 = vld [vmem:[%s8500_s3] ss:$0 sm:$0xff]  ;;  %v1229_v33 = vld [vmem:[%s8499_s8 + $0x90] sm:$0xff]  ;;  %v1246_v51 = vld [vmem:[%s8499_s8 + $0x118] sm:$0xff]  ;;  %s6547_s3 = smov (!%p5684_p11), 64  }
 0x133   : > { %1645 = vmatprep.subr.bf16.mxu1 %v5509_v17  ;;  %v5532_v50 = vcombine.low %v1267_v43, %v1271_v44  ;;  %v1233_v34 = vld [vmem:[%s8499_s8 + $0xb0] sm:$0xff]  ;;  %v5498_v43 = vcombine.low %v1230_v18, %v1234_v19  ;;  %v1250_v52 = vld [vmem:[%s8499_s8 + $0x138] sm:$0xff] }
 0x134   : > { %1757 = vmatpush1.bf16.msra.mxu0 %v5502_v16  ;;  %v1237_v39 = vld [vmem:[%s8499_s8 + $0xd0] sm:$0xff]  ;;  %v5497_v44 = vcombine.high %v1229_v33, %v1233_v34 }
 0x135   : > { %1758 = vmatprep.subr.bf16.mxu0 %v5511_v21  ;;  %2138 = vperm.xlu0 %6354, %v2101_v22   ;;  %v5489_v22 = vcombine.high %v1221_v11, %v1225_v12 }
 0x136   : > { %1646 = vmatpush1.bf16.msra.mxu1 %v5508_v24  ;;  %2147 = vperm.xlu1 %6355, %v2104_v28  }
 0x137   : > { %6097 = vmatmul.mubr.msk.bf16.gmra.mrb[8].mxu0 %vm1058_vm7, %v6361_v63  ;;  %1647 = vmatprep.subr.bf16.mxu1 %v5517_v27  ;;  %v5490_v27 = vcombine.low %v1222_v6, %v1226_v7  ;;  %v1253_v6 = vld [vmem:[%s8499_s8 + $0x150] sm:$0xff] }
 0x138   : > { %6100 = vmatprep.mubr.msk.bf16.mxu0 %vm1058_vm7, %v6362_v2  ;;  %1759 = vmatpush1.bf16.msra.mxu0 %v5510_v25  ;;  %v1257_v7 = vld [vmem:[%s8499_s8 + $0x170] sm:$0xff] }
 0x139   : > { %1760 = vmatprep.subr.bf16.mxu0 %v5519_v29  ;;  %2144 = vperm.xlu0 %6354, %v2103_v30   ;;  %v5499_v30 = vcombine.high %v1230_v18, %v1234_v19 }
 0x13a   : > { %1648 = vmatpush1.bf16.msra.mxu1 %v5516_v31  ;;  %2153 = vperm.xlu1 %6355, %v2106_v36   ;;  %v1238_v36 = vld [vmem:[%s8499_s8 + $0xd8] sm:$0xff] }
 0x13b   : > { %1649 = vmatprep.subr.bf16.mxu1 %v5525_v38 }
 0x13c   : > { %1761 = vmatpush1.bf16.msra.mxu0 %v5518_v32  ;;  %v5488_v32 = vcombine.low %v1221_v11, %v1225_v12  ;;  %v5514_v11 = vcombine.low %v1246_v51, %v1250_v52 }
 0x13d   : > { %2150 = vperm.xlu0 %6354, %v2105_v37   ;;  %1762 = vmatprep.subr.bf16.mxu0 %v5527_v42  ;;  %v1242_v37 = vld [vmem:[%s8499_s8 + $0xf8] sm:$0xff] }
 0x13e   : > { %1650 = vmatpush1.bf16.msra.mxu1 %v5524_v40  ;;  %v1241_v40 = vld [vmem:[%s8499_s8 + $0xf0] sm:$0xff]  ;;  %v5507_v47 = vcombine.high %v1238_v36, %v1242_v37 }
 0x13f   : > { %6101 = vmatmul.mubr.msk.bf16.gmra.mrb[12].mxu0 %vm1058_vm7, %v6363_v23  ;;  %1651 = vmatprep.subr.bf16.mxu1 %v5533_v46 }
 0x140   : > { %1782 = vmatprep.mubr.bf16.mxu0 %v8463_v26  ;;  %1763 = vmatpush1.bf16.msra.mxu0 %v5526_v41 }
 0x141   : > { %1764 = vmatprep.subr.bf16.mxu0 %v5535_v49 }
 0x142   : > { %1652 = vmatpush1.bf16.msra.mxu1 %v5532_v50 }
 0x143   : > { %1863 = vmatprep.subr.bf16.mxu1 %v5481_v58 }
 0x144   : > { %1765 = vmatpush1.bf16.msra.mxu0 %v5534_v48  ;;  %v5496_v48 = vcombine.low %v1229_v33, %v1233_v34  ;;  %v1261_v33 = vld [vmem:[%s8499_s8 + $0x190] sm:$0xff] }
 0x145   : > { %1976 = vmatprep.subr.bf16.mxu0 %v5483_v54  ;;  %v1265_v34 = vld [vmem:[%s8499_s8 + $0x1b0] sm:$0xff] }
 0x1fa   : > { %v6090_v60 = vpop.f32.mrb[0].mxu0 }
 0x1fb   : > { %v1133_v61 = vadd.f32 %v6090_v60, %v6923_v59  ;;  %v1124_v62 = vpop.f32.mrb[1].mxu0  ;;  %v5506_v60 = vcombine.low %v1238_v36, %v1242_v37  ;;  %v1274_v36 = vld [vmem:[%s8499_s8 + $0x1f8] sm:$0xff] }
 0x1fc   : > { %v1125_v63 = vadd.f32 %v6923_v59, %v1124_v62  ;;  %v6091_v0 = vpop.f32.mrb[2].mxu0  ;;  %v5515_v62 = vcombine.high %v1246_v51, %v1250_v52 }
 0x1fd   : > { %v1136_v1 = vadd.f32 %v6091_v0, %v6923_v59  ;;  %v1127_v2 = vpop.f32.mrb[3].mxu0  ;;  %v1189_v4 = vmax.f32 %v1133_v61, 0.0  ;;  %v1245_v0 = vld [vmem:[%s8499_s8 + $0x110] sm:$0xff] }
 0x1fe   : > { %v1128_v3 = vadd.f32 %v6923_v59, %v1127_v2  ;;  %v1187_v8 = vmax.f32 %v1125_v63, 0.0  ;;  %v5504_v63 = vcombine.low %v1237_v39, %v1241_v40 }
 0x1ff   : > { %v1190_v5 = vmax.f32 %v1136_v1, 0.0  ;;  %v1249_v1 = vld [vmem:[%s8499_s8 + $0x130] sm:$0xff] }
 0x200   : > { %v1188_v9 = vmax.f32 %v1128_v3, 0.0  ;;  %v1254_v3 = vld [vmem:[%s8499_s8 + $0x158] sm:$0xff]  ;;  %v5513_v12 = vcombine.high %v1245_v0, %v1249_v1 }
 0x201   : > { %v6935_v10 = vpack.c.bf16 %v1190_v5, %v1189_v4  ;;  %v1258_v4 = vld [vmem:[%s8499_s8 + $0x178] sm:$0xff] }
 0x202   : > { %v6943_v13 = vpack.c.bf16 %v1188_v9, %v1187_v8  ;;  %v6094_v14 = vpop.f32.mrb[4].mxu0 }
 0x203   : > { %v1149_v16 = vadd.f32 %v6094_v14, %v6923_v59  ;;  %v1140_v17 = vpop.f32.mrb[5].mxu0 }
 0x204   : > { %1670 = vmatmul.mubr.bf16.vlgmr.msra.gmra.mrb[0].mxu1 %v6943_v13  ;;  %1783 = vmatmul.mubr.bf16.vlgmr.msra.gmra.mrb[16].mxu0 %v6943_v13  ;;  %v1141_v20 = vadd.f32 %v6923_v59, %v1140_v17  ;;  %v6095_v21 = vpop.f32.mrb[6].mxu0  ;;  %v5512_v17 = vcombine.low %v1245_v0, %v1249_v1 }
 0x205   : > { %v1193_v23 = vmax.f32 %v1149_v16, 0.0  ;;  %v1152_v24 = vadd.f32 %v6095_v21, %v6923_v59  ;;  %1977 = vmatpush1.bf16.msra.mxu0 %v5482_v53  ;;  %v1143_v25 = vpop.f32.mrb[7].mxu0  ;;  %1679 = vmatprep.mubr.bf16.mxu1 %v8463_v26  ;;  %v5505_v53 = vcombine.high %v1237_v39, %v1241_v40  ;;  %v5523_v16 = vcombine.high %v1254_v3, %v1258_v4  ;;  %v1262_v21 = vld [vmem:[%s8499_s8 + $0x198] sm:$0xff]  ;;  %v1269_v39 = vld [vmem:[%s8499_s8 + $0x1d0] sm:$0xff] }
 0x206   : > { %v1191_v28 = vmax.f32 %v1141_v20, 0.0  ;;  %v1144_v29 = vadd.f32 %v6923_v59, %v1143_v25  ;;  %1792 = vmatprep.mubr.bf16.mxu0 %v8463_v26  ;;  %1978 = vmatprep.subr.bf16.mxu0 %v5491_v15  ;;  %v5521_v20 = vcombine.high %v1253_v6, %v1257_v7  ;;  %v1273_v40 = vld [vmem:[%s8499_s8 + $0x1f0] sm:$0xff] }
 0x207   : > { %v1194_v31 = vmax.f32 %v1152_v24, 0.0  ;;  %1864 = vmatpush1.bf16.msra.mxu1 %v5480_v57  ;;  %v5536_v51 = vcombine.low %v1269_v39, %v1273_v40 }
 0x208   : > { %v1192_v35 = vmax.f32 %v1144_v29, 0.0  ;;  %1865 = vmatprep.subr.bf16.mxu1 %v5489_v22  ;;  %v1266_v22 = vld [vmem:[%s8499_s8 + $0x1b8] sm:$0xff]  ;;  %v5522_v29 = vcombine.low %v1254_v3, %v1258_v4 }
 0x209   : > { %v6971_v38 = vpack.c.bf16 %v1194_v31, %v1193_v23  ;;  %1979 = vmatpush1.bf16.msra.mxu0 %v5490_v27  ;;  %v5520_v31 = vcombine.low %v1253_v6, %v1257_v7 }
 0x20a   : > { %v6979_v41 = vpack.c.bf16 %v1192_v35, %v1191_v28  ;;  %v6098_v42 = vpop.f32.mrb[8].mxu0  ;;  %1980 = vmatprep.subr.bf16.mxu0 %v5499_v30 }
 0x20b   : > { %v1165_v45 = vadd.f32 %v6098_v42, %v6923_v59  ;;  %v1156_v46 = vpop.f32.mrb[9].mxu0  ;;  %1866 = vmatpush1.bf16.msra.mxu1 %v5488_v32  ;;  %v5531_v32 = vcombine.high %v1262_v21, %v1266_v22 }
 0x20c   : > { %1680 = vmatmul.mubr.bf16.gmra.mrb[4].mxu1 %v6935_v10  ;;  %1793 = vmatmul.mubr.bf16.gmra.mrb[20].mxu0 %v6935_v10  ;;  %v1157_v49 = vadd.f32 %v6923_v59, %v1156_v46  ;;  %v6099_v50 = vpop.f32.mrb[10].mxu0 }
 0x20d   : > { %1689 = vmatprep.mubr.bf16.mxu1 %v8463_v26  ;;  %1802 = vmatprep.mubr.bf16.mxu0 %v8463_v26  ;;  %v1197_v54 = vmax.f32 %v1165_v45, 0.0  ;;  %v1168_v55 = vadd.f32 %v6099_v50, %v6923_v59  ;;  %v1159_v56 = vpop.f32.mrb[11].mxu0  ;;  %v5528_v45 = vcombine.low %v1261_v33, %v1265_v34 }
 0x20e   : > { %v1195_v57 = vmax.f32 %v1157_v49, 0.0  ;;  %1981 = vmatpush1.bf16.msra.mxu0 %v5498_v43  ;;  %v1160_v58 = vadd.f32 %v6923_v59, %v1159_v56  ;;  %1867 = vmatprep.subr.bf16.mxu1 %v5497_v44  ;;  %v5530_v43 = vcombine.low %v1262_v21, %v1266_v22  ;;  %v5529_v44 = vcombine.high %v1261_v33, %v1265_v34  ;;  %v2232_v49 = vld [vmem:[#allocation2 + $0x8] sm:$0xff] }
 0x20f   : > { %v1198_v61 = vmax.f32 %v1168_v55, 0.0  ;;  %1982 = vmatprep.subr.bf16.mxu0 %v5507_v47  ;;  %1868 = vmatpush1.bf16.msra.mxu1 %v5496_v48  ;;  %v5537_v47 = vcombine.high %v1269_v39, %v1273_v40  ;;  %v2231_v48 = vld [vmem:[#allocation2] sm:$0xff] }
 0x210   : > { %v1196_v2 = vmax.f32 %v1160_v58, 0.0  ;;  %1869 = vmatprep.subr.bf16.mxu1 %v5505_v53  ;;  %v2234_v52 = vpack.c.bf16 %v2232_v49, %v2231_v48  ;;  %v2233_v53 = vld [vmem:[#allocation2 + $0x10] sm:$0xff]  ;;  %v2370_v39 = vld [vmem:[%s8501_s28] sm:$0xff] }
 0x211   : > { %v7007_v5 = vpack.c.bf16 %v1198_v61, %v1197_v54  ;;  %v2235_v54 = vpack.c.bf16 %v2233_v53, %v2233_v53  ;;  %v2374_v40 = vld [vmem:[%s8501_s28 + $0x20] sm:$0xff] }
 0x212   : > { %v7015_v8 = vpack.c.bf16 %v1196_v2, %v1195_v57  ;;  %1983 = vmatpush1.bf16.msra.mxu0 %v5506_v60  ;;  %v6102_v9 = vpop.f32.mrb[12].mxu0  ;;  %v8462_v57 = vlaneseq }
 0x213   : > { %v1181_v14 = vadd.f32 %v6102_v9, %v6923_v59  ;;  %v1172_v15 = vpop.f32.mrb[13].mxu0  ;;  %1984 = vmatprep.subr.bf16.mxu0 %v5515_v62  ;;  %1870 = vmatpush1.bf16.msra.mxu1 %v5504_v63  ;;  %v2263_v55 = vsel %vm2261_vm8, %v2235_v54, 0  ;;  %v6544_v63 = vmov 0.0  }
 0x214   : > { %1690 = vmatmul.mubr.bf16.gmra.mrb[8].mxu1 %v6979_v41  ;;  %1803 = vmatmul.mubr.bf16.gmra.mrb[24].mxu0 %v6979_v41  ;;  %v1173_v18 = vadd.f32 %v6923_v59, %v1172_v15  ;;  %v6103_v19 = vpop.f32.mrb[14].mxu0 }
 0x215   : > { %1699 = vmatprep.mubr.bf16.mxu1 %v8463_v26  ;;  %1812 = vmatprep.mubr.bf16.mxu0 %v8463_v26  ;;  %v1201_v23 = vmax.f32 %v1181_v14, 0.0  ;;  %v1184_v24 = vadd.f32 %v6103_v19, %v6923_v59  ;;  %v1175_v25 = vpop.f32.mrb[15].mxu0 }
 0x216   : > { %v1199_v27 = vmax.f32 %v1173_v18, 0.0  ;;  %1985 = vmatpush1.bf16.msra.mxu0 %v5514_v11  ;;  %v1176_v28 = vadd.f32 %v6923_v59, %v1175_v25  ;;  %1871 = vmatprep.subr.bf16.mxu1 %v5513_v12  ;;  %v1270_v59 = vld [vmem:[%s8499_s8 + $0x1d8] sm:$0xff] }
 0x217   : > { %v1202_v30 = vmax.f32 %v1184_v24, 0.0  ;;  %1986 = vmatprep.subr.bf16.mxu0 %v5523_v16  ;;  %1872 = vmatpush1.bf16.msra.mxu1 %v5512_v17  ;;  %v5539_v46 = vcombine.high %v1270_v59, %v1274_v36  ;;  %v5538_v50 = vcombine.low %v1270_v59, %v1274_v36  ;;  %v2375_v59 = vld [vmem:[%s8501_s28 + $0x28] sm:$0xff] }
 0x218   : > { %v1200_v35 = vmax.f32 %v1176_v28, 0.0  ;;  %1873 = vmatprep.subr.bf16.mxu1 %v5521_v20 }
 0x219   : > { %v7043_v37 = vpack.c.bf16 %v1202_v30, %v1201_v23 }
 0x21a   : > { %v7051_v42 = vpack.c.bf16 %v1200_v35, %v1199_v27  ;;  %1987 = vmatpush1.bf16.msra.mxu0 %v5522_v29  ;;  %v2371_v35 = vld [vmem:[%s8501_s28 + $0x8] sm:$0xff] }
 0x21b   : > { %1988 = vmatprep.subr.bf16.mxu0 %v5531_v32  ;;  %1874 = vmatpush1.bf16.msra.mxu1 %v5520_v31  ;;  %v5570_v36 = vcombine.low %v2371_v35, %v2375_v59 }
 0x21c   : > { %1700 = vmatmul.mubr.bf16.gmra.mrb[12].mxu1 %v6971_v38  ;;  %1813 = vmatmul.mubr.bf16.gmra.mrb[28].mxu0 %v6971_v38 }
 0x21d   : > { %1709 = vmatprep.mubr.bf16.mxu1 %v8463_v26  ;;  %1822 = vmatprep.mubr.bf16.mxu0 %v8463_v26 }
 0x21e   : > { %1989 = vmatpush1.bf16.msra.mxu0 %v5530_v43  ;;  %1875 = vmatprep.subr.bf16.mxu1 %v5529_v44  ;;  %v5569_v43 = vcombine.high %v2370_v39, %v2374_v40  ;;  %v2379_v44 = vld [vmem:[%s8501_s28 + $0x48] sm:$0xff] }
 0x21f   : > { %1876 = vmatpush1.bf16.msra.mxu1 %v5528_v45  ;;  %1990 = vmatprep.subr.bf16.mxu0 %v5539_v46  ;;  %v2383_v45 = vld [vmem:[%s8501_s28 + $0x68] sm:$0xff]  ;;  %v2378_v46 = vld [vmem:[%s8501_s28 + $0x40] sm:$0xff] }
 0x220   : > { %1877 = vmatprep.subr.bf16.mxu1 %v5537_v47  ;;  %v5578_v49 = vcombine.low %v2379_v44, %v2383_v45 }
 0x222   : > { %1991 = vmatpush1.bf16.msra.mxu0 %v5538_v50  ;;  %v5579_v50 = vcombine.high %v2379_v44, %v2383_v45 }
 0x223   : > { %1878 = vmatpush1.bf16.msra.mxu1 %v5536_v51  ;;  %6104 = vmatprep.subr.bf16.mxu0 %v2234_v52  ;;  %v2382_v51 = vld [vmem:[%s8501_s28 + $0x60] sm:$0xff] }
 0x224   : > { %1710 = vmatmul.mubr.bf16.gmra.mrb[16].mxu1 %v7015_v8  ;;  %1823 = vmatmul.mubr.bf16.gmra.mrb[32].mxu0 %v7015_v8 }
 0x225   : > { %1719 = vmatprep.mubr.bf16.mxu1 %v8463_v26  ;;  %1832 = vmatprep.mubr.bf16.mxu0 %v8463_v26 }
 0x226   : > { %6288 = vmatprep.subr.bf16.mxu1 %v2234_v52 }
 0x22c   : > { %1720 = vmatmul.mubr.bf16.gmra.mrb[20].mxu1 %v7007_v5  ;;  %1833 = vmatmul.mubr.bf16.gmra.mrb[36].mxu0 %v7007_v5 }
 0x22d   : > { %1729 = vmatprep.mubr.bf16.mxu1 %v8463_v26  ;;  %1842 = vmatprep.mubr.bf16.mxu0 %v8463_v26 }
 0x234   : > { %1730 = vmatmul.mubr.bf16.gmra.mrb[24].mxu1 %v7051_v42  ;;  %1843 = vmatmul.mubr.bf16.gmra.mrb[40].mxu0 %v7051_v42 }
 0x235   : > { %1739 = vmatprep.mubr.bf16.mxu1 %v8463_v26  ;;  %1852 = vmatprep.mubr.bf16.mxu0 %v8463_v26 }
 0x23c   : > { %1740 = vmatmul.mubr.bf16.gmra.mrb[28].mxu1 %v7043_v37  ;;  %1853 = vmatmul.mubr.bf16.gmra.mrb[44].mxu0 %v7043_v37 }
 0x23d   : > { %1895 = vmatprep.mubr.bf16.mxu1 %v8463_v26  ;;  %2008 = vmatprep.mubr.bf16.mxu0 %v8463_v26 }
 0x244   : > { %1896 = vmatmul.mubr.bf16.vlgmr.msra.gmra.mrb[32].mxu1 %v6943_v13  ;;  %2009 = vmatmul.mubr.bf16.vlgmr.msra.gmra.mrb[48].mxu0 %v6943_v13  ;;  %v2109_v13 = vpop.permute.xlu0 %2108 }
 0x245   : > { %6105 = vmatpush3.bf16.msra.mxu0 %v2234_v52  ;;  %1905 = vmatprep.mubr.bf16.mxu1 %v8463_v26 }
 0x246   : > { %2018 = vmatprep.mubr.bf16.mxu0 %v8463_v26  ;;  %6290 = vmatpush3.bf16.msra.mxu1 %v2234_v52 }
 0x247   : > { %6292 = vmatprep.subr.msk.bf16.mxu0 %vm2261_vm8, %v2235_v54  ;;  %6293 = vmatprep.subr.msk.bf16.mxu1 %vm2261_vm8, %v2235_v54  ;;  %v5576_v54 = vcombine.low %v2378_v46, %v2382_v51 }
 0x249   : > { %6107 = vmatpush3.bf16.msra.mxu0 %v2263_v55 }
 0x24a   : > { %6291 = vmatpush3.bf16.msra.mxu1 %v2263_v55  ;;  %2491 = vmatprep.subr.bf16.mxu0 %v5569_v43  ;;  %v5577_v55 = vcombine.high %v2378_v46, %v2382_v51 }
 0x24c   : > { %1906 = vmatmul.mubr.bf16.gmra.mrb[36].mxu1 %v6935_v10  ;;  %2019 = vmatmul.mubr.bf16.gmra.mrb[52].mxu0 %v6935_v10  ;;  %v2115_v10 = vpop.permute.xlu1 %2114 }
 0x24d   : > { %1915 = vmatprep.mubr.bf16.mxu1 %v8463_v26  ;;  %2028 = vmatprep.mubr.bf16.mxu0 %v8463_v26 }
 0x250   : > { %v2118_v56 = vpop.permute.xlu1 %2117 }
 0x254   : > { %1916 = vmatmul.mubr.bf16.gmra.mrb[40].mxu1 %v6979_v41  ;;  %2029 = vmatmul.mubr.bf16.gmra.mrb[56].mxu0 %v6979_v41  ;;  %v2112_v41 = vpop.permute.xlu0 %2111  ;;  %v2124_v58 = vpop.permute.xlu1 %2123 }
 0x255   : > { %1925 = vmatprep.mubr.bf16.mxu1 %v8463_v26  ;;  %2038 = vmatprep.mubr.bf16.mxu0 %v8463_v26 }
 0x258   : > { %v2121_v60 = vpop.permute.xlu0 %2120  ;;  %v2130_v61 = vpop.permute.xlu1 %2129 }
 0x25c   : > { %1926 = vmatmul.mubr.bf16.gmra.mrb[44].mxu1 %v6971_v38  ;;  %2039 = vmatmul.mubr.bf16.gmra.mrb[60].mxu0 %v6971_v38  ;;  %v7101_v38 = vand.u32 127, %v8462_v57  ;;  %v2127_v62 = vpop.permute.xlu0 %2126  ;;  %v2136_v4 = vpop.permute.xlu1 %2135 }
 0x25d   : > { %1935 = vmatprep.mubr.bf16.mxu1 %v8463_v26  ;;  %2048 = vmatprep.mubr.bf16.mxu0 %v8463_v26 }
 0x25e   : > { %vm2155_vm9 = vcmp.eq.s32.totalorder %v2109_v13, %v7101_v38  ;;  %vm2156_vm10 = vcmp.eq.s32.totalorder %v2112_v41, %v7101_v38  ;;  %vm2160_vm11 = vcmp.eq.s32.totalorder %v2124_v58, %v7101_v38  ;;  %vm2159_vm12 = vcmp.eq.s32.totalorder %v2121_v60, %v7101_v38 }
 0x25f   : > { %v5540_v0 = vsel %vm2155_vm9, 1.0, %v6544_v63  ;;  %v5541_v1 = vsel %vm2156_vm10, 1.0, %v6544_v63  ;;  %v5545_v2 = vsel %vm2160_vm11, 1.0, %v6544_v63  ;;  %v5544_v3 = vsel %vm2159_vm12, 1.0, %v6544_v63 }
 0x260   : > { %v2203_v6 = vpack.c.bf16 %v5541_v1, %v5540_v0  ;;  %v2205_v7 = vpack.c.bf16 %v5545_v2, %v5544_v3  ;;  %vm2157_vm14 = vcmp.eq.s32.totalorder %v2115_v10, %v7101_v38  ;;  %vm2158_vm15 = vcmp.eq.s32.totalorder %v2118_v56, %v7101_v38  ;;  %v7194_v2 = vld [vmem:[%s8501_s28 + $0x10] sm:$0xff] }
 0x261   : > { %vm2162_vm0 = vcmp.eq.s32.totalorder %v2130_v61, %v7101_v38  ;;  %vm2161_vm1 = vcmp.eq.s32.totalorder %v2127_v62, %v7101_v38  ;;  %vm2164_vm2 = vcmp.eq.s32.totalorder %v2136_v4, %v7101_v38  ;;  %v5542_v11 = vsel %vm2157_vm14, 1.0, %v6544_v63  ;;  %v7199_v3 = vld [vmem:[%s8501_s28 + $0x30] sm:$0xff] }
 0x262   : > { %v5543_v12 = vsel %vm2158_vm15, 1.0, %v6544_v63  ;;  %v5547_v14 = vsel %vm2162_vm0, 1.0, %v6544_v63  ;;  %v5546_v15 = vsel %vm2161_vm1, 1.0, %v6544_v63  ;;  %v5549_v16 = vsel %vm2164_vm2, 1.0, %v6544_v63 }
 0x263   : > { %v2204_v18 = vpack.c.bf16 %v5543_v12, %v5542_v11  ;;  %v2206_v19 = vpack.c.bf16 %v5547_v14, %v5546_v15  ;;  %vm2466_vm11 = vcmask 261120  }
 0x264   : > { %1936 = vmatmul.mubr.bf16.gmra.mrb[48].mxu1 %v7015_v8  ;;  %2049 = vmatmul.mubr.bf16.gmra.mrb[64].mxu0 %v7015_v8  ;;  %v2142_v8 = vpop.permute.xlu1 %2141 }
 0x265   : > { %1945 = vmatprep.mubr.bf16.mxu1 %v8463_v26  ;;  %2058 = vmatprep.mubr.bf16.mxu0 %v8463_v26  ;;  %vm2166_vm4 = vcmp.eq.s32.totalorder %v2142_v8, %v7101_v38 }
 0x266   : > { %v5551_v23 = vsel %vm2166_vm4, 1.0, %v6544_v63 }
 0x268   : > { %v2148_v21 = vpop.permute.xlu1 %2147 }
 0x269   : > { %vm2168_vm6 = vcmp.eq.s32.totalorder %v2148_v21, %v7101_v38 }
 0x26a   : > { %v5553_v25 = vsel %vm2168_vm6, 1.0, %v6544_v63 }
 0x26c   : > { %1946 = vmatmul.mubr.bf16.gmra.mrb[52].mxu1 %v7007_v5  ;;  %2059 = vmatmul.mubr.bf16.gmra.mrb[68].mxu0 %v7007_v5  ;;  %v2133_v5 = vpop.permute.xlu0 %2132  ;;  %v2154_v28 = vpop.permute.xlu1 %2153 }
 0x26d   : > { %1955 = vmatprep.mubr.bf16.mxu1 %v8463_v26  ;;  %2068 = vmatprep.mubr.bf16.mxu0 %v8463_v26  ;;  %vm2163_vm3 = vcmp.eq.s32.totalorder %v2133_v5, %v7101_v38  ;;  %vm2170_vm9 = vcmp.eq.s32.totalorder %v2154_v28, %v7101_v38  ;;  %v5573_v5 = vcombine.high %v7194_v2, %v7199_v3 }
 0x26e   : > { %v5548_v17 = vsel %vm2163_vm3, 1.0, %v6544_v63  ;;  %v5555_v32 = vsel %vm2170_vm9, 1.0, %v6544_v63 }
 0x26f   : > { %v2207_v20 = vpack.c.bf16 %v5549_v16, %v5548_v17 }
 0x270   : > { %v2139_v9 = vpop.permute.xlu0 %2138 }
 0x271   : > { %vm2165_vm5 = vcmp.eq.s32.totalorder %v2139_v9, %v7101_v38 }
 0x272   : > { %v5550_v24 = vsel %vm2165_vm5, 1.0, %v6544_v63 }
 0x273   : > { %v2208_v30 = vpack.c.bf16 %v5551_v23, %v5550_v24 }
 0x274   : > { %1956 = vmatmul.mubr.bf16.gmra.mrb[56].mxu1 %v7051_v42  ;;  %2069 = vmatmul.mubr.bf16.gmra.mrb[72].mxu0 %v7051_v42  ;;  %v2145_v22 = vpop.permute.xlu0 %2144  ;;  %v5568_v42 = vcombine.low %v2370_v39, %v2374_v40 }
 0x275   : > { %1965 = vmatprep.mubr.bf16.mxu1 %v8463_v26  ;;  %2078 = vmatprep.mubr.bf16.mxu0 %v8463_v26  ;;  %vm2167_vm7 = vcmp.eq.s32.totalorder %v2145_v22, %v7101_v38 }
 0x276   : > { %v5552_v27 = vsel %vm2167_vm7, 1.0, %v6544_v63 }
 0x277   : > { %v2209_v31 = vpack.c.bf16 %v5553_v25, %v5552_v27 }
 0x278   : > { %v2151_v29 = vpop.permute.xlu0 %2150 }
 0x279   : > { %vm2169_vm10 = vcmp.eq.s32.totalorder %v2151_v29, %v7101_v38 }
 0x27a   : > { %v5554_v33 = vsel %vm2169_vm10, 1.0, %v6544_v63 }
 0x27b   : > { %v2210_v34 = vpack.c.bf16 %v5555_v32, %v5554_v33 }
 0x27c   : > { %1966 = vmatmul.mubr.bf16.gmra.mrb[60].mxu1 %v7043_v37  ;;  %2079 = vmatmul.mubr.bf16.gmra.mrb[76].mxu0 %v7043_v37  ;;  %v5571_v37 = vcombine.high %v2371_v35, %v2375_v59 }
 0x27d   : > { %6108 = vmatprep.mubr.msk.bf16.mxu0 %vm2236_vm13, %v2203_v6  ;;  %6112 = vmatprep.mubr.msk.bf16.mxu1 %vm2236_vm13, %v2205_v7  ;;  %v7208_v6 = vld [vmem:[%s8501_s28 + $0x18] sm:$0xff] }
 0x27e   : > { %2604 = vmatprep.subr.bf16.mxu1 %v5571_v37  ;;  %v7213_v7 = vld [vmem:[%s8501_s28 + $0x38] sm:$0xff] }
 0x27f   : > { %v5575_v9 = vcombine.high %v7208_v6, %v7213_v7 }
 0x284   : > { %6109 = vmatmul.mubr.msk.bf16.vlgmr.msra.gmra.mrb[80].mxu0 %vm2236_vm13, %v2204_v18  ;;  %6113 = vmatmul.mubr.msk.bf16.vlgmr.msra.gmra.mrb[64].mxu1 %vm2236_vm13, %v2206_v19 }
 0x285   : > { %6116 = vmatprep.mubr.msk.bf16.mxu1 %vm2236_vm13, %v2207_v20  ;;  %2523 = vmatprep.mubr.bf16.mxu0 %v8463_v26 }
 0x286   : > { %2605 = vmatpush1.bf16.msra.mxu1 %v5570_v36  ;;  %2492 = vmatpush1.bf16.msra.mxu0 %v5568_v42 }
 0x287   : > { %2606 = vmatprep.subr.bf16.mxu1 %v5579_v50  ;;  %2493 = vmatprep.subr.bf16.mxu0 %v5577_v55 }
 0x28a   : > { %2607 = vmatpush1.bf16.msra.mxu1 %v5578_v49  ;;  %2494 = vmatpush1.bf16.msra.mxu0 %v5576_v54 }
 0x28b   : > { %2717 = vmatprep.subr.bf16.mxu0 %v5573_v5  ;;  %2830 = vmatprep.subr.bf16.mxu1 %v5575_v9 }
 0x28c   : > { %6117 = vmatmul.mubr.msk.bf16.gmra.mrb[68].mxu1 %vm2236_vm13, %v2208_v30 }
 0x28d   : > { %6120 = vmatprep.mubr.msk.bf16.mxu1 %vm2236_vm13, %v2209_v31 }
 0x294   : > { %6121 = vmatmul.mubr.msk.bf16.gmra.mrb[72].mxu1 %vm2236_vm13, %v2210_v34 }
 0x295   : > { %2636 = vmatprep.mubr.bf16.mxu1 %v8463_v26 }
 0x2d7   : > { %v7156_v47 = vpop.f32.mrb[0].mxu1  ;;  %v7158_v48 = vpop.f32.mrb[16].mxu0 }
 0x2d8   : > { %v7163_v52 = vpop.f32.mrb[1].mxu1  ;;  %v7165_v53 = vpop.f32.mrb[17].mxu0 }
 0x2d9   : > { %v7167_v10 = vpop.f32.mrb[2].mxu1  ;;  %v7169_v13 = vpop.f32.mrb[18].mxu0 }
 0x2da   : > { %v7171_v56 = vpop.f32.mrb[3].mxu1  ;;  %v7173_v41 = vpop.f32.mrb[19].mxu0 }
 0x2df   : > { %v7175_v58 = vpop.f32.mrb[4].mxu1  ;;  %v7177_v60 = vpop.f32.mrb[20].mxu0 }
 0x2e0   : > { %v7179_v38 = vpop.f32.mrb[5].mxu1  ;;  %v7181_v61 = vpop.f32.mrb[21].mxu0 }
 0x2e1   : > { %v7183_v62 = vpop.f32.mrb[6].mxu1  ;;  %v7185_v63 = vpop.f32.mrb[22].mxu0 }
 0x2e2   : > { %v7187_v0 = vpop.f32.mrb[7].mxu1  ;;  %v7189_v1 = vpop.f32.mrb[23].mxu0 }
 0x2e7   : > { %v7219_v11 = vpop.f32.mrb[8].mxu1  ;;  %v7221_v12 = vpop.f32.mrb[24].mxu0 }
 0x2e8   : > { %v7223_v14 = vpop.f32.mrb[9].mxu1  ;;  %v7225_v15 = vpop.f32.mrb[25].mxu0 }
 0x2e9   : > { %v7227_v16 = vpop.f32.mrb[10].mxu1  ;;  %v7229_v17 = vpop.f32.mrb[26].mxu0 }
 0x2ea   : > { %v7231_v18 = vpop.f32.mrb[11].mxu1  ;;  %v7233_v19 = vpop.f32.mrb[27].mxu0 }
 0x2ef   : > { %v7235_v20 = vpop.f32.mrb[12].mxu1  ;;  %v7237_v21 = vpop.f32.mrb[28].mxu0 }
 0x2f0   : > { %v7239_v22 = vpop.f32.mrb[13].mxu1  ;;  %v7241_v23 = vpop.f32.mrb[29].mxu0 }
 0x2f1   : > { %v7243_v24 = vpop.f32.mrb[14].mxu1  ;;  %v7245_v25 = vpop.f32.mrb[30].mxu0 }
 0x2f2   : > { %v7247_v27 = vpop.f32.mrb[15].mxu1  ;;  %v7249_v28 = vpop.f32.mrb[31].mxu0 }
 0x2f7   : > { %v7251_v29 = vpop.f32.mrb[16].mxu1  ;;  %v7253_v30 = vpop.f32.mrb[32].mxu0 }
 0x2f8   : > { %v7255_v31 = vpop.f32.mrb[17].mxu1  ;;  %v7257_v32 = vpop.f32.mrb[33].mxu0 }
 0x2f9   : > { %v7259_v33 = vpop.f32.mrb[18].mxu1  ;;  %v7261_v34 = vpop.f32.mrb[34].mxu0 }
 0x2fa   : > { %v7263_v35 = vpop.f32.mrb[19].mxu1  ;;  %v7265_v59 = vpop.f32.mrb[35].mxu0 }
 0x2ff   : > { %v7267_v36 = vpop.f32.mrb[20].mxu1  ;;  %v7269_v37 = vpop.f32.mrb[36].mxu0 }
 0x300   : > { %v7271_v39 = vpop.f32.mrb[21].mxu1  ;;  %v7273_v40 = vpop.f32.mrb[37].mxu0 }
 0x301   : > { %8502 = vst [vmem:[#allocation11_spill] sm:$0xff] %v7271_v39  ;;  %8503 = vst [vmem:[#allocation12_spill] sm:$0xff] %v7273_v40  ;;  %v7275_v42 = vpop.f32.mrb[22].mxu1  ;;  %v7277_v43 = vpop.f32.mrb[38].mxu0 }
 0x302   : > { %8504 = vst [vmem:[#allocation13_spill] sm:$0xff] %v7275_v42  ;;  %8505 = vst [vmem:[#allocation14_spill] sm:$0xff] %v7277_v43  ;;  %v7279_v44 = vpop.f32.mrb[23].mxu1  ;;  %v7281_v45 = vpop.f32.mrb[39].mxu0 }
 0x303   : > { %8506 = vst [vmem:[#allocation15_spill] sm:$0xff] %v7279_v44  ;;  %8507 = vst [vmem:[#allocation16_spill] sm:$0xff] %v7281_v45 }
 0x307   : > { %v7283_v46 = vpop.f32.mrb[24].mxu1  ;;  %v7285_v49 = vpop.f32.mrb[40].mxu0 }
 0x308   : > { %8508 = vst [vmem:[#allocation17_spill] sm:$0xff] %v7283_v46  ;;  %8509 = vst [vmem:[#allocation18_spill] sm:$0xff] %v7285_v49  ;;  %v7287_v50 = vpop.f32.mrb[25].mxu1  ;;  %v7289_v51 = vpop.f32.mrb[41].mxu0 }
 0x309   : > { %8510 = vst [vmem:[#allocation19_spill] sm:$0xff] %v7287_v50  ;;  %8511 = vst [vmem:[#allocation20_spill] sm:$0xff] %v7289_v51  ;;  %v7291_v54 = vpop.f32.mrb[26].mxu1  ;;  %v7293_v55 = vpop.f32.mrb[42].mxu0 }
 0x30a   : > { %8512 = vst [vmem:[#allocation21_spill] sm:$0xff] %v7291_v54  ;;  %8513 = vst [vmem:[#allocation22_spill] sm:$0xff] %v7293_v55  ;;  %v7295_v5 = vpop.f32.mrb[27].mxu1  ;;  %v7297_v9 = vpop.f32.mrb[43].mxu0 }
 0x30b   : > { %8514 = vst [vmem:[#allocation23_spill] sm:$0xff] %v7295_v5  ;;  %8515 = vst [vmem:[#allocation24_spill] sm:$0xff] %v7297_v9 }
 0x30f   : > { %v7299_v57 = vpop.f32.mrb[28].mxu1  ;;  %v7301_v8 = vpop.f32.mrb[44].mxu0 }
 0x310   : > { %8516 = vst [vmem:[#allocation25_spill] sm:$0xff] %v7299_v57  ;;  %8517 = vst [vmem:[#allocation26_spill] sm:$0xff] %v7301_v8  ;;  %v7303_v26 = vpop.f32.mrb[29].mxu1  ;;  %v7305_v4 = vpop.f32.mrb[45].mxu0 }
 0x311   : > { %8518 = vst [vmem:[#allocation27_spill] sm:$0xff] %v7303_v26  ;;  %8519 = vst [vmem:[#allocation28_spill] sm:$0xff] %v7305_v4  ;;  %v7307_v49 = vpop.f32.mrb[30].mxu1  ;;  %v7309_v50 = vpop.f32.mrb[46].mxu0 }
 0x312   : > { %8520 = vst [vmem:[#allocation29_spill] sm:$0xff] %v7307_v49  ;;  %8521 = vst [vmem:[#allocation30_spill] sm:$0xff] %v7309_v50  ;;  %v7311_v51 = vpop.f32.mrb[31].mxu1  ;;  %v7313_v54 = vpop.f32.mrb[47].mxu0 }
 0x313   : > { %8522 = vst [vmem:[#allocation31_spill] sm:$0xff] %v7311_v51  ;;  %8523 = vst [vmem:[#allocation32_spill] sm:$0xff] %v7313_v54 }
 0x317   : > { %v7315_v55 = vpop.f32.mrb[32].mxu1  ;;  %v7317_v5 = vpop.f32.mrb[48].mxu0 }
 0x318   : > { %8524 = vst [vmem:[#allocation33_spill] sm:$0xff] %v7315_v55  ;;  %8525 = vst [vmem:[#allocation34_spill] sm:$0xff] %v7317_v5  ;;  %v7319_v9 = vpop.f32.mrb[33].mxu1  ;;  %v7321_v57 = vpop.f32.mrb[49].mxu0 }
 0x319   : > { %8526 = vst [vmem:[#allocation35_spill] sm:$0xff] %v7319_v9  ;;  %8527 = vst [vmem:[#allocation36_spill] sm:$0xff] %v7321_v57  ;;  %v7323_v8 = vpop.f32.mrb[34].mxu1  ;;  %v7325_v26 = vpop.f32.mrb[50].mxu0 }
 0x31a   : > { %8528 = vst [vmem:[#allocation37_spill] sm:$0xff] %v7323_v8  ;;  %8529 = vst [vmem:[#allocation38_spill] sm:$0xff] %v7325_v26  ;;  %v7327_v4 = vpop.f32.mrb[35].mxu1  ;;  %v7329_v49 = vpop.f32.mrb[51].mxu0 }
 0x31b   : > { %8530 = vst [vmem:[#allocation39_spill] sm:$0xff] %v7327_v4  ;;  %8531 = vst [vmem:[#allocation40_spill] sm:$0xff] %v7329_v49 }
 0x31f   : > { %v7331_v50 = vpop.f32.mrb[36].mxu1  ;;  %v7333_v51 = vpop.f32.mrb[52].mxu0 }
 0x320   : > { %8532 = vst [vmem:[#allocation41_spill] sm:$0xff] %v7331_v50  ;;  %8533 = vst [vmem:[#allocation42_spill] sm:$0xff] %v7333_v51  ;;  %v7335_v54 = vpop.f32.mrb[37].mxu1  ;;  %v7337_v55 = vpop.f32.mrb[53].mxu0 }
 0x321   : > { %8534 = vst [vmem:[#allocation43_spill] sm:$0xff] %v7335_v54  ;;  %8535 = vst [vmem:[#allocation44_spill] sm:$0xff] %v7337_v55  ;;  %v7339_v5 = vpop.f32.mrb[38].mxu1  ;;  %v7341_v9 = vpop.f32.mrb[54].mxu0 }
 0x322   : > { %8536 = vst [vmem:[#allocation45_spill] sm:$0xff] %v7339_v5  ;;  %8537 = vst [vmem:[#allocation46_spill] sm:$0xff] %v7341_v9  ;;  %v7343_v57 = vpop.f32.mrb[39].mxu1  ;;  %v7345_v8 = vpop.f32.mrb[55].mxu0 }
 0x323   : > { %8538 = vst [vmem:[#allocation47_spill] sm:$0xff] %v7343_v57  ;;  %8539 = vst [vmem:[#allocation48_spill] sm:$0xff] %v7345_v8 }
 0x327   : > { %v7347_v26 = vpop.f32.mrb[40].mxu1  ;;  %v7349_v4 = vpop.f32.mrb[56].mxu0 }
 0x328   : > { %8540 = vst [vmem:[#allocation49_spill] sm:$0xff] %v7347_v26  ;;  %8541 = vst [vmem:[#allocation50_spill] sm:$0xff] %v7349_v4  ;;  %v7351_v49 = vpop.f32.mrb[41].mxu1  ;;  %v7353_v50 = vpop.f32.mrb[57].mxu0 }
 0x329   : > { %8542 = vst [vmem:[#allocation51_spill] sm:$0xff] %v7351_v49  ;;  %8543 = vst [vmem:[#allocation52_spill] sm:$0xff] %v7353_v50  ;;  %v7355_v51 = vpop.f32.mrb[42].mxu1  ;;  %v7357_v54 = vpop.f32.mrb[58].mxu0 }
 0x32a   : > { %8544 = vst [vmem:[#allocation53_spill] sm:$0xff] %v7355_v51  ;;  %8545 = vst [vmem:[#allocation54_spill] sm:$0xff] %v7357_v54  ;;  %v7359_v55 = vpop.f32.mrb[43].mxu1  ;;  %v7361_v5 = vpop.f32.mrb[59].mxu0 }
 0x32b   : > { %8546 = vst [vmem:[#allocation55_spill] sm:$0xff] %v7359_v55  ;;  %8547 = vst [vmem:[#allocation56_spill] sm:$0xff] %v7361_v5 }
 0x32f   : > { %v7363_v9 = vpop.f32.mrb[44].mxu1  ;;  %v7365_v57 = vpop.f32.mrb[60].mxu0 }
 0x330   : > { %8548 = vst [vmem:[#allocation57_spill] sm:$0xff] %v7363_v9  ;;  %8549 = vst [vmem:[#allocation58_spill] sm:$0xff] %v7365_v57  ;;  %v7367_v8 = vpop.f32.mrb[45].mxu1  ;;  %v7369_v26 = vpop.f32.mrb[61].mxu0 }
 0x331   : > { %8550 = vst [vmem:[#allocation59_spill] sm:$0xff] %v7367_v8  ;;  %8551 = vst [vmem:[#allocation60_spill] sm:$0xff] %v7369_v26  ;;  %v7371_v4 = vpop.f32.mrb[46].mxu1  ;;  %v7373_v49 = vpop.f32.mrb[62].mxu0 }
 0x332   : > { %8552 = vst [vmem:[#allocation61_spill] sm:$0xff] %v7371_v4  ;;  %8553 = vst [vmem:[#allocation62_spill] sm:$0xff] %v7373_v49  ;;  %v7375_v50 = vpop.f32.mrb[47].mxu1  ;;  %v7377_v51 = vpop.f32.mrb[63].mxu0 }
 0x333   : > { %8554 = vst [vmem:[#allocation63_spill] sm:$0xff] %v7375_v50  ;;  %8555 = vst [vmem:[#allocation64_spill] sm:$0xff] %v7377_v51 }
 0x337   : > { %v7379_v54 = vpop.f32.mrb[48].mxu1  ;;  %v7381_v55 = vpop.f32.mrb[64].mxu0 }
 0x338   : > { %8556 = vst [vmem:[#allocation65_spill] sm:$0xff] %v7379_v54  ;;  %8557 = vst [vmem:[#allocation66_spill] sm:$0xff] %v7381_v55  ;;  %v7383_v5 = vpop.f32.mrb[49].mxu1  ;;  %v7385_v9 = vpop.f32.mrb[65].mxu0 }
 0x339   : > { %8558 = vst [vmem:[#allocation67_spill] sm:$0xff] %v7383_v5  ;;  %8559 = vst [vmem:[#allocation68_spill] sm:$0xff] %v7385_v9  ;;  %v7387_v57 = vpop.f32.mrb[50].mxu1  ;;  %v7389_v8 = vpop.f32.mrb[66].mxu0 }
 0x33a   : > { %8560 = vst [vmem:[#allocation69_spill] sm:$0xff] %v7387_v57  ;;  %8561 = vst [vmem:[#allocation70_spill] sm:$0xff] %v7389_v8  ;;  %v7391_v26 = vpop.f32.mrb[51].mxu1  ;;  %v7393_v4 = vpop.f32.mrb[67].mxu0 }
 0x33b   : > { %8562 = vst [vmem:[#allocation71_spill] sm:$0xff] %v7391_v26  ;;  %8563 = vst [vmem:[#allocation72_spill] sm:$0xff] %v7393_v4 }
 0x33f   : > { %v7395_v49 = vpop.f32.mrb[52].mxu1  ;;  %v7397_v50 = vpop.f32.mrb[68].mxu0 }
 0x340   : > { %8564 = vst [vmem:[#allocation73_spill] sm:$0xff] %v7395_v49  ;;  %8565 = vst [vmem:[#allocation74_spill] sm:$0xff] %v7397_v50  ;;  %v7399_v51 = vpop.f32.mrb[53].mxu1  ;;  %v7401_v54 = vpop.f32.mrb[69].mxu0 }
 0x341   : > { %8566 = vst [vmem:[#allocation75_spill] sm:$0xff] %v7399_v51  ;;  %8567 = vst [vmem:[#allocation76_spill] sm:$0xff] %v7401_v54  ;;  %v7403_v55 = vpop.f32.mrb[54].mxu1  ;;  %v7405_v5 = vpop.f32.mrb[70].mxu0 }
 0x342   : > { %8568 = vst [vmem:[#allocation77_spill] sm:$0xff] %v7403_v55  ;;  %8569 = vst [vmem:[#allocation78_spill] sm:$0xff] %v7405_v5  ;;  %v7407_v9 = vpop.f32.mrb[55].mxu1  ;;  %v7409_v57 = vpop.f32.mrb[71].mxu0 }
 0x343   : > { %8570 = vst [vmem:[#allocation79_spill] sm:$0xff] %v7407_v9  ;;  %8571 = vst [vmem:[#allocation80_spill] sm:$0xff] %v7409_v57 }
 0x347   : > { %v7411_v8 = vpop.f32.mrb[56].mxu1  ;;  %v7413_v26 = vpop.f32.mrb[72].mxu0 }
 0x348   : > { %8572 = vst [vmem:[#allocation81_spill] sm:$0xff] %v7411_v8  ;;  %8573 = vst [vmem:[#allocation82_spill] sm:$0xff] %v7413_v26  ;;  %v7415_v4 = vpop.f32.mrb[57].mxu1  ;;  %v7417_v49 = vpop.f32.mrb[73].mxu0 }
 0x349   : > { %8574 = vst [vmem:[#allocation83_spill] sm:$0xff] %v7415_v4  ;;  %8575 = vst [vmem:[#allocation84_spill] sm:$0xff] %v7417_v49  ;;  %v7419_v50 = vpop.f32.mrb[58].mxu1  ;;  %v7421_v51 = vpop.f32.mrb[74].mxu0 }
 0x34a   : > { %8576 = vst [vmem:[#allocation85_spill] sm:$0xff] %v7419_v50  ;;  %8577 = vst [vmem:[#allocation86_spill] sm:$0xff] %v7421_v51  ;;  %v7423_v54 = vpop.f32.mrb[59].mxu1  ;;  %v7425_v55 = vpop.f32.mrb[75].mxu0 }
 0x34b   : > { %8578 = vst [vmem:[#allocation87_spill] sm:$0xff] %v7423_v54  ;;  %8579 = vst [vmem:[#allocation88_spill] sm:$0xff] %v7425_v55 }
 0x34f   : > { %v7427_v5 = vpop.f32.mrb[60].mxu1  ;;  %v7429_v9 = vpop.f32.mrb[76].mxu0 }
 0x350   : > { %8580 = vst [vmem:[#allocation89_spill] sm:$0xff] %v7427_v5  ;;  %8581 = vst [vmem:[#allocation90_spill] sm:$0xff] %v7429_v9  ;;  %v7431_v57 = vpop.f32.mrb[61].mxu1  ;;  %v7433_v8 = vpop.f32.mrb[77].mxu0  ;;  %v2380_v9 = vld [vmem:[%s8501_s28 + $0x50] sm:$0xff] }
 0x351   : > { %8582 = vst [vmem:[#allocation91_spill] sm:$0xff] %v7431_v57  ;;  %8583 = vst [vmem:[#allocation92_spill] sm:$0xff] %v7433_v8  ;;  %v7435_v26 = vpop.f32.mrb[62].mxu1  ;;  %v7437_v4 = vpop.f32.mrb[78].mxu0 }
 0x352   : > { %8584 = vst [vmem:[#allocation93_spill] sm:$0xff] %v7435_v26  ;;  %8585 = vst [vmem:[#allocation94_spill] sm:$0xff] %v7437_v4  ;;  %v7439_v49 = vpop.f32.mrb[63].mxu1  ;;  %v7441_v50 = vpop.f32.mrb[79].mxu0  ;;  %v2384_v26 = vld [vmem:[%s8501_s28 + $0x70] sm:$0xff] }
 0x353   : > { %8586 = vst [vmem:[#allocation95_spill] sm:$0xff] %v7439_v49  ;;  %8587 = vst [vmem:[#allocation96_spill] sm:$0xff] %v7441_v50  ;;  %v2381_v49 = vld [vmem:[%s8501_s28 + $0x58] sm:$0xff]  ;;  %v5581_v40 = vcombine.high %v2380_v9, %v2384_v26 }
 0x354   : > { %v2385_v50 = vld [vmem:[%s8501_s28 + $0x78] sm:$0xff] }
 0x355   : > { %v5583_v39 = vcombine.high %v2381_v49, %v2385_v50 }
 0x357   : > { %v6110_v51 = vpop.f32.mrb[80].mxu0  ;;  %v6114_v54 = vpop.f32.mrb[64].mxu1 }
 0x358   : > { %v2299_v46 = vpop.f32.mrb[81].mxu0  ;;  %v2315_v55 = vpop.f32.mrb[65].mxu1 }
 0x359   : > { %v6111_v5 = vpop.f32.mrb[82].mxu0  ;;  %v6115_v57 = vpop.f32.mrb[66].mxu1 }
 0x35a   : > { %v7455_v4 = vpack.c.bf16 %v6111_v5, %v6110_v51  ;;  %v7457_v8 = vpack.c.bf16 %v6115_v57, %v6114_v54  ;;  %v2302_v45 = vpop.f32.mrb[83].mxu0  ;;  %v2318_v44 = vpop.f32.mrb[67].mxu1  ;;  %v8588_v51 = vcombine.low %v7194_v2, %v7199_v3  ;;  %v8589_v57 = vmov 0   ;;  %v6366_v2 = vld [vmem:[%s8436_s13 + $0xc0] sm:$0xff]  }
 0x35b   : > { %v7459_v43 = vpack.c.bf16 %v2302_v45, %v2299_v46  ;;  %v7461_v42 = vpack.c.bf16 %v2318_v44, %v2315_v55  ;;  %v5580_v54 = vcombine.low %v2380_v9, %v2384_v26  ;;  %v8590_v44 = vcombine.low %v7208_v6, %v7213_v7  ;;  %v6364_v46 = vld [vmem:[%s8436_s13 + $0x40] sm:$0xff]  }
 0x35c   : > { %v5582_v45 = vcombine.low %v2381_v49, %v2385_v50 }
 0x35d   : > { %5584 = vmatmul.mubr.msk.bf16.vlgmr.msra.gmra.mrb[84].mxu0 %vm2466_vm11, %v7459_v43  ;;  %5592 = vmatmul.mubr.msk.bf16.vlgmr.msra.gmra.mrb[76].mxu1 %vm2466_vm11, %v7459_v43 }
 0x35e   : > { %2718 = vmatpush1.bf16.msra.mxu0 %v8588_v51  ;;  %2533 = vmatprep.mubr.bf16.mxu0 %v8589_v57 }
 0x35f   : > { %v6118_v5 = vpop.f32.mrb[68].mxu1  ;;  %2646 = vmatprep.mubr.bf16.mxu1 %v8589_v57  ;;  %2831 = vmatpush1.bf16.msra.mxu1 %v8590_v44  ;;  %v6368_v44 = vld [vmem:[%s8436_s13 + $0x48] sm:$0xff]  }
 0x360   : > { %v2331_v55 = vpop.f32.mrb[69].mxu1  ;;  %2719 = vmatprep.subr.bf16.mxu0 %v5581_v40  ;;  %2832 = vmatprep.subr.bf16.mxu1 %v5583_v39 }
 0x361   : > { %v6119_v26 = vpop.f32.mrb[70].mxu1 }
 0x362   : > { %v7481_v3 = vpack.c.bf16 %v6119_v26, %v6118_v5  ;;  %v2334_v9 = vpop.f32.mrb[71].mxu1  ;;  %2720 = vmatpush1.bf16.msra.mxu0 %v5580_v54  ;;  %v6365_v54 = vld [vmem:[%s8436_s13] sm:$0xff]   ;;  %v6373_v26 = vld [vmem:[%s8436_s13 + $0x10] sm:$0xff]  }
 0x363   : > { %v7483_v51 = vpack.c.bf16 %v2334_v9, %v2331_v55  ;;  %2833 = vmatpush1.bf16.msra.mxu1 %v5582_v45  ;;  %5757 = vmatprep.subr.bf16.mxu0 %v6364_v46  ;;  %v6367_v5 = vld [vmem:[%s8436_s13 + $0x80] sm:$0xff]   ;;  %v6370_v45 = vld [vmem:[%s8436_s13 + $0xc8] sm:$0xff]   ;;  %v6375_v9 = vld [vmem:[%s8436_s13 + $0x90] sm:$0xff]  }
 0x364   : > { %5821 = vmatprep.subr.bf16.mxu1 %v6366_v2  ;;  %v6369_v46 = vld [vmem:[%s8436_s13 + $0x8] sm:$0xff]   ;;  %v6374_v2 = vld [vmem:[%s8436_s13 + $0xd0] sm:$0xff]  }
 0x365   : > { %5585 = vmatmul.mubr.msk.bf16.gmra.mrb[88].mxu0 %vm2466_vm11, %v7455_v4  ;;  %5593 = vmatmul.mubr.msk.bf16.gmra.mrb[80].mxu1 %vm2466_vm11, %v7455_v4  ;;  %v6371_v55 = vld [vmem:[%s8436_s13 + $0x88] sm:$0xff]  }
 0x366   : > { %2543 = vmatprep.mubr.bf16.mxu0 %v8589_v57  ;;  %2656 = vmatprep.mubr.bf16.mxu1 %v8589_v57 }
 0x367   : > { %v6122_v6 = vpop.f32.mrb[72].mxu1 }
 0x368   : > { %v2347_v7 = vpop.f32.mrb[73].mxu1 }
 0x369   : > { %v6123_v39 = vpop.f32.mrb[74].mxu1 }
 0x36a   : > { %v7491_v40 = vpack.c.bf16 %v6123_v39, %v6122_v6  ;;  %v2350_v49 = vpop.f32.mrb[75].mxu1  ;;  %v6376_v6 = vld [vmem:[%s8436_s13 + $0x58] sm:$0xff]  }
 0x36b   : > { %v7493_v50 = vpack.c.bf16 %v2350_v49, %v2347_v7  ;;  %v6378_v7 = vld [vmem:[%s8436_s13 + $0xd8] sm:$0xff]  }
 0x36c   : > { %v6377_v39 = vld [vmem:[%s8436_s13 + $0x18] sm:$0xff]  }
 0x36d   : > { %5586 = vmatmul.mubr.msk.bf16.gmra.mrb[92].mxu0 %vm2466_vm11, %v7461_v42  ;;  %5594 = vmatmul.mubr.msk.bf16.gmra.mrb[84].mxu1 %vm2466_vm11, %v7461_v42  ;;  %v6379_v49 = vld [vmem:[%s8436_s13 + $0x98] sm:$0xff]  }
 0x36e   : > { %2553 = vmatprep.mubr.bf16.mxu0 %v8589_v57  ;;  %2666 = vmatprep.mubr.bf16.mxu1 %v8589_v57 }
 0x375   : > { %5587 = vmatmul.mubr.msk.bf16.gmra.mrb[96].mxu0 %vm2466_vm11, %v7457_v8  ;;  %5595 = vmatmul.mubr.msk.bf16.gmra.mrb[88].mxu1 %vm2466_vm11, %v7457_v8 }
 0x376   : > { %2563 = vmatprep.mubr.bf16.mxu0 %v8589_v57  ;;  %2676 = vmatprep.mubr.bf16.mxu1 %v8589_v57 }
 0x37d   : > { %5588 = vmatmul.mubr.msk.bf16.gmra.mrb[100].mxu0 %vm2466_vm11, %v7483_v51  ;;  %5596 = vmatmul.mubr.msk.bf16.gmra.mrb[92].mxu1 %vm2466_vm11, %v7483_v51 }
 0x37e   : > { %2573 = vmatprep.mubr.bf16.mxu0 %v8589_v57  ;;  %2686 = vmatprep.mubr.bf16.mxu1 %v8589_v57 }
 0x385   : > { %5589 = vmatmul.mubr.msk.bf16.gmra.mrb[104].mxu0 %vm2466_vm11, %v7481_v3  ;;  %5597 = vmatmul.mubr.msk.bf16.gmra.mrb[96].mxu1 %vm2466_vm11, %v7481_v3 }
 0x386   : > { %2583 = vmatprep.mubr.bf16.mxu0 %v8589_v57  ;;  %2696 = vmatprep.mubr.bf16.mxu1 %v8589_v57 }
 0x38d   : > { %5590 = vmatmul.mubr.msk.bf16.gmra.mrb[108].mxu0 %vm2466_vm11, %v7493_v50  ;;  %5598 = vmatmul.mubr.msk.bf16.gmra.mrb[100].mxu1 %vm2466_vm11, %v7493_v50 }
 0x38e   : > { %2593 = vmatprep.mubr.bf16.mxu0 %v8589_v57  ;;  %2706 = vmatprep.mubr.bf16.mxu1 %v8589_v57 }
 0x395   : > { %5591 = vmatmul.mubr.msk.bf16.gmra.mrb[112].mxu0 %vm2466_vm11, %v7491_v40  ;;  %5599 = vmatmul.mubr.msk.bf16.gmra.mrb[104].mxu1 %vm2466_vm11, %v7491_v40 }
 0x396   : > { %2749 = vmatprep.mubr.bf16.mxu0 %v8589_v57  ;;  %2862 = vmatprep.mubr.bf16.mxu1 %v8589_v57 }
 0x39d   : > { %5600 = vmatmul.mubr.msk.bf16.vlgmr.msra.gmra.mrb[116].mxu0 %vm2466_vm11, %v7459_v43  ;;  %5608 = vmatmul.mubr.msk.bf16.vlgmr.msra.gmra.mrb[108].mxu1 %vm2466_vm11, %v7459_v43  ;;  %v6372_v43 = vld [vmem:[%s8436_s13 + $0x50] sm:$0xff]  }
 0x39e   : > { %2759 = vmatprep.mubr.bf16.mxu0 %v8589_v57  ;;  %2872 = vmatprep.mubr.bf16.mxu1 %v8589_v57 }
 0x39f   : > { %5758 = vmatpush3.bf16.msra.mxu0 %v6365_v54  ;;  %5822 = vmatpush3.bf16.msra.mxu1 %v6367_v5  ;;  %v6382_v54 = vld [vmem:[%s8436_s13 + $0xe0] sm:$0xff]  }
 0x3a0   : > { %5759 = vmatprep.subr.bf16.mxu0 %v6368_v44  ;;  %5823 = vmatprep.subr.bf16.mxu1 %v6370_v45  ;;  %v6381_v5 = vld [vmem:[%s8436_s13 + $0x20] sm:$0xff]   ;;  %v6384_v45 = vld [vmem:[%s8436_s13 + $0x68] sm:$0xff]  }
 0x3a1   : > { %v6383_v44 = vld [vmem:[%s8436_s13 + $0xa0] sm:$0xff]  }
 0x3a3   : > { %5760 = vmatpush3.bf16.msra.mxu0 %v6369_v46  ;;  %5824 = vmatpush3.bf16.msra.mxu1 %v6371_v55  ;;  %v6386_v46 = vld [vmem:[%s8436_s13 + $0xe8] sm:$0xff]  }
 0x3a4   : > { %5761 = vmatprep.subr.bf16.mxu0 %v6372_v43  ;;  %5825 = vmatprep.subr.bf16.mxu1 %v6374_v2  ;;  %v6385_v55 = vld [vmem:[%s8436_s13 + $0x28] sm:$0xff]   ;;  %v6390_v2 = vld [vmem:[%s8436_s13 + $0xf0] sm:$0xff]  }
 0x3a5   : > { %5601 = vmatmul.mubr.msk.bf16.gmra.mrb[120].mxu0 %vm2466_vm11, %v7455_v4  ;;  %5609 = vmatmul.mubr.msk.bf16.gmra.mrb[112].mxu1 %vm2466_vm11, %v7455_v4  ;;  %v6380_v4 = vld [vmem:[%s8436_s13 + $0x60] sm:$0xff]   ;;  %v6387_v43 = vld [vmem:[%s8436_s13 + $0xa8] sm:$0xff]  }
 0x3a6   : > { %2769 = vmatprep.mubr.bf16.mxu0 %v8589_v57  ;;  %2882 = vmatprep.mubr.bf16.mxu1 %v8589_v57 }
 0x3a7   : > { %5762 = vmatpush3.bf16.msra.mxu0 %v6373_v26  ;;  %5826 = vmatpush3.bf16.msra.mxu1 %v6375_v9  ;;  %v6389_v26 = vld [vmem:[%s8436_s13 + $0x30] sm:$0xff]  }
 0x3a8   : > { %5763 = vmatprep.subr.bf16.mxu0 %v6376_v6  ;;  %5827 = vmatprep.subr.bf16.mxu1 %v6378_v7  ;;  %v6391_v9 = vld [vmem:[%s8436_s13 + $0xb0] sm:$0xff]   ;;  %v6392_v6 = vld [vmem:[%s8436_s13 + $0x78] sm:$0xff]  }
 0x3a9   : > { %v6393_v7 = vld [vmem:[%s8436_s13 + $0xf8] sm:$0xff]  }
 0x3ab   : > { %5764 = vmatpush3.bf16.msra.mxu0 %v6377_v39  ;;  %5828 = vmatpush3.bf16.msra.mxu1 %v6379_v49  ;;  %v6394_v39 = vld [vmem:[%s8436_s13 + $0x38] sm:$0xff]  }
 0x3ac   : > { %5765 = vmatprep.subr.bf16.mxu0 %v6380_v4  ;;  %5829 = vmatprep.subr.bf16.mxu1 %v6382_v54  ;;  %v6395_v49 = vld [vmem:[%s8436_s13 + $0xb8] sm:$0xff]   ;;  %v6398_v4 = vld [vmem:[%s8436_s13 + $0x1c0] sm:$0xff]  }
 0x3ad   : > { %5602 = vmatmul.mubr.msk.bf16.gmra.mrb[124].mxu0 %vm2466_vm11, %v7461_v42  ;;  %5610 = vmatmul.mubr.msk.bf16.gmra.mrb[116].mxu1 %vm2466_vm11, %v7461_v42  ;;  %v6388_v42 = vld [vmem:[%s8436_s13 + $0x70] sm:$0xff]  }
 0x3ae   : > { %2779 = vmatprep.mubr.bf16.mxu0 %v8589_v57  ;;  %2892 = vmatprep.mubr.bf16.mxu1 %v8589_v57 }
 0x3af   : > { %5766 = vmatpush3.bf16.msra.mxu0 %v6381_v5  ;;  %5830 = vmatpush3.bf16.msra.mxu1 %v6383_v44 }
 0x3b0   : > { %5767 = vmatprep.subr.bf16.mxu0 %v6384_v45  ;;  %5831 = vmatprep.subr.bf16.mxu1 %v6386_v46 }
 0x3b3   : > { %5768 = vmatpush3.bf16.msra.mxu0 %v6385_v55  ;;  %5832 = vmatpush3.bf16.msra.mxu1 %v6387_v43 }
 0x3b4   : > { %5769 = vmatprep.subr.bf16.mxu0 %v6388_v42  ;;  %5833 = vmatprep.subr.bf16.mxu1 %v6390_v2 }
 0x3b5   : > { %5603 = vmatmul.mubr.msk.bf16.gmra.mrb[128].mxu0 %vm2466_vm11, %v7457_v8  ;;  %5611 = vmatmul.mubr.msk.bf16.gmra.mrb[120].mxu1 %vm2466_vm11, %v7457_v8  ;;  %v6396_v8 = vld [vmem:[%s8436_s13 + $0x140] sm:$0xff]  }
 0x3b6   : > { %2789 = vmatprep.mubr.bf16.mxu0 %v8589_v57  ;;  %2902 = vmatprep.mubr.bf16.mxu1 %v8589_v57 }
 0x3b7   : > { %5770 = vmatpush3.bf16.msra.mxu0 %v6389_v26  ;;  %5834 = vmatpush3.bf16.msra.mxu1 %v6391_v9 }
 0x3b8   : > { %5771 = vmatprep.subr.bf16.mxu0 %v6392_v6  ;;  %5835 = vmatprep.subr.bf16.mxu1 %v6393_v7 }
 0x3bb   : > { %5772 = vmatpush3.bf16.msra.mxu0 %v6394_v39  ;;  %5836 = vmatpush3.bf16.msra.mxu1 %v6395_v49 }
 0x3bc   : > { %5885 = vmatprep.subr.bf16.mxu0 %v6396_v8  ;;  %5949 = vmatprep.subr.bf16.mxu1 %v6398_v4 }
 0x3bd   : > { %5604 = vmatmul.mubr.msk.bf16.gmra.mrb[132].mxu0 %vm2466_vm11, %v7483_v51  ;;  %5612 = vmatmul.mubr.msk.bf16.gmra.mrb[124].mxu1 %vm2466_vm11, %v7483_v51 }
 0x3be   : > { %2799 = vmatprep.mubr.bf16.mxu0 %v8589_v57  ;;  %2912 = vmatprep.mubr.bf16.mxu1 %v8589_v57 }
 0x3c5   : > { %5605 = vmatmul.mubr.msk.bf16.gmra.mrb[136].mxu0 %vm2466_vm11, %v7481_v3  ;;  %5613 = vmatmul.mubr.msk.bf16.gmra.mrb[128].mxu1 %vm2466_vm11, %v7481_v3  ;;  %v8591_v3 = vlaneseq }
 0x3c6   : > { %2809 = vmatprep.mubr.bf16.mxu0 %v8589_v57  ;;  %2922 = vmatprep.mubr.bf16.mxu1 %v8589_v57 }
 0x3c7   : > { %v7674_v51 = vshrl.u32 %v8591_v3, 7 }
 0x3c9   : > { %8592 = vst [vmem:[#allocation97_spill] sm:$0xff] %v7674_v51  ;;  %v1279_v54 = vsub.s32 0, %v7674_v51  ;;  %v1287_v5 = vsub.s32 2, %v7674_v51  ;;  %v1291_v44 = vsub.s32 3, %v7674_v51 }
 0x3cd   : > { %5606 = vmatmul.mubr.msk.bf16.gmra.mrb[140].mxu0 %vm2466_vm11, %v7493_v50  ;;  %5614 = vmatmul.mubr.msk.bf16.gmra.mrb[132].mxu1 %vm2466_vm11, %v7493_v50  ;;  %v7681_v50 = vld [vmem:[%s8593_s23] sm:$0xff] }
 0x3ce   : > { %2819 = vmatprep.mubr.bf16.mxu0 %v8589_v57  ;;  %2932 = vmatprep.mubr.bf16.mxu1 %v8589_v57  ;;  %8594 = vst [vmem:[#allocation98_spill] sm:$0xff] %v7681_v50  ;;  %v1283_v57 = vsub.s32 1, %v7674_v51  ;;  %v7686_v45 = vrot.slane %v7681_v50, %v1279_v54  ;;  %v7695_v55 = vrot.slane %v7681_v50, %v1291_v44 }
 0x3d0   : > { %v7692_v46 = vrot.slane %v7681_v50, %v1283_v57  ;;  %v1672_v43 = vadd.f32 %v7156_v47, %v7686_v45  ;;  %v1787_v26 = vadd.f32 %v7165_v53, %v7695_v55  ;;  %v1676_v7 = vadd.f32 %v7167_v10, %v7686_v45 }
 0x3d2   : > { %v1674_v2 = vadd.f32 %v7163_v52, %v7692_v46  ;;  %v1791_v52 = vadd.f32 %v7173_v41, %v7695_v55  ;;  %v6399_v41 = vld [vmem:[%s8436_s13 + $0x180] sm:$0xff]  }
 0x3d5   : > { %5607 = vmatmul.mubr.msk.bf16.gmra.mrb[144].mxu0 %vm2466_vm11, %v7491_v40  ;;  %5615 = vmatmul.mubr.msk.bf16.gmra.mrb[136].mxu1 %vm2466_vm11, %v7491_v40  ;;  %v7689_v40 = vrot.slane %v7681_v50, %v1287_v5 }
 0x3d7   : > { %v1785_v42 = vadd.f32 %v7158_v48, %v7689_v40  ;;  %v1789_v39 = vadd.f32 %v7169_v13, %v7689_v40  ;;  %v1678_v48 = vadd.f32 %v7171_v56, %v7692_v46  ;;  %v6397_v56 = vld [vmem:[%s8436_s13 + $0x100] sm:$0xff]  }
 0x430   : > { %v2525_v9 = vpop.f32.mrb[84].mxu0  ;;  %v2638_v6 = vpop.f32.mrb[76].mxu1 }
 0x431   : > { %v2943_v49 = vmul.f32 %v2525_v9, %v1672_v43  ;;  %v2945_v8 = vmul.f32 %v2638_v6, %v1785_v42  ;;  %v2527_v47 = vpop.f32.mrb[85].mxu0  ;;  %v2640_v4 = vpop.f32.mrb[77].mxu1 }
 0x432   : > { %v2944_v3 = vmul.f32 %v2527_v47, %v1674_v2  ;;  %v2946_v53 = vmul.f32 %v2640_v4, %v1787_v26  ;;  %v2529_v54 = vpop.f32.mrb[86].mxu0  ;;  %v2642_v5 = vpop.f32.mrb[78].mxu1  ;;  %v1682_v2 = vadd.f32 %v7175_v58, %v7686_v45  ;;  %v1795_v26 = vadd.f32 %v7177_v60, %v7689_v40 }
 0x433   : > { %v2951_v57 = vmul.f32 %v2529_v54, %v1676_v7  ;;  %v2953_v44 = vmul.f32 %v2642_v5, %v1789_v39  ;;  %v2531_v10 = vpop.f32.mrb[87].mxu0  ;;  %v2644_v50 = vpop.f32.mrb[79].mxu1  ;;  %v6402_v7 = vld [vmem:[%s8436_s13 + $0x1c8] sm:$0xff]   ;;  %v1797_v39 = vadd.f32 %v7181_v61, %v7695_v55  ;;  %v1686_v58 = vadd.f32 %v7183_v62, %v7686_v45 }
 0x434   : > { %v2952_v51 = vmul.f32 %v2531_v10, %v1678_v48  ;;  %v2954_v13 = vmul.f32 %v2644_v50, %v1791_v52  ;;  %v1684_v50 = vadd.f32 %v7179_v38, %v7692_v46  ;;  %v1799_v60 = vadd.f32 %v7185_v63, %v7689_v40  ;;  %v6401_v54 = vld [vmem:[%s8436_s13 + $0x108] sm:$0xff]  }
 0x435   : > { %v3071_v43 = vpack.c.bf16 %v2951_v57, %v2943_v49  ;;  %v3073_v42 = vpack.c.bf16 %v2953_v44, %v2945_v8  ;;  %v1688_v38 = vadd.f32 %v7187_v0, %v7692_v46  ;;  %v1801_v61 = vadd.f32 %v7189_v1, %v7695_v55  ;;  %v6403_v0 = vld [vmem:[%s8436_s13 + $0x188] sm:$0xff]   ;;  %v6404_v1 = vld [vmem:[%s8436_s13 + $0x150] sm:$0xff]  }
 0x436   : > { %v3072_v9 = vpack.c.bf16 %v2952_v51, %v2944_v3  ;;  %v3074_v6 = vpack.c.bf16 %v2954_v13, %v2946_v53  ;;  %v6400_v51 = vld [vmem:[%s8436_s13 + $0x148] sm:$0xff]   ;;  %v6406_v13 = vld [vmem:[%s8436_s13 + $0x1d0] sm:$0xff]  }
 0x438   : > { %v2535_v49 = vpop.f32.mrb[88].mxu0  ;;  %v2648_v8 = vpop.f32.mrb[80].mxu1  ;;  %3679 = vmatprep.mubr.bf16.mxu0 %v3072_v9  ;;  %3776 = vmatprep.mubr.bf16.mxu1 %v3074_v6 }
 0x439   : > { %v2959_v47 = vmul.f32 %v2535_v49, %v1682_v2  ;;  %v2961_v4 = vmul.f32 %v2648_v8, %v1795_v26  ;;  %v2537_v48 = vpop.f32.mrb[89].mxu0  ;;  %v2650_v52 = vpop.f32.mrb[81].mxu1  ;;  %3680 = vmatmul.mubr.bf16.vlgmr.msra.gmra.mrb[148].mxu0 %v3071_v43  ;;  %3777 = vmatmul.mubr.bf16.vlgmr.msra.gmra.mrb[140].mxu1 %v3073_v42  ;;  %v6405_v2 = vld [vmem:[%s8436_s13 + $0x110] sm:$0xff]   ;;  %v1698_v8 = vadd.f32 %v7231_v18, %v7692_v46  ;;  %v6411_v18 = vld [vmem:[%s8436_s13 + $0x198] sm:$0xff]  }
 0x43a   : > { %v2960_v62 = vmul.f32 %v2537_v48, %v1684_v50  ;;  %v2962_v3 = vmul.f32 %v2650_v52, %v1797_v39  ;;  %v2539_v53 = vpop.f32.mrb[90].mxu0  ;;  %v2652_v63 = vpop.f32.mrb[82].mxu1  ;;  %5886 = vmatpush3.bf16.msra.mxu0 %v6397_v56  ;;  %5950 = vmatpush3.bf16.msra.mxu1 %v6399_v41  ;;  %v6407_v26 = vld [vmem:[%s8436_s13 + $0x190] sm:$0xff]   ;;  %v1692_v50 = vadd.f32 %v7219_v11, %v7686_v45  ;;  %v6408_v39 = vld [vmem:[%s8436_s13 + $0x158] sm:$0xff]  }
 0x43b   : > { %v2967_v5 = vmul.f32 %v2539_v53, %v1686_v58  ;;  %v2969_v57 = vmul.f32 %v2652_v63, %v1799_v60  ;;  %v2541_v44 = vpop.f32.mrb[91].mxu0  ;;  %v2654_v10 = vpop.f32.mrb[83].mxu1  ;;  %5887 = vmatprep.subr.bf16.mxu0 %v6400_v51  ;;  %5951 = vmatprep.subr.bf16.mxu1 %v6402_v7  ;;  %v1805_v51 = vadd.f32 %v7221_v12, %v7689_v40  ;;  %v6410_v58 = vld [vmem:[%s8436_s13 + $0x1d8] sm:$0xff]  }
 0x43c   : > { %v2968_v43 = vmul.f32 %v2541_v44, %v1688_v38  ;;  %v2970_v42 = vmul.f32 %v2654_v10, %v1801_v61  ;;  %v1694_v7 = vadd.f32 %v7223_v14, %v7692_v46  ;;  %v1807_v60 = vadd.f32 %v7225_v15, %v7695_v55 }
 0x43d   : > { %v3079_v9 = vpack.c.bf16 %v2967_v5, %v2959_v47  ;;  %v3081_v6 = vpack.c.bf16 %v2969_v57, %v2961_v4  ;;  %v1696_v11 = vadd.f32 %v7227_v16, %v7686_v45  ;;  %v1809_v12 = vadd.f32 %v7229_v17, %v7689_v40 }
 0x43e   : > { %v3080_v56 = vpack.c.bf16 %v2968_v43, %v2960_v62  ;;  %v3082_v41 = vpack.c.bf16 %v2970_v42, %v2962_v3  ;;  %5888 = vmatpush3.bf16.msra.mxu0 %v6401_v54  ;;  %5952 = vmatpush3.bf16.msra.mxu1 %v6403_v0  ;;  %v1811_v15 = vadd.f32 %v7233_v19, %v7695_v55  ;;  %v6409_v62 = vld [vmem:[%s8436_s13 + $0x118] sm:$0xff]   ;;  %v6412_v19 = vld [vmem:[%s8436_s13 + $0x160] sm:$0xff]  }
 0x43f   : > { %5889 = vmatprep.subr.bf16.mxu0 %v6404_v1  ;;  %5953 = vmatprep.subr.bf16.mxu1 %v6406_v13  ;;  %v6414_v0 = vld [vmem:[%s8436_s13 + $0x1e0] sm:$0xff]  }
 0x440   : > { %v2545_v14 = vpop.f32.mrb[92].mxu0  ;;  %v2658_v49 = vpop.f32.mrb[84].mxu1  ;;  %3687 = vmatprep.mubr.bf16.mxu0 %v3080_v56  ;;  %3784 = vmatprep.mubr.bf16.mxu1 %v3082_v41  ;;  %v6413_v43 = vld [vmem:[%s8436_s13 + $0x120] sm:$0xff]   ;;  %v1704_v56 = vadd.f32 %v7239_v22, %v7692_v46  ;;  %v6416_v41 = vld [vmem:[%s8436_s13 + $0x168] sm:$0xff]  }
 0x441   : > { %v2975_v38 = vmul.f32 %v2545_v14, %v1692_v50  ;;  %v2977_v47 = vmul.f32 %v2658_v49, %v1805_v51  ;;  %v2547_v4 = vpop.f32.mrb[93].mxu0  ;;  %v2660_v48 = vpop.f32.mrb[85].mxu1  ;;  %3688 = vmatmul.mubr.bf16.gmra.mrb[152].mxu0 %v3079_v9  ;;  %3785 = vmatmul.mubr.bf16.gmra.mrb[144].mxu1 %v3081_v6  ;;  %v6415_v42 = vld [vmem:[%s8436_s13 + $0x1a0] sm:$0xff]   ;;  %v1702_v9 = vadd.f32 %v7235_v20, %v7686_v45  ;;  %v6417_v14 = vld [vmem:[%s8436_s13 + $0x128] sm:$0xff]  }
 0x442   : > { %v2976_v16 = vmul.f32 %v2547_v4, %v1694_v7  ;;  %v2978_v52 = vmul.f32 %v2660_v48, %v1807_v60  ;;  %v2549_v61 = vpop.f32.mrb[94].mxu0  ;;  %v2662_v17 = vpop.f32.mrb[86].mxu1  ;;  %5890 = vmatpush3.bf16.msra.mxu0 %v6405_v2  ;;  %5954 = vmatpush3.bf16.msra.mxu1 %v6407_v26  ;;  %v1815_v6 = vadd.f32 %v7237_v21, %v7689_v40  ;;  %v6418_v2 = vld [vmem:[%s8436_s13 + $0x1e8] sm:$0xff]   ;;  %v6422_v4 = vld [vmem:[%s8436_s13 + $0x1f0] sm:$0xff]  }
 0x443   : > { %v2983_v3 = vmul.f32 %v2549_v61, %v1696_v11  ;;  %v2985_v53 = vmul.f32 %v2662_v17, %v1809_v12  ;;  %v2551_v63 = vpop.f32.mrb[95].mxu0  ;;  %v2664_v54 = vpop.f32.mrb[87].mxu1  ;;  %5891 = vmatprep.subr.bf16.mxu0 %v6408_v39  ;;  %5955 = vmatprep.subr.bf16.mxu1 %v6410_v58  ;;  %v1817_v26 = vadd.f32 %v7241_v23, %v7695_v55 }
 0x444   : > { %v2984_v5 = vmul.f32 %v2551_v63, %v1698_v8  ;;  %v2986_v57 = vmul.f32 %v2664_v54, %v1811_v15  ;;  %v1706_v20 = vadd.f32 %v7243_v24, %v7686_v45  ;;  %v1819_v21 = vadd.f32 %v7245_v25, %v7689_v40  ;;  %v6424_v54 = vld [vmem:[%s8436_s13 + $0x178] sm:$0xff]  }
 0x445   : > { %v3087_v44 = vpack.c.bf16 %v2983_v3, %v2975_v38  ;;  %v3089_v10 = vpack.c.bf16 %v2985_v53, %v2977_v47  ;;  %v1708_v51 = vadd.f32 %v7247_v27, %v7692_v46  ;;  %v1821_v23 = vadd.f32 %v7249_v28, %v7695_v55  ;;  %v6419_v27 = vld [vmem:[%s8436_s13 + $0x1a8] sm:$0xff]   ;;  %v6420_v28 = vld [vmem:[%s8436_s13 + $0x170] sm:$0xff]  }
 0x446   : > { %v3088_v1 = vpack.c.bf16 %v2984_v5, %v2976_v16  ;;  %v3090_v13 = vpack.c.bf16 %v2986_v57, %v2978_v52  ;;  %5892 = vmatpush3.bf16.msra.mxu0 %v6409_v62  ;;  %5956 = vmatpush3.bf16.msra.mxu1 %v6411_v18  ;;  %v6421_v62 = vld [vmem:[%s8436_s13 + $0x130] sm:$0xff]   ;;  %v1712_v3 = vadd.f32 %v7251_v29, %v7686_v45 }
 0x447   : > { %5893 = vmatprep.subr.bf16.mxu0 %v6412_v19  ;;  %5957 = vmatprep.subr.bf16.mxu1 %v6414_v0  ;;  %v6423_v18 = vld [vmem:[%s8436_s13 + $0x1b0] sm:$0xff]   ;;  %v1825_v53 = vadd.f32 %v7253_v30, %v7689_v40  ;;  %v1714_v63 = vadd.f32 %v7255_v31, %v7692_v46  ;;  %v6425_v19 = vld [vmem:[%s8436_s13 + $0x1f8] sm:$0xff]   ;;  %v1827_v0 = vadd.f32 %v7257_v32, %v7695_v55 }
 0x448   : > { %v2555_v22 = vpop.f32.mrb[96].mxu0  ;;  %v2668_v50 = vpop.f32.mrb[88].mxu1  ;;  %3695 = vmatprep.mubr.bf16.mxu0 %v3088_v1  ;;  %3792 = vmatprep.mubr.bf16.mxu1 %v3090_v13  ;;  %v1716_v29 = vadd.f32 %v7259_v33, %v7686_v45  ;;  %v1829_v30 = vadd.f32 %v7261_v34, %v7689_v40  ;;  %v1718_v57 = vadd.f32 %v7263_v35, %v7692_v46  ;;  %v6427_v35 = vld [vmem:[%s8436_s13 + $0x1b8] sm:$0xff]  }
 0x449   : > { %v2991_v7 = vmul.f32 %v2555_v22, %v1702_v9  ;;  %v2993_v39 = vmul.f32 %v2668_v50, %v1815_v6  ;;  %v2557_v58 = vpop.f32.mrb[97].mxu0  ;;  %v2670_v60 = vpop.f32.mrb[89].mxu1  ;;  %3696 = vmatmul.mubr.bf16.gmra.mrb[156].mxu0 %v3087_v44  ;;  %3793 = vmatmul.mubr.bf16.gmra.mrb[148].mxu1 %v3089_v10  ;;  %v1831_v32 = vadd.f32 %v7265_v59, %v7695_v55  ;;  %v6426_v9 = vld [vmem:[%s8436_s13 + $0x138] sm:$0xff]  }
 0x44a   : > { %v2992_v24 = vmul.f32 %v2557_v58, %v1704_v56  ;;  %v2994_v11 = vmul.f32 %v2670_v60, %v1817_v26  ;;  %v2559_v12 = vpop.f32.mrb[98].mxu0  ;;  %v2672_v25 = vpop.f32.mrb[90].mxu1  ;;  %5894 = vmatpush3.bf16.msra.mxu0 %v6413_v43  ;;  %5958 = vmatpush3.bf16.msra.mxu1 %v6415_v42  ;;  %v8596_v60 = vld [vmem:[#allocation12_spill] sm:$0xff] }
 0x44b   : > { %v2999_v49 = vmul.f32 %v2559_v12, %v1706_v20  ;;  %v3001_v8 = vmul.f32 %v2672_v25, %v1819_v21  ;;  %v2561_v38 = vpop.f32.mrb[99].mxu0  ;;  %v2674_v47 = vpop.f32.mrb[91].mxu1  ;;  %5895 = vmatprep.subr.bf16.mxu0 %v6416_v41  ;;  %5959 = vmatprep.subr.bf16.mxu1 %v6418_v2 }
 0x44c   : > { %v3000_v48 = vmul.f32 %v2561_v38, %v1708_v51  ;;  %v3002_v15 = vmul.f32 %v2674_v47, %v1821_v23  ;;  %v1722_v51 = vadd.f32 %v7267_v36, %v7686_v45  ;;  %v1837_v23 = vadd.f32 %v8596_v60, %v7695_v55  ;;  %v8599_v38 = vld [vmem:[#allocation15_spill] sm:$0xff] }
 0x44d   : > { %v3095_v16 = vpack.c.bf16 %v2999_v49, %v2991_v7  ;;  %v3097_v52 = vpack.c.bf16 %v3001_v8, %v2993_v39  ;;  %v1835_v7 = vadd.f32 %v7269_v37, %v7689_v40  ;;  %v8595_v39 = vld [vmem:[#allocation11_spill] sm:$0xff]  ;;  %v1728_v47 = vadd.f32 %v8599_v38, %v7692_v46 }
 0x44e   : > { %v3096_v61 = vpack.c.bf16 %v3000_v48, %v2992_v24  ;;  %v3098_v17 = vpack.c.bf16 %v3002_v15, %v2994_v11  ;;  %5896 = vmatpush3.bf16.msra.mxu0 %v6417_v14  ;;  %5960 = vmatpush3.bf16.msra.mxu1 %v6419_v27  ;;  %v1724_v58 = vadd.f32 %v8595_v39, %v7692_v46  ;;  %v8597_v24 = vld [vmem:[#allocation13_spill] sm:$0xff]  ;;  %v8598_v14 = vld [vmem:[#allocation14_spill] sm:$0xff] }
 0x44f   : > { %5897 = vmatprep.subr.bf16.mxu0 %v6420_v28  ;;  %5961 = vmatprep.subr.bf16.mxu1 %v6422_v4  ;;  %v1726_v11 = vadd.f32 %v8597_v24, %v7686_v45  ;;  %v1839_v27 = vadd.f32 %v8598_v14, %v7689_v40  ;;  %v8600_v28 = vld [vmem:[#allocation16_spill] sm:$0xff] }
 0x450   : > { %v2565_v31 = vpop.f32.mrb[100].mxu0  ;;  %v2678_v5 = vpop.f32.mrb[92].mxu1  ;;  %3703 = vmatprep.mubr.bf16.mxu0 %v3096_v61  ;;  %3800 = vmatprep.mubr.bf16.mxu1 %v3098_v17  ;;  %v1841_v4 = vadd.f32 %v8600_v28, %v7695_v55  ;;  %v8612_v28 = vld [vmem:[#allocation27_spill] sm:$0xff] }
 0x451   : > { %v3007_v44 = vmul.f32 %v2565_v31, %v1712_v3  ;;  %v3009_v10 = vmul.f32 %v2678_v5, %v1825_v53  ;;  %v2567_v1 = vpop.f32.mrb[101].mxu0  ;;  %v2680_v13 = vpop.f32.mrb[93].mxu1  ;;  %3704 = vmatmul.mubr.bf16.gmra.mrb[160].mxu0 %v3095_v16  ;;  %3801 = vmatmul.mubr.bf16.gmra.mrb[152].mxu1 %v3097_v52  ;;  %v8602_v31 = vld [vmem:[#allocation18_spill] sm:$0xff] }
 0x452   : > { %v3008_v33 = vmul.f32 %v2567_v1, %v1714_v63  ;;  %v3010_v43 = vmul.f32 %v2680_v13, %v1827_v0  ;;  %v2569_v42 = vpop.f32.mrb[102].mxu0  ;;  %v2682_v34 = vpop.f32.mrb[94].mxu1  ;;  %5898 = vmatpush3.bf16.msra.mxu0 %v6421_v62  ;;  %5962 = vmatpush3.bf16.msra.mxu1 %v6423_v18  ;;  %v1845_v5 = vadd.f32 %v8602_v31, %v7689_v40  ;;  %v8605_v13 = vld [vmem:[#allocation21_spill] sm:$0xff] }
 0x453   : > { %v3015_v6 = vmul.f32 %v2569_v42, %v1716_v29  ;;  %v3017_v56 = vmul.f32 %v2682_v34, %v1829_v30  ;;  %v2571_v41 = vpop.f32.mrb[103].mxu0  ;;  %v2684_v2 = vpop.f32.mrb[95].mxu1  ;;  %5899 = vmatprep.subr.bf16.mxu0 %v6424_v54  ;;  %5963 = vmatprep.subr.bf16.mxu1 %v6425_v19  ;;  %v8601_v29 = vld [vmem:[#allocation17_spill] sm:$0xff]  ;;  %v8606_v42 = vld [vmem:[#allocation22_spill] sm:$0xff] }
 0x454   : > { %v3016_v59 = vmul.f32 %v2571_v41, %v1718_v57  ;;  %v3018_v26 = vmul.f32 %v2684_v2, %v1831_v32  ;;  %v1732_v30 = vadd.f32 %v8601_v29, %v7686_v45  ;;  %v8603_v57 = vld [vmem:[#allocation19_spill] sm:$0xff]  ;;  %v1736_v32 = vadd.f32 %v8605_v13, %v7686_v45 }
 0x455   : > { %v3103_v20 = vpack.c.bf16 %v3015_v6, %v3007_v44  ;;  %v3105_v21 = vpack.c.bf16 %v3017_v56, %v3009_v10  ;;  %v1734_v44 = vadd.f32 %v8603_v57, %v7692_v46  ;;  %v8604_v10 = vld [vmem:[#allocation20_spill] sm:$0xff]  ;;  %v1849_v34 = vadd.f32 %v8606_v42, %v7689_v40  ;;  %v8607_v41 = vld [vmem:[#allocation23_spill] sm:$0xff] }
 0x456   : > { %v3104_v22 = vpack.c.bf16 %v3016_v59, %v3008_v33  ;;  %v3106_v50 = vpack.c.bf16 %v3018_v26, %v3010_v43  ;;  %5900 = vmatpush3.bf16.msra.mxu0 %v6426_v9  ;;  %5964 = vmatpush3.bf16.msra.mxu1 %v6427_v35  ;;  %v1847_v1 = vadd.f32 %v8604_v10, %v7695_v55  ;;  %v8608_v59 = vld [vmem:[#allocation24_spill] sm:$0xff]  ;;  %v8618_v10 = vld [vmem:[#allocation98_spill] sm:$0xff] }
 0x457   : > { %v1738_v2 = vadd.f32 %v8607_v41, %v7692_v46  ;;  %v1851_v26 = vadd.f32 %v8608_v59, %v7695_v55  ;;  %v8619_v41 = vld [vmem:[#allocation33_spill] sm:$0xff]  ;;  %v8620_v59 = vld [vmem:[#allocation34_spill] sm:$0xff] }
 0x458   : > { %v2575_v12 = vpop.f32.mrb[104].mxu0  ;;  %v2688_v25 = vpop.f32.mrb[96].mxu1  ;;  %3711 = vmatprep.mubr.bf16.mxu0 %v3104_v22  ;;  %3808 = vmatprep.mubr.bf16.mxu1 %v3106_v50 }
 0x459   : > { %v3023_v36 = vmul.f32 %v2575_v12, %v1722_v51  ;;  %v3025_v49 = vmul.f32 %v2688_v25, %v1835_v7  ;;  %v2577_v8 = vpop.f32.mrb[105].mxu0  ;;  %v2690_v37 = vpop.f32.mrb[97].mxu1  ;;  %3712 = vmatmul.mubr.bf16.gmra.mrb[164].mxu0 %v3103_v20  ;;  %3809 = vmatmul.mubr.bf16.gmra.mrb[156].mxu1 %v3105_v21  ;;  %v8609_v12 = vld [vmem:[#allocation97_spill] sm:$0xff] }
 0x45a   : > { %v3024_v48 = vmul.f32 %v2577_v8, %v1724_v58  ;;  %v3026_v15 = vmul.f32 %v2690_v37, %v1837_v23  ;;  %v2579_v16 = vpop.f32.mrb[106].mxu0  ;;  %v2692_v52 = vpop.f32.mrb[98].mxu1  ;;  %v1295_v25 = vsub.s32 4, %v8609_v12  ;;  %v8611_v8 = vld [vmem:[#allocation26_spill] sm:$0xff]  ;;  %v1303_v38 = vsub.s32 6, %v8609_v12 }
 0x45b   : > { %v3031_v61 = vmul.f32 %v2579_v16, %v1726_v11  ;;  %v3033_v17 = vmul.f32 %v2692_v52, %v1839_v27  ;;  %v2581_v62 = vpop.f32.mrb[107].mxu0  ;;  %v2694_v18 = vpop.f32.mrb[99].mxu1  ;;  %v1855_v37 = vadd.f32 %v8611_v8, %v7689_v40  ;;  %v8614_v16 = vld [vmem:[#allocation29_spill] sm:$0xff] }
 0x45c   : > { %v3032_v3 = vmul.f32 %v2581_v62, %v1728_v47  ;;  %v3034_v53 = vmul.f32 %v2694_v18, %v1841_v4  ;;  %v1299_v47 = vsub.s32 5, %v8609_v12  ;;  %v1744_v4 = vadd.f32 %v8612_v28, %v7692_v46  ;;  %v8615_v18 = vld [vmem:[#allocation30_spill] sm:$0xff] }
 0x45d   : > { %v3111_v63 = vpack.c.bf16 %v3031_v61, %v3023_v36  ;;  %v3113_v54 = vpack.c.bf16 %v3033_v17, %v3025_v49  ;;  %v8610_v36 = vld [vmem:[#allocation25_spill] sm:$0xff]  ;;  %v1746_v52 = vadd.f32 %v8614_v16, %v7686_v45  ;;  %v1307_v61 = vsub.s32 7, %v8609_v12 }
 0x45e   : > { %v3112_v19 = vpack.c.bf16 %v3032_v3, %v3024_v48  ;;  %v3114_v0 = vpack.c.bf16 %v3034_v53, %v3026_v15  ;;  %v1742_v49 = vadd.f32 %v8610_v36, %v7686_v45  ;;  %v8613_v48 = vld [vmem:[#allocation28_spill] sm:$0xff]  ;;  %v1859_v3 = vadd.f32 %v8615_v18, %v7689_v40 }
 0x45f   : > { %v1857_v15 = vadd.f32 %v8613_v48, %v7695_v55  ;;  %v8617_v45 = vld [vmem:[#allocation32_spill] sm:$0xff]  ;;  %v7923_v40 = vrot.slane %v8618_v10, %v1303_v38  ;;  %v7926_v42 = vrot.slane %v8618_v10, %v1299_v47 }
 0x460   : > { %v2585_v33 = vpop.f32.mrb[108].mxu0  ;;  %v2698_v43 = vpop.f32.mrb[100].mxu1  ;;  %3719 = vmatprep.mubr.bf16.mxu0 %v3112_v19  ;;  %3816 = vmatprep.mubr.bf16.mxu1 %v3114_v0  ;;  %v8616_v0 = vld [vmem:[#allocation31_spill] sm:$0xff] }
 0x461   : > { %v3039_v9 = vmul.f32 %v2585_v33, %v1732_v30  ;;  %v3041_v35 = vmul.f32 %v2698_v43, %v1845_v5  ;;  %v2587_v6 = vpop.f32.mrb[109].mxu0  ;;  %v2700_v56 = vpop.f32.mrb[101].mxu1  ;;  %3720 = vmatmul.mubr.bf16.gmra.mrb[168].mxu0 %v3111_v63  ;;  %3817 = vmatmul.mubr.bf16.gmra.mrb[160].mxu1 %v3113_v54  ;;  %v1748_v29 = vadd.f32 %v8616_v0, %v7692_v46  ;;  %v8629_v0 = vld [vmem:[#allocation43_spill] sm:$0xff] }
 0x462   : > { %v3040_v20 = vmul.f32 %v2587_v6, %v1734_v44  ;;  %v3042_v21 = vmul.f32 %v2700_v56, %v1847_v1  ;;  %v2589_v22 = vpop.f32.mrb[110].mxu0  ;;  %v2702_v50 = vpop.f32.mrb[102].mxu1  ;;  %v1861_v30 = vadd.f32 %v8617_v45, %v7695_v55  ;;  %v7920_v1 = vrot.slane %v8618_v10, %v1295_v25  ;;  %v8630_v45 = vld [vmem:[#allocation44_spill] sm:$0xff] }
 0x463   : > { %v3047_v51 = vmul.f32 %v2589_v22, %v1736_v32  ;;  %v3049_v7 = vmul.f32 %v2702_v50, %v1849_v34  ;;  %v2591_v39 = vpop.f32.mrb[111].mxu0  ;;  %v2704_v58 = vpop.f32.mrb[103].mxu1  ;;  %v7929_v46 = vrot.slane %v8618_v10, %v1307_v61  ;;  %v8622_v22 = vld [vmem:[#allocation36_spill] sm:$0xff]  ;;  %v8632_v10 = vld [vmem:[#allocation46_spill] sm:$0xff] }
 0x464   : > { %v3048_v60 = vmul.f32 %v2591_v39, %v1738_v2  ;;  %v3050_v23 = vmul.f32 %v2704_v58, %v1851_v26  ;;  %v1898_v2 = vadd.f32 %v8619_v41, %v7920_v1  ;;  %v2011_v26 = vadd.f32 %v8620_v59, %v7923_v40 }
 0x465   : > { %v3119_v24 = vpack.c.bf16 %v3047_v51, %v3039_v9  ;;  %v3121_v11 = vpack.c.bf16 %v3049_v7, %v3041_v35  ;;  %v2013_v50 = vadd.f32 %v8622_v22, %v7929_v46  ;;  %v8623_v51 = vld [vmem:[#allocation37_spill] sm:$0xff] }
 0x466   : > { %v3120_v14 = vpack.c.bf16 %v3048_v60, %v3040_v20  ;;  %v3122_v27 = vpack.c.bf16 %v3050_v23, %v3042_v21  ;;  %v8621_v20 = vld [vmem:[#allocation35_spill] sm:$0xff]  ;;  %v1902_v7 = vadd.f32 %v8623_v51, %v7920_v1  ;;  %v8624_v60 = vld [vmem:[#allocation38_spill] sm:$0xff] }
 0x467   : > { %v1900_v21 = vadd.f32 %v8621_v20, %v7926_v42  ;;  %v2015_v23 = vadd.f32 %v8624_v60, %v7923_v40 }
 0x468   : > { %v2595_v17 = vpop.f32.mrb[112].mxu0  ;;  %v2708_v62 = vpop.f32.mrb[104].mxu1  ;;  %3727 = vmatprep.mubr.bf16.mxu0 %v3120_v14  ;;  %3824 = vmatprep.mubr.bf16.mxu1 %v3122_v27  ;;  %v8625_v27 = vld [vmem:[#allocation39_spill] sm:$0xff] }
 0x469   : > { %v3055_v53 = vmul.f32 %v2595_v17, %v1742_v49  ;;  %v3057_v63 = vmul.f32 %v2708_v62, %v1855_v37  ;;  %v2597_v54 = vpop.f32.mrb[113].mxu0  ;;  %v2710_v19 = vpop.f32.mrb[105].mxu1  ;;  %3728 = vmatmul.mubr.bf16.gmra.mrb[172].mxu0 %v3119_v24  ;;  %3825 = vmatmul.mubr.bf16.gmra.mrb[164].mxu1 %v3121_v11  ;;  %v1904_v36 = vadd.f32 %v8625_v27, %v7926_v42  ;;  %v8626_v49 = vld [vmem:[#allocation40_spill] sm:$0xff] }
 0x46a   : > { %v3056_v31 = vmul.f32 %v2597_v54, %v1744_v4  ;;  %v3058_v5 = vmul.f32 %v2710_v19, %v1857_v15  ;;  %v2599_v57 = vpop.f32.mrb[114].mxu0  ;;  %v2712_v44 = vpop.f32.mrb[106].mxu1  ;;  %v2017_v8 = vadd.f32 %v8626_v49, %v7929_v46  ;;  %v8628_v54 = vld [vmem:[#allocation42_spill] sm:$0xff] }
 0x46b   : > { %v3063_v13 = vmul.f32 %v2599_v57, %v1746_v52  ;;  %v3065_v32 = vmul.f32 %v2712_v44, %v1859_v3  ;;  %v2601_v33 = vpop.f32.mrb[115].mxu0  ;;  %v2714_v43 = vpop.f32.mrb[107].mxu1  ;;  %v2021_v19 = vadd.f32 %v8628_v54, %v7923_v40 }
 0x46c   : > { %v3064_v55 = vmul.f32 %v2601_v33, %v1748_v29  ;;  %v3066_v34 = vmul.f32 %v2714_v43, %v1861_v30  ;;  %v1910_v29 = vadd.f32 %v8629_v0, %v7926_v42  ;;  %v2023_v30 = vadd.f32 %v8630_v45, %v7929_v46 }
 0x46d   : > { %v3127_v9 = vpack.c.bf16 %v3063_v13, %v3055_v53  ;;  %v3129_v35 = vpack.c.bf16 %v3065_v32, %v3057_v63  ;;  %v8627_v53 = vld [vmem:[#allocation41_spill] sm:$0xff]  ;;  %v2025_v13 = vadd.f32 %v8632_v10, %v7923_v40 }
 0x46e   : > { %v3128_v6 = vpack.c.bf16 %v3064_v55, %v3056_v31  ;;  %v3130_v56 = vpack.c.bf16 %v3066_v34, %v3058_v5  ;;  %v1908_v63 = vadd.f32 %v8627_v53, %v7920_v1  ;;  %v8631_v31 = vld [vmem:[#allocation45_spill] sm:$0xff]  ;;  %v8633_v34 = vld [vmem:[#allocation47_spill] sm:$0xff] }
 0x46f   : > { %v1912_v5 = vadd.f32 %v8631_v31, %v7920_v1 }
 0x470   : > { %v2751_v39 = vpop.f32.mrb[116].mxu0  ;;  %v2864_v58 = vpop.f32.mrb[108].mxu1  ;;  %3735 = vmatprep.mubr.bf16.mxu0 %v3128_v6  ;;  %3832 = vmatprep.mubr.bf16.mxu1 %v3130_v56 }
 0x471   : > { %v2947_v24 = vmul.f32 %v2751_v39, %v1898_v2  ;;  %v2949_v11 = vmul.f32 %v2864_v58, %v2011_v26  ;;  %v2753_v25 = vpop.f32.mrb[117].mxu0  ;;  %v2866_v14 = vpop.f32.mrb[109].mxu1  ;;  %3736 = vmatmul.mubr.bf16.gmra.mrb[176].mxu0 %v3127_v9  ;;  %3833 = vmatmul.mubr.bf16.gmra.mrb[168].mxu1 %v3129_v35  ;;  %v1914_v9 = vadd.f32 %v8633_v34, %v7926_v42  ;;  %v8634_v35 = vld [vmem:[#allocation48_spill] sm:$0xff] }
 0x472   : > { %v2948_v37 = vmul.f32 %v2753_v25, %v1900_v21  ;;  %v2950_v38 = vmul.f32 %v2866_v14, %v2013_v50  ;;  %v2755_v47 = vpop.f32.mrb[118].mxu0  ;;  %v2868_v28 = vpop.f32.mrb[110].mxu1  ;;  %v2027_v6 = vadd.f32 %v8634_v35, %v7929_v46  ;;  %v8637_v14 = vld [vmem:[#allocation51_spill] sm:$0xff] }
 0x473   : > { %v2955_v4 = vmul.f32 %v2755_v47, %v1902_v7  ;;  %v2957_v48 = vmul.f32 %v2868_v28, %v2015_v23  ;;  %v2757_v15 = vpop.f32.mrb[119].mxu0  ;;  %v2870_v16 = vpop.f32.mrb[111].mxu1  ;;  %v8635_v23 = vld [vmem:[#allocation49_spill] sm:$0xff]  ;;  %v1920_v27 = vadd.f32 %v8637_v14, %v7926_v42  ;;  %v8640_v28 = vld [vmem:[#allocation54_spill] sm:$0xff] }
 0x474   : > { %v2956_v52 = vmul.f32 %v2757_v15, %v1904_v36  ;;  %v2958_v61 = vmul.f32 %v2870_v16, %v2017_v8  ;;  %v8638_v36 = vld [vmem:[#allocation52_spill] sm:$0xff]  ;;  %v8639_v8 = vld [vmem:[#allocation53_spill] sm:$0xff] }
 0x475   : > { %v3075_v17 = vpack.c.bf16 %v2955_v4, %v2947_v24  ;;  %v3077_v62 = vpack.c.bf16 %v2957_v48, %v2949_v11  ;;  %v1918_v24 = vadd.f32 %v8635_v23, %v7920_v1  ;;  %v8636_v11 = vld [vmem:[#allocation50_spill] sm:$0xff]  ;;  %v2033_v49 = vadd.f32 %v8638_v36, %v7929_v46 }
 0x476   : > { %v3076_v18 = vpack.c.bf16 %v2956_v52, %v2948_v37  ;;  %v3078_v3 = vpack.c.bf16 %v2958_v61, %v2950_v38  ;;  %v2031_v25 = vadd.f32 %v8636_v11, %v7923_v40  ;;  %v1922_v37 = vadd.f32 %v8639_v8, %v7920_v1  ;;  %v8641_v61 = vld [vmem:[#allocation55_spill] sm:$0xff] }
 0x477   : > { %v2035_v4 = vadd.f32 %v8640_v28, %v7923_v40 }
 0x478   : > { %v2761_v57 = vpop.f32.mrb[120].mxu0  ;;  %v2874_v44 = vpop.f32.mrb[112].mxu1  ;;  %3873 = vmatprep.mubr.bf16.mxu0 %v3076_v18  ;;  %3970 = vmatprep.mubr.bf16.mxu1 %v3078_v3 }
 0x479   : > { %v2963_v32 = vmul.f32 %v2761_v57, %v1908_v63  ;;  %v2965_v33 = vmul.f32 %v2874_v44, %v2021_v19  ;;  %v2763_v43 = vpop.f32.mrb[121].mxu0  ;;  %v2876_v55 = vpop.f32.mrb[113].mxu1  ;;  %3874 = vmatmul.mubr.bf16.vlgmr.msra.gmra.mrb[180].mxu0 %v3075_v17  ;;  %3971 = vmatmul.mubr.bf16.vlgmr.msra.gmra.mrb[172].mxu1 %v3077_v62  ;;  %v1924_v17 = vadd.f32 %v8641_v61, %v7926_v42  ;;  %v8642_v62 = vld [vmem:[#allocation56_spill] sm:$0xff] }
 0x47a   : > { %v2964_v56 = vmul.f32 %v2763_v43, %v1910_v29  ;;  %v2966_v41 = vmul.f32 %v2876_v55, %v2023_v30  ;;  %v2765_v2 = vpop.f32.mrb[122].mxu0  ;;  %v2878_v59 = vpop.f32.mrb[114].mxu1  ;;  %v2037_v18 = vadd.f32 %v8642_v62, %v7929_v46  ;;  %v8645_v55 = vld [vmem:[#allocation59_spill] sm:$0xff] }
 0x47b   : > { %v2971_v26 = vmul.f32 %v2765_v2, %v1912_v5  ;;  %v2973_v20 = vmul.f32 %v2878_v59, %v2025_v13  ;;  %v2767_v21 = vpop.f32.mrb[123].mxu0  ;;  %v2880_v22 = vpop.f32.mrb[115].mxu1  ;;  %v8643_v13 = vld [vmem:[#allocation57_spill] sm:$0xff]  ;;  %v1930_v34 = vadd.f32 %v8645_v55, %v7926_v42  ;;  %v8648_v59 = vld [vmem:[#allocation62_spill] sm:$0xff] }
 0x47c   : > { %v2972_v50 = vmul.f32 %v2767_v21, %v1914_v9  ;;  %v2974_v51 = vmul.f32 %v2880_v22, %v2027_v6  ;;  %v8646_v9 = vld [vmem:[#allocation60_spill] sm:$0xff]  ;;  %v8647_v6 = vld [vmem:[#allocation61_spill] sm:$0xff] }
 0x47d   : > { %v3083_v7 = vpack.c.bf16 %v2971_v26, %v2963_v32  ;;  %v3085_v39 = vpack.c.bf16 %v2973_v20, %v2965_v33  ;;  %v1928_v32 = vadd.f32 %v8643_v13, %v7920_v1  ;;  %v8644_v33 = vld [vmem:[#allocation58_spill] sm:$0xff]  ;;  %v2043_v35 = vadd.f32 %v8646_v9, %v7929_v46 }
 0x47e   : > { %v3084_v58 = vpack.c.bf16 %v2972_v50, %v2964_v56  ;;  %v3086_v60 = vpack.c.bf16 %v2974_v51, %v2966_v41  ;;  %v2041_v43 = vadd.f32 %v8644_v33, %v7923_v40  ;;  %v1932_v56 = vadd.f32 %v8647_v6, %v7920_v1  ;;  %v8649_v51 = vld [vmem:[#allocation63_spill] sm:$0xff] }
 0x47f   : > { %v2045_v26 = vadd.f32 %v8648_v59, %v7923_v40 }
 0x480   : > { %v2771_v38 = vpop.f32.mrb[124].mxu0  ;;  %v2884_v47 = vpop.f32.mrb[116].mxu1  ;;  %3881 = vmatprep.mubr.bf16.mxu0 %v3084_v58  ;;  %3978 = vmatprep.mubr.bf16.mxu1 %v3086_v60 }
 0x481   : > { %v2979_v48 = vmul.f32 %v2771_v38, %v1918_v24  ;;  %v2981_v15 = vmul.f32 %v2884_v47, %v2031_v25  ;;  %v2773_v16 = vpop.f32.mrb[125].mxu0  ;;  %v2886_v52 = vpop.f32.mrb[117].mxu1  ;;  %3882 = vmatmul.mubr.bf16.gmra.mrb[184].mxu0 %v3083_v7  ;;  %3979 = vmatmul.mubr.bf16.gmra.mrb[176].mxu1 %v3085_v39  ;;  %v1934_v7 = vadd.f32 %v8649_v51, %v7926_v42  ;;  %v8650_v39 = vld [vmem:[#allocation64_spill] sm:$0xff] }
 0x482   : > { %v2980_v3 = vmul.f32 %v2773_v16, %v1920_v27  ;;  %v2982_v53 = vmul.f32 %v2886_v52, %v2033_v49  ;;  %v2775_v63 = vpop.f32.mrb[126].mxu0  ;;  %v2888_v54 = vpop.f32.mrb[118].mxu1  ;;  %v2047_v58 = vadd.f32 %v8650_v39, %v7929_v46  ;;  %v8653_v52 = vld [vmem:[#allocation67_spill] sm:$0xff] }
 0x483   : > { %v2987_v19 = vmul.f32 %v2775_v63, %v1922_v37  ;;  %v2989_v0 = vmul.f32 %v2888_v54, %v2035_v4  ;;  %v2777_v29 = vpop.f32.mrb[127].mxu0  ;;  %v2890_v45 = vpop.f32.mrb[119].mxu1  ;;  %v8651_v4 = vld [vmem:[#allocation65_spill] sm:$0xff]  ;;  %v1940_v61 = vadd.f32 %v8653_v52, %v7926_v42  ;;  %v8656_v54 = vld [vmem:[#allocation70_spill] sm:$0xff] }
 0x484   : > { %v2988_v30 = vmul.f32 %v2777_v29, %v1924_v17  ;;  %v2990_v31 = vmul.f32 %v2890_v45, %v2037_v18  ;;  %v8654_v17 = vld [vmem:[#allocation68_spill] sm:$0xff]  ;;  %v8655_v18 = vld [vmem:[#allocation69_spill] sm:$0xff] }
 0x485   : > { %v3091_v5 = vpack.c.bf16 %v2987_v19, %v2979_v48  ;;  %v3093_v57 = vpack.c.bf16 %v2989_v0, %v2981_v15  ;;  %v1938_v48 = vadd.f32 %v8651_v4, %v7920_v1  ;;  %v8652_v15 = vld [vmem:[#allocation66_spill] sm:$0xff]  ;;  %v2053_v62 = vadd.f32 %v8654_v17, %v7929_v46 }
 0x486   : > { %v3092_v44 = vpack.c.bf16 %v2988_v30, %v2980_v3  ;;  %v3094_v10 = vpack.c.bf16 %v2990_v31, %v2982_v53  ;;  %v2051_v16 = vadd.f32 %v8652_v15, %v7923_v40  ;;  %v1942_v3 = vadd.f32 %v8655_v18, %v7920_v1  ;;  %v8657_v31 = vld [vmem:[#allocation71_spill] sm:$0xff] }
 0x487   : > { %v2055_v19 = vadd.f32 %v8656_v54, %v7923_v40 }
 0x488   : > { %v2781_v41 = vpop.f32.mrb[128].mxu0  ;;  %v2894_v2 = vpop.f32.mrb[120].mxu1  ;;  %3889 = vmatprep.mubr.bf16.mxu0 %v3092_v44  ;;  %3986 = vmatprep.mubr.bf16.mxu1 %v3094_v10 }
 0x489   : > { %v2995_v20 = vmul.f32 %v2781_v41, %v1928_v32  ;;  %v2997_v21 = vmul.f32 %v2894_v2, %v2041_v43  ;;  %v2783_v22 = vpop.f32.mrb[129].mxu0  ;;  %v2896_v50 = vpop.f32.mrb[121].mxu1  ;;  %3890 = vmatmul.mubr.bf16.gmra.mrb[188].mxu0 %v3091_v5  ;;  %3987 = vmatmul.mubr.bf16.gmra.mrb[180].mxu1 %v3093_v57  ;;  %v1944_v5 = vadd.f32 %v8657_v31, %v7926_v42  ;;  %v8658_v57 = vld [vmem:[#allocation72_spill] sm:$0xff] }
 0x48a   : > { %v2996_v60 = vmul.f32 %v2783_v22, %v1930_v34  ;;  %v2998_v23 = vmul.f32 %v2896_v50, %v2043_v35  ;;  %v2785_v24 = vpop.f32.mrb[130].mxu0  ;;  %v2898_v11 = vpop.f32.mrb[122].mxu1  ;;  %v2057_v44 = vadd.f32 %v8658_v57, %v7929_v46  ;;  %v8661_v50 = vld [vmem:[#allocation75_spill] sm:$0xff] }
 0x48b   : > { %v3003_v25 = vmul.f32 %v2785_v24, %v1932_v56  ;;  %v3005_v14 = vmul.f32 %v2898_v11, %v2045_v26  ;;  %v2787_v27 = vpop.f32.mrb[131].mxu0  ;;  %v2900_v36 = vpop.f32.mrb[123].mxu1  ;;  %v8659_v26 = vld [vmem:[#allocation73_spill] sm:$0xff]  ;;  %v1950_v51 = vadd.f32 %v8661_v50, %v7926_v42  ;;  %v8664_v11 = vld [vmem:[#allocation78_spill] sm:$0xff] }
 0x48c   : > { %v3004_v49 = vmul.f32 %v2787_v27, %v1934_v7  ;;  %v3006_v8 = vmul.f32 %v2900_v36, %v2047_v58  ;;  %v8662_v7 = vld [vmem:[#allocation76_spill] sm:$0xff]  ;;  %v8663_v58 = vld [vmem:[#allocation77_spill] sm:$0xff] }
 0x48d   : > { %v3099_v37 = vpack.c.bf16 %v3003_v25, %v2995_v20  ;;  %v3101_v38 = vpack.c.bf16 %v3005_v14, %v2997_v21  ;;  %v1948_v20 = vadd.f32 %v8659_v26, %v7920_v1  ;;  %v8660_v21 = vld [vmem:[#allocation74_spill] sm:$0xff]  ;;  %v2063_v39 = vadd.f32 %v8662_v7, %v7929_v46 }
 0x48e   : > { %v3100_v47 = vpack.c.bf16 %v3004_v49, %v2996_v60  ;;  %v3102_v28 = vpack.c.bf16 %v3006_v8, %v2998_v23  ;;  %v2061_v22 = vadd.f32 %v8660_v21, %v7923_v40  ;;  %v1952_v60 = vadd.f32 %v8663_v58, %v7920_v1  ;;  %v8665_v8 = vld [vmem:[#allocation79_spill] sm:$0xff] }
 0x48f   : > { %v2065_v25 = vadd.f32 %v8664_v11, %v7923_v40 }
 0x490   : > { %v2791_v53 = vpop.f32.mrb[132].mxu0  ;;  %v2904_v63 = vpop.f32.mrb[124].mxu1  ;;  %3897 = vmatprep.mubr.bf16.mxu0 %v3100_v47  ;;  %3994 = vmatprep.mubr.bf16.mxu1 %v3102_v28 }
 0x491   : > { %v3011_v0 = vmul.f32 %v2791_v53, %v1938_v48  ;;  %v3013_v29 = vmul.f32 %v2904_v63, %v2051_v16  ;;  %v2793_v45 = vpop.f32.mrb[133].mxu0  ;;  %v2906_v30 = vpop.f32.mrb[125].mxu1  ;;  %3898 = vmatmul.mubr.bf16.gmra.mrb[192].mxu0 %v3099_v37  ;;  %3995 = vmatmul.mubr.bf16.gmra.mrb[184].mxu1 %v3101_v38  ;;  %v1954_v37 = vadd.f32 %v8665_v8, %v7926_v42  ;;  %v8666_v38 = vld [vmem:[#allocation80_spill] sm:$0xff] }
 0x492   : > { %v3012_v10 = vmul.f32 %v2793_v45, %v1940_v61  ;;  %v3014_v13 = vmul.f32 %v2906_v30, %v2053_v62  ;;  %v2795_v32 = vpop.f32.mrb[134].mxu0  ;;  %v2908_v33 = vpop.f32.mrb[126].mxu1  ;;  %v2067_v47 = vadd.f32 %v8666_v38, %v7929_v46  ;;  %v8669_v30 = vld [vmem:[#allocation83_spill] sm:$0xff] }
 0x493   : > { %v3019_v43 = vmul.f32 %v2795_v32, %v1942_v3  ;;  %v3021_v55 = vmul.f32 %v2908_v33, %v2055_v19  ;;  %v2797_v34 = vpop.f32.mrb[135].mxu0  ;;  %v2910_v9 = vpop.f32.mrb[127].mxu1  ;;  %v8667_v19 = vld [vmem:[#allocation81_spill] sm:$0xff]  ;;  %v1960_v31 = vadd.f32 %v8669_v30, %v7926_v42  ;;  %v8672_v33 = vld [vmem:[#allocation86_spill] sm:$0xff] }
 0x494   : > { %v3020_v35 = vmul.f32 %v2797_v34, %v1944_v5  ;;  %v3022_v6 = vmul.f32 %v2910_v9, %v2057_v44  ;;  %v8670_v5 = vld [vmem:[#allocation84_spill] sm:$0xff]  ;;  %v8671_v44 = vld [vmem:[#allocation85_spill] sm:$0xff] }
 0x495   : > { %v3107_v56 = vpack.c.bf16 %v3019_v43, %v3011_v0  ;;  %v3109_v41 = vpack.c.bf16 %v3021_v55, %v3013_v29  ;;  %v1958_v0 = vadd.f32 %v8667_v19, %v7920_v1  ;;  %v8668_v29 = vld [vmem:[#allocation82_spill] sm:$0xff]  ;;  %v2073_v57 = vadd.f32 %v8670_v5, %v7929_v46 }
 0x496   : > { %v3108_v2 = vpack.c.bf16 %v3020_v35, %v3012_v10  ;;  %v3110_v59 = vpack.c.bf16 %v3022_v6, %v3014_v13  ;;  %v2071_v45 = vadd.f32 %v8668_v29, %v7923_v40  ;;  %v1962_v10 = vadd.f32 %v8671_v44, %v7920_v1  ;;  %v8673_v6 = vld [vmem:[#allocation87_spill] sm:$0xff] }
 0x497   : > { %v2075_v43 = vadd.f32 %v8672_v33, %v7923_v40 }
 0x498   : > { %v2801_v23 = vpop.f32.mrb[136].mxu0  ;;  %v2914_v24 = vpop.f32.mrb[128].mxu1  ;;  %3905 = vmatprep.mubr.bf16.mxu0 %v3108_v2  ;;  %4002 = vmatprep.mubr.bf16.mxu1 %v3110_v59 }
 0x499   : > { %v3027_v14 = vmul.f32 %v2801_v23, %v1948_v20  ;;  %v3029_v27 = vmul.f32 %v2914_v24, %v2061_v22  ;;  %v2803_v36 = vpop.f32.mrb[137].mxu0  ;;  %v2916_v49 = vpop.f32.mrb[129].mxu1  ;;  %3906 = vmatmul.mubr.bf16.gmra.mrb[196].mxu0 %v3107_v56  ;;  %4003 = vmatmul.mubr.bf16.gmra.mrb[188].mxu1 %v3109_v41  ;;  %v1964_v56 = vadd.f32 %v8673_v6, %v7926_v42  ;;  %v8674_v41 = vld [vmem:[#allocation88_spill] sm:$0xff] }
 0x49a   : > { %v3028_v28 = vmul.f32 %v2803_v36, %v1950_v51  ;;  %v3030_v4 = vmul.f32 %v2916_v49, %v2063_v39  ;;  %v2805_v48 = vpop.f32.mrb[138].mxu0  ;;  %v2918_v15 = vpop.f32.mrb[130].mxu1  ;;  %v2077_v2 = vadd.f32 %v8674_v41, %v7929_v46  ;;  %v8677_v49 = vld [vmem:[#allocation91_spill] sm:$0xff] }
 0x49b   : > { %v3035_v16 = vmul.f32 %v2805_v48, %v1952_v60  ;;  %v3037_v52 = vmul.f32 %v2918_v15, %v2065_v25  ;;  %v2807_v61 = vpop.f32.mrb[139].mxu0  ;;  %v2920_v17 = vpop.f32.mrb[131].mxu1  ;;  %v8675_v25 = vld [vmem:[#allocation89_spill] sm:$0xff]  ;;  %v1970_v8 = vadd.f32 %v8677_v49, %v7926_v42  ;;  %v8680_v15 = vld [vmem:[#allocation94_spill] sm:$0xff] }
 0x49c   : > { %v3036_v62 = vmul.f32 %v2807_v61, %v1954_v37  ;;  %v3038_v18 = vmul.f32 %v2920_v17, %v2067_v47  ;;  %v8678_v37 = vld [vmem:[#allocation92_spill] sm:$0xff]  ;;  %v8679_v47 = vld [vmem:[#allocation93_spill] sm:$0xff] }
 0x49d   : > { %v3115_v3 = vpack.c.bf16 %v3035_v16, %v3027_v14  ;;  %v3117_v53 = vpack.c.bf16 %v3037_v52, %v3029_v27  ;;  %v1968_v14 = vadd.f32 %v8675_v25, %v7920_v1  ;;  %v8676_v27 = vld [vmem:[#allocation90_spill] sm:$0xff]  ;;  %v2083_v38 = vadd.f32 %v8678_v37, %v7929_v46 }
 0x49e   : > { %v3116_v63 = vpack.c.bf16 %v3036_v62, %v3028_v28  ;;  %v3118_v54 = vpack.c.bf16 %v3038_v18, %v3030_v4  ;;  %v2081_v36 = vadd.f32 %v8676_v27, %v7923_v40  ;;  %v1972_v28 = vadd.f32 %v8679_v47, %v7920_v1  ;;  %v8681_v18 = vld [vmem:[#allocation95_spill] sm:$0xff] }
 0x49f   : > { %v2085_v16 = vadd.f32 %v8680_v15, %v7923_v40 }
 0x4a0   : > { %v2811_v13 = vpop.f32.mrb[140].mxu0  ;;  %v2924_v32 = vpop.f32.mrb[132].mxu1  ;;  %3913 = vmatprep.mubr.bf16.mxu0 %v3116_v63  ;;  %4010 = vmatprep.mubr.bf16.mxu1 %v3118_v54 }
 0x4a1   : > { %v3043_v55 = vmul.f32 %v2811_v13, %v1958_v0  ;;  %v3045_v34 = vmul.f32 %v2924_v32, %v2071_v45  ;;  %v2813_v9 = vpop.f32.mrb[141].mxu0  ;;  %v2926_v35 = vpop.f32.mrb[133].mxu1  ;;  %3914 = vmatmul.mubr.bf16.gmra.mrb[200].mxu0 %v3115_v3  ;;  %4011 = vmatmul.mubr.bf16.gmra.mrb[192].mxu1 %v3117_v53  ;;  %v1974_v3 = vadd.f32 %v8681_v18, %v7926_v42  ;;  %v8682_v53 = vld [vmem:[#allocation96_spill] sm:$0xff] }
 0x4a2   : > { %v3044_v59 = vmul.f32 %v2813_v9, %v1960_v31  ;;  %v3046_v26 = vmul.f32 %v2926_v35, %v2073_v57  ;;  %v2815_v20 = vpop.f32.mrb[142].mxu0  ;;  %v2928_v21 = vpop.f32.mrb[134].mxu1  ;;  %v2087_v63 = vadd.f32 %v8682_v53, %v7929_v46 }
 0x4a3   : > { %v3051_v22 = vmul.f32 %v2815_v20, %v1962_v10  ;;  %v3053_v50 = vmul.f32 %v2928_v21, %v2075_v43  ;;  %v2817_v51 = vpop.f32.mrb[143].mxu0  ;;  %v2930_v7 = vpop.f32.mrb[135].mxu1  ;;  %v6545_v21 = vmov 1.0|1.0  }
 0x4a4   : > { %v3052_v39 = vmul.f32 %v2817_v51, %v1964_v56  ;;  %v3054_v58 = vmul.f32 %v2930_v7, %v2077_v2  ;;  %v2213_v56 = vadd.s32 8, %v8609_v12 }
 0x4a5   : > { %v3123_v60 = vpack.c.bf16 %v3051_v22, %v3043_v55  ;;  %v3125_v23 = vpack.c.bf16 %v3053_v50, %v3045_v34 }
 0x4a6   : > { %v3124_v24 = vpack.c.bf16 %v3052_v39, %v3044_v59  ;;  %v3126_v11 = vpack.c.bf16 %v3054_v58, %v3046_v26  ;;  %v8067_v26 = vld [vmem:[%s882_s1] ss:$0 sm:$0xff] }
 0x4a7   : > { %vm2220_vm12 = vcmp.eq.s32.totalorder %v8067_v26, %v8609_v12  ;;  %vm2221_vm14 = vcmp.eq.s32.totalorder %v8067_v26, %v2213_v56 }
 0x4a8   : > { %v2821_v4 = vpop.f32.mrb[144].mxu0  ;;  %v2934_v48 = vpop.f32.mrb[136].mxu1  ;;  %3921 = vmatprep.mubr.bf16.mxu0 %v3124_v24  ;;  %4018 = vmatprep.mubr.bf16.mxu1 %v3126_v11  ;;  %vm5680_vm15 = vmpackc.low %vm2221_vm14, %vm2220_vm12 }
 0x4a9   : > { %v3059_v52 = vmul.f32 %v2821_v4, %v1968_v14  ;;  %v3061_v61 = vmul.f32 %v2934_v48, %v2081_v36  ;;  %v2823_v17 = vpop.f32.mrb[145].mxu0  ;;  %v2936_v62 = vpop.f32.mrb[137].mxu1  ;;  %3922 = vmatmul.mubr.bf16.gmra.mrb[204].mxu0 %v3123_v60  ;;  %4019 = vmatmul.mubr.bf16.gmra.mrb[196].mxu1 %v3125_v23 }
 0x4aa   : > { %v3060_v1 = vmul.f32 %v2823_v17, %v1970_v8  ;;  %v3062_v54 = vmul.f32 %v2936_v62, %v2083_v38  ;;  %v2825_v19 = vpop.f32.mrb[146].mxu0  ;;  %v2938_v0 = vpop.f32.mrb[138].mxu1 }
 0x4ab   : > { %v3067_v29 = vmul.f32 %v2825_v19, %v1972_v28  ;;  %v3069_v45 = vmul.f32 %v2938_v0, %v2085_v16  ;;  %v2827_v30 = vpop.f32.mrb[147].mxu0  ;;  %v2940_v40 = vpop.f32.mrb[139].mxu1 }
 0x4ac   : > { %v3068_v31 = vmul.f32 %v2827_v30, %v1974_v3  ;;  %v3070_v5 = vmul.f32 %v2940_v40, %v2087_v63 }
 0x4ad   : > { %v3131_v57 = vpack.c.bf16 %v3067_v29, %v3059_v52  ;;  %v3133_v44 = vpack.c.bf16 %v3069_v45, %v3061_v61 }
 0x4ae   : > { %v3132_v10 = vpack.c.bf16 %v3068_v31, %v3060_v1  ;;  %v3134_v13 = vpack.c.bf16 %v3070_v5, %v3062_v54 }
 0x4b0   : > { %3929 = vmatprep.mubr.bf16.mxu0 %v3132_v10  ;;  %4026 = vmatprep.mubr.bf16.mxu1 %v3134_v13 }
 0x4b1   : > { %3930 = vmatmul.mubr.bf16.gmra.mrb[208].mxu0 %v3131_v57  ;;  %4027 = vmatmul.mubr.bf16.gmra.mrb[200].mxu1 %v3133_v44 }
 0x4b2   : > { %6140 = vmatprep.mubr.msk.bf16.mxu0 %vm5680_vm15, %v6545_v21 }
 0x50c   : > { %v5773_v42 = vpop.f32.mrb[148].mxu0  ;;  %v5837_v46 = vpop.f32.mrb[140].mxu1 }
 0x50d   : > { %v5774_v32 = vpop.f32.mrb[149].mxu0  ;;  %v5838_v33 = vpop.f32.mrb[141].mxu1 }
 0x50e   : > { %v5775_v43 = vadd.f32 %v5774_v32, %v5773_v42  ;;  %v5839_v55 = vadd.f32 %v5838_v33, %v5837_v46  ;;  %v5776_v34 = vpop.f32.mrb[150].mxu0  ;;  %v5840_v9 = vpop.f32.mrb[142].mxu1 }
 0x50f   : > { %v5777_v35 = vpop.f32.mrb[151].mxu0  ;;  %v5841_v6 = vpop.f32.mrb[143].mxu1 }
 0x510   : > { %v8060_v41 = vadd.f32 %v5839_v55, %v5775_v43  ;;  %v5778_v2 = vadd.f32 %v5777_v35, %v5776_v34  ;;  %v5842_v59 = vadd.f32 %v5841_v6, %v5840_v9 }
 0x512   : > { %v8072_v20 = vadd.f32 %v5842_v59, %v5778_v2 }
 0x514   : > { %v5779_v22 = vpop.f32.mrb[152].mxu0  ;;  %v5843_v50 = vpop.f32.mrb[144].mxu1 }
 0x515   : > { %v5780_v51 = vpop.f32.mrb[153].mxu0  ;;  %v5844_v7 = vpop.f32.mrb[145].mxu1 }
 0x516   : > { %v5781_v39 = vadd.f32 %v5780_v51, %v5779_v22  ;;  %v5845_v58 = vadd.f32 %v5844_v7, %v5843_v50  ;;  %v5782_v60 = vpop.f32.mrb[154].mxu0  ;;  %v5846_v23 = vpop.f32.mrb[146].mxu1 }
 0x517   : > { %v5783_v24 = vpop.f32.mrb[155].mxu0  ;;  %v5847_v11 = vpop.f32.mrb[147].mxu1 }
 0x518   : > { %v8075_v25 = vadd.f32 %v5845_v58, %v5781_v39  ;;  %v5784_v14 = vadd.f32 %v5783_v24, %v5782_v60  ;;  %v5848_v27 = vadd.f32 %v5847_v11, %v5846_v23 }
 0x51a   : > { %v8077_v36 = vadd.f32 %v5848_v27, %v5784_v14 }
 0x51c   : > { %v5785_v49 = vpop.f32.mrb[156].mxu0  ;;  %v5849_v8 = vpop.f32.mrb[148].mxu1 }
 0x51d   : > { %v5786_v37 = vpop.f32.mrb[157].mxu0  ;;  %v5850_v38 = vpop.f32.mrb[149].mxu1 }
 0x51e   : > { %v5787_v47 = vadd.f32 %v5786_v37, %v5785_v49  ;;  %v5851_v28 = vadd.f32 %v5850_v38, %v5849_v8  ;;  %v5788_v4 = vpop.f32.mrb[158].mxu0  ;;  %v5852_v48 = vpop.f32.mrb[150].mxu1 }
 0x51f   : > { %v5789_v15 = vpop.f32.mrb[159].mxu0  ;;  %v5853_v16 = vpop.f32.mrb[151].mxu1 }
 0x520   : > { %v8079_v52 = vadd.f32 %v5851_v28, %v5787_v47  ;;  %v5790_v61 = vadd.f32 %v5789_v15, %v5788_v4  ;;  %v5854_v17 = vadd.f32 %v5853_v16, %v5852_v48 }
 0x522   : > { %v8081_v62 = vadd.f32 %v5854_v17, %v5790_v61 }
 0x524   : > { %v5791_v18 = vpop.f32.mrb[160].mxu0  ;;  %v5855_v3 = vpop.f32.mrb[152].mxu1 }
 0x525   : > { %v5792_v53 = vpop.f32.mrb[161].mxu0  ;;  %v5856_v63 = vpop.f32.mrb[153].mxu1 }
 0x526   : > { %v5793_v1 = vadd.f32 %v5792_v53, %v5791_v18  ;;  %v5857_v54 = vadd.f32 %v5856_v63, %v5855_v3  ;;  %v5794_v19 = vpop.f32.mrb[162].mxu0  ;;  %v5858_v0 = vpop.f32.mrb[154].mxu1 }
 0x527   : > { %v5795_v29 = vpop.f32.mrb[163].mxu0  ;;  %v5859_v45 = vpop.f32.mrb[155].mxu1 }
 0x528   : > { %v8083_v30 = vadd.f32 %v5857_v54, %v5793_v1  ;;  %v5796_v40 = vadd.f32 %v5795_v29, %v5794_v19  ;;  %v5860_v31 = vadd.f32 %v5859_v45, %v5858_v0 }
 0x52a   : > { %v8085_v5 = vadd.f32 %v5860_v31, %v5796_v40 }
 0x52c   : > { %v5797_v57 = vpop.f32.mrb[164].mxu0  ;;  %v5861_v44 = vpop.f32.mrb[156].mxu1 }
 0x52d   : > { %v5798_v10 = vpop.f32.mrb[165].mxu0  ;;  %v5862_v13 = vpop.f32.mrb[157].mxu1 }
 0x52e   : > { %v5799_v42 = vadd.f32 %v5798_v10, %v5797_v57  ;;  %v5863_v46 = vadd.f32 %v5862_v13, %v5861_v44  ;;  %v5800_v32 = vpop.f32.mrb[166].mxu0  ;;  %v5864_v33 = vpop.f32.mrb[158].mxu1 }
 0x52f   : > { %v5801_v43 = vpop.f32.mrb[167].mxu0  ;;  %v5865_v55 = vpop.f32.mrb[159].mxu1 }
 0x530   : > { %v8087_v34 = vadd.f32 %v5863_v46, %v5799_v42  ;;  %v5802_v9 = vadd.f32 %v5801_v43, %v5800_v32  ;;  %v5866_v35 = vadd.f32 %v5865_v55, %v5864_v33 }
 0x532   : > { %v8089_v6 = vadd.f32 %v5866_v35, %v5802_v9 }
 0x534   : > { %v5803_v56 = vpop.f32.mrb[168].mxu0  ;;  %v5867_v2 = vpop.f32.mrb[160].mxu1 }
 0x535   : > { %v5804_v59 = vpop.f32.mrb[169].mxu0  ;;  %v5868_v22 = vpop.f32.mrb[161].mxu1 }
 0x536   : > { %v5805_v50 = vadd.f32 %v5804_v59, %v5803_v56  ;;  %v5869_v51 = vadd.f32 %v5868_v22, %v5867_v2  ;;  %v5806_v7 = vpop.f32.mrb[170].mxu0  ;;  %v5870_v39 = vpop.f32.mrb[162].mxu1 }
 0x537   : > { %v5807_v58 = vpop.f32.mrb[171].mxu0  ;;  %v5871_v60 = vpop.f32.mrb[163].mxu1 }
 0x538   : > { %v8091_v23 = vadd.f32 %v5869_v51, %v5805_v50  ;;  %v5808_v24 = vadd.f32 %v5807_v58, %v5806_v7  ;;  %v5872_v11 = vadd.f32 %v5871_v60, %v5870_v39 }
 0x53a   : > { %v8093_v14 = vadd.f32 %v5872_v11, %v5808_v24 }
 0x53c   : > { %v5809_v27 = vpop.f32.mrb[172].mxu0  ;;  %v5873_v49 = vpop.f32.mrb[164].mxu1 }
 0x53d   : > { %v5810_v8 = vpop.f32.mrb[173].mxu0  ;;  %v5874_v37 = vpop.f32.mrb[165].mxu1 }
 0x53e   : > { %v5811_v38 = vadd.f32 %v5810_v8, %v5809_v27  ;;  %v5875_v47 = vadd.f32 %v5874_v37, %v5873_v49  ;;  %v5812_v28 = vpop.f32.mrb[174].mxu0  ;;  %v5876_v4 = vpop.f32.mrb[166].mxu1 }
 0x53f   : > { %v5813_v48 = vpop.f32.mrb[175].mxu0  ;;  %v5877_v15 = vpop.f32.mrb[167].mxu1 }
 0x540   : > { %v8095_v16 = vadd.f32 %v5875_v47, %v5811_v38  ;;  %v5814_v61 = vadd.f32 %v5813_v48, %v5812_v28  ;;  %v5878_v17 = vadd.f32 %v5877_v15, %v5876_v4 }
 0x542   : > { %v8097_v18 = vadd.f32 %v5878_v17, %v5814_v61 }
 0x544   : > { %v5815_v3 = vpop.f32.mrb[176].mxu0  ;;  %v5879_v53 = vpop.f32.mrb[168].mxu1 }
 0x545   : > { %v5816_v63 = vpop.f32.mrb[177].mxu0  ;;  %v5880_v1 = vpop.f32.mrb[169].mxu1 }
 0x546   : > { %v5817_v54 = vadd.f32 %v5816_v63, %v5815_v3  ;;  %v5881_v19 = vadd.f32 %v5880_v1, %v5879_v53  ;;  %v5818_v0 = vpop.f32.mrb[178].mxu0  ;;  %v5882_v29 = vpop.f32.mrb[170].mxu1 }
 0x547   : > { %v5819_v45 = vpop.f32.mrb[179].mxu0  ;;  %v5883_v40 = vpop.f32.mrb[171].mxu1 }
 0x548   : > { %v8099_v31 = vadd.f32 %v5881_v19, %v5817_v54  ;;  %v5820_v57 = vadd.f32 %v5819_v45, %v5818_v0  ;;  %v5884_v44 = vadd.f32 %v5883_v40, %v5882_v29 }
 0x54a   : > { %v8101_v10 = vadd.f32 %v5884_v44, %v5820_v57 }
 0x54c   : > { %v5901_v13 = vpop.f32.mrb[180].mxu0  ;;  %v5965_v42 = vpop.f32.mrb[172].mxu1 }
 0x54d   : > { %v5902_v46 = vpop.f32.mrb[181].mxu0  ;;  %v5966_v32 = vpop.f32.mrb[173].mxu1 }
 0x54e   : > { %v5903_v33 = vadd.f32 %v5902_v46, %v5901_v13  ;;  %v5967_v43 = vadd.f32 %v5966_v32, %v5965_v42  ;;  %v5904_v55 = vpop.f32.mrb[182].mxu0  ;;  %v5968_v9 = vpop.f32.mrb[174].mxu1 }
 0x54f   : > { %v5905_v35 = vpop.f32.mrb[183].mxu0  ;;  %v5969_v56 = vpop.f32.mrb[175].mxu1 }
 0x550   : > { %v3876_v2 = vadd.f32 %v5903_v33, %v8060_v41  ;;  %v5906_v59 = vadd.f32 %v5905_v35, %v5904_v55  ;;  %v5970_v22 = vadd.f32 %v5969_v56, %v5968_v9 }
 0x552   : > { %v3973_v50 = vadd.f32 %v5967_v43, %v3876_v2  ;;  %v3879_v51 = vadd.f32 %v5906_v59, %v8072_v20 }
 0x554   : > { %v3976_v7 = vadd.f32 %v5970_v22, %v3879_v51  ;;  %v5907_v39 = vpop.f32.mrb[184].mxu0  ;;  %v5971_v58 = vpop.f32.mrb[176].mxu1 }
 0x555   : > { %v5908_v60 = vpop.f32.mrb[185].mxu0  ;;  %v5972_v24 = vpop.f32.mrb[177].mxu1 }
 0x556   : > { %v5909_v11 = vadd.f32 %v5908_v60, %v5907_v39  ;;  %v5973_v27 = vadd.f32 %v5972_v24, %v5971_v58  ;;  %v5910_v49 = vpop.f32.mrb[186].mxu0  ;;  %v5974_v8 = vpop.f32.mrb[178].mxu1  ;;  %v4038_v37 = vpack.c.bf16 %v3976_v7, %v3973_v50 }
 0x557   : > { %v5911_v38 = vpop.f32.mrb[187].mxu0  ;;  %v5975_v47 = vpop.f32.mrb[179].mxu1 }
 0x558   : > { %v3884_v28 = vadd.f32 %v5909_v11, %v8075_v25  ;;  %v5912_v41 = vadd.f32 %v5911_v38, %v5910_v49  ;;  %v5976_v4 = vadd.f32 %v5975_v47, %v5974_v8  ;;  %6124 = vmatprep.subr.bf16.mxu0 %v4038_v37 }
 0x559   : > { %6125 = vmatpush3.bf16.msra.mxu0 %v4038_v37 }
 0x55a   : > { %v3981_v48 = vadd.f32 %v5973_v27, %v3884_v28  ;;  %v3887_v20 = vadd.f32 %v5912_v41, %v8077_v36 }
 0x55c   : > { %v3984_v15 = vadd.f32 %v5976_v4, %v3887_v20  ;;  %v5913_v61 = vpop.f32.mrb[188].mxu0  ;;  %v5977_v17 = vpop.f32.mrb[180].mxu1 }
 0x55d   : > { %v5914_v3 = vpop.f32.mrb[189].mxu0  ;;  %v5978_v53 = vpop.f32.mrb[181].mxu1 }
 0x55e   : > { %v5915_v63 = vadd.f32 %v5914_v3, %v5913_v61  ;;  %v5979_v1 = vadd.f32 %v5978_v53, %v5977_v17  ;;  %v5916_v54 = vpop.f32.mrb[190].mxu0  ;;  %v5980_v19 = vpop.f32.mrb[182].mxu1  ;;  %v4039_v0 = vpack.c.bf16 %v3984_v15, %v3981_v48 }
 0x55f   : > { %v5917_v29 = vpop.f32.mrb[191].mxu0  ;;  %v5981_v45 = vpop.f32.mrb[183].mxu1 }
 0x560   : > { %v3892_v25 = vadd.f32 %v5915_v63, %v8079_v52  ;;  %v5918_v40 = vadd.f32 %v5917_v29, %v5916_v54  ;;  %v5982_v57 = vadd.f32 %v5981_v45, %v5980_v19  ;;  %6126 = vmatprep.subr.bf16.mxu0 %v4039_v0 }
 0x561   : > { %6127 = vmatpush3.bf16.msra.mxu0 %v4039_v0 }
 0x562   : > { %v3989_v44 = vadd.f32 %v5979_v1, %v3892_v25  ;;  %v3895_v36 = vadd.f32 %v5918_v40, %v8081_v62 }
 0x564   : > { %v3992_v13 = vadd.f32 %v5982_v57, %v3895_v36  ;;  %v5919_v42 = vpop.f32.mrb[192].mxu0  ;;  %v5983_v46 = vpop.f32.mrb[184].mxu1 }
 0x565   : > { %v5920_v32 = vpop.f32.mrb[193].mxu0  ;;  %v5984_v33 = vpop.f32.mrb[185].mxu1 }
 0x566   : > { %v5921_v43 = vadd.f32 %v5920_v32, %v5919_v42  ;;  %v5985_v55 = vadd.f32 %v5984_v33, %v5983_v46  ;;  %v5922_v9 = vpop.f32.mrb[194].mxu0  ;;  %v5986_v35 = vpop.f32.mrb[186].mxu1  ;;  %v4040_v56 = vpack.c.bf16 %v3992_v13, %v3989_v44 }
 0x567   : > { %v5923_v2 = vpop.f32.mrb[195].mxu0  ;;  %v5987_v59 = vpop.f32.mrb[187].mxu1 }
 0x568   : > { %v3900_v52 = vadd.f32 %v5921_v43, %v8083_v30  ;;  %v5924_v22 = vadd.f32 %v5923_v2, %v5922_v9  ;;  %v5988_v50 = vadd.f32 %v5987_v59, %v5986_v35  ;;  %6128 = vmatprep.subr.bf16.mxu0 %v4040_v56 }
 0x569   : > { %6129 = vmatpush3.bf16.msra.mxu0 %v4040_v56 }
 0x56a   : > { %v3997_v51 = vadd.f32 %v5985_v55, %v3900_v52  ;;  %v3903_v62 = vadd.f32 %v5924_v22, %v8085_v5 }
 0x56c   : > { %v4000_v7 = vadd.f32 %v5988_v50, %v3903_v62  ;;  %v5925_v39 = vpop.f32.mrb[196].mxu0  ;;  %v5989_v58 = vpop.f32.mrb[188].mxu1 }
 0x56d   : > { %v5926_v60 = vpop.f32.mrb[197].mxu0  ;;  %v5990_v24 = vpop.f32.mrb[189].mxu1 }
 0x56e   : > { %v5927_v11 = vadd.f32 %v5926_v60, %v5925_v39  ;;  %v5991_v27 = vadd.f32 %v5990_v24, %v5989_v58  ;;  %v5928_v49 = vpop.f32.mrb[198].mxu0  ;;  %v5992_v8 = vpop.f32.mrb[190].mxu1  ;;  %v4041_v37 = vpack.c.bf16 %v4000_v7, %v3997_v51 }
 0x56f   : > { %v5929_v38 = vpop.f32.mrb[199].mxu0  ;;  %v5993_v47 = vpop.f32.mrb[191].mxu1 }
 0x570   : > { %v3908_v30 = vadd.f32 %v5927_v11, %v8087_v34  ;;  %v5930_v28 = vadd.f32 %v5929_v38, %v5928_v49  ;;  %v5994_v41 = vadd.f32 %v5993_v47, %v5992_v8  ;;  %6130 = vmatprep.subr.bf16.mxu0 %v4041_v37 }
 0x571   : > { %6131 = vmatpush3.bf16.msra.mxu0 %v4041_v37  ;;  %v2214_v37 = vadd.s32 16, %v8609_v12 }
 0x572   : > { %v4005_v4 = vadd.f32 %v5991_v27, %v3908_v30  ;;  %v3911_v5 = vadd.f32 %v5930_v28, %v8089_v6  ;;  %v4037_v30 = vld [vmem:[#allocation4 + $0x10] sm:$0xff] }
 0x573   : > { %vm2222_vm0 = vcmp.eq.s32.totalorder %v8067_v26, %v2214_v37  ;;  %v6430_v26 = vld [vmem:[%s8437_s14] sm:$0xff] (!%p5684_p11)  }
 0x574   : > { %v4008_v48 = vadd.f32 %v5994_v41, %v3911_v5  ;;  %v5931_v20 = vpop.f32.mrb[200].mxu0  ;;  %v5995_v15 = vpop.f32.mrb[192].mxu1  ;;  %vm5682_vm1 = vmpackc.low %vm2222_vm0, %vm2222_vm0  ;;  %v4036_v5 = vld [vmem:[#allocation4 + $0x8] sm:$0xff] }
 0x575   : > { %v5932_v61 = vpop.f32.mrb[201].mxu0  ;;  %v5996_v17 = vpop.f32.mrb[193].mxu1 }
 0x576   : > { %v5933_v3 = vadd.f32 %v5932_v61, %v5931_v20  ;;  %v5997_v53 = vadd.f32 %v5996_v17, %v5995_v15  ;;  %v5934_v63 = vpop.f32.mrb[202].mxu0  ;;  %v5998_v1 = vpop.f32.mrb[194].mxu1  ;;  %v4042_v54 = vpack.c.bf16 %v4008_v48, %v4005_v4  ;;  %v6546_v15 = vmov (!%p5684_p11), 0   ;;  %v4107_v61 = vld [vmem:[#allocation2] sm:$0xff] (!%p5684_p11)  ;;  %v4108_v17 = vld [vmem:[#allocation2 + $0x8] sm:$0xff] (!%p5684_p11) }
 0x577   : > { %v5935_v19 = vpop.f32.mrb[203].mxu0  ;;  %v5999_v0 = vpop.f32.mrb[195].mxu1  ;;  %6428 = vset.pattern.permute.xlu0 (!%p5684_p11), %v6546_v15  ;;  %6429 = vset.pattern.permute.xlu1 (!%p5684_p11), %v6546_v15 }
 0x578   : > { %v3916_v34 = vadd.f32 %v5933_v3, %v8091_v23  ;;  %v5936_v29 = vadd.f32 %v5935_v19, %v5934_v63  ;;  %v6000_v45 = vadd.f32 %v5999_v0, %v5998_v1  ;;  %6132 = vmatprep.subr.bf16.mxu0 %v4042_v54  ;;  %v4134_v3 = vpack.c.bf16 (!%p5684_p11), %v4108_v17, %v4107_v61  ;;  %v4113_v63 = vld [vmem:[%s8684_s11] sm:$0xff] (!%p5684_p11)  ;;  %v4115_v1 = vld [vmem:[%s8684_s11 + $0x10] sm:$0xff] (!%p5684_p11)  ;;  %v4114_v19 = vld [vmem:[%s8684_s11 + $0x8] sm:$0xff] (!%p5684_p11) }
 0x579   : > { %6133 = vmatpush3.bf16.msra.mxu0 %v4042_v54  ;;  %4118 = vperm.xlu0 (!%p5684_p11), %6428, %v4113_v63   ;;  %v6432_v54 = vld [vmem:[%s8440_s17] sm:$0xff] (!%p5684_p11)  }
 0x57a   : > { %v4013_v25 = vadd.f32 %v5997_v53, %v3916_v34  ;;  %v3919_v6 = vadd.f32 %v5936_v29, %v8093_v14  ;;  %v4109_v53 = vld [vmem:[#allocation2 + $0x10] sm:$0xff] (!%p5684_p11)  ;;  %4128 = vperm.xlu1 (!%p5684_p11), %6429, %v4115_v1   ;;  %v8145_v34 = vld [vmem:[#allocation3] sm:$0xff] (!%p5684_p11)  ;;  %v8147_v29 = vld [vmem:[#allocation3 + $0x8] sm:$0xff] (!%p5684_p11) }
 0x57b   : > { %v4135_v0 = vpack.c.bf16 (!%p5684_p11), %v4109_v53, %v4109_v53 }
 0x57c   : > { %v4016_v40 = vadd.f32 %v6000_v45, %v3919_v6  ;;  %v5937_v57 = vpop.f32.mrb[204].mxu0  ;;  %v6001_v44 = vpop.f32.mrb[196].mxu1  ;;  %v4301_v45 = vpack.c.bf16 (!%p5684_p11), %v8147_v29, %v8145_v34  ;;  %v8156_v6 = vld [vmem:[#allocation3 + $0x10] sm:$0xff] (!%p5684_p11) }
 0x57d   : > { %v5938_v36 = vpop.f32.mrb[205].mxu0  ;;  %v6002_v13 = vpop.f32.mrb[197].mxu1  ;;  %4123 = vperm.xlu0 (!%p5684_p11), %6428, %v4114_v19  }
 0x57e   : > { %v5939_v42 = vadd.f32 %v5938_v36, %v5937_v57  ;;  %v6003_v46 = vadd.f32 %v6002_v13, %v6001_v44  ;;  %v5940_v32 = vpop.f32.mrb[206].mxu0  ;;  %v6004_v33 = vpop.f32.mrb[198].mxu1  ;;  %v4043_v43 = vpack.c.bf16 %v4016_v40, %v4013_v25  ;;  %v6433_v25 = vld [vmem:[%s8440_s17 + $0x8] sm:$0xff] (!%p5684_p11)   ;;  %v4302_v40 = vpack.c.bf16 (!%p5684_p11), %v8156_v6, %v8156_v6  ;;  %v6434_v57 = vld [vmem:[%s8439_s16] sm:$0xff] (!%p5684_p11)  }
 0x57f   : > { %v5941_v55 = vpop.f32.mrb[207].mxu0  ;;  %v6005_v9 = vpop.f32.mrb[199].mxu1  ;;  %6152 = vmatprep.subr.bf16.mxu1 (!%p5684_p11), %v6434_v57  ;;  %v6435_v44 = vld [vmem:[%s8439_s16 + $0x8] sm:$0xff] (!%p5684_p11)  }
 0x580   : > { %v3924_v23 = vadd.f32 %v5939_v42, %v8095_v16  ;;  %v5942_v35 = vadd.f32 %v5941_v55, %v5940_v32  ;;  %v6006_v56 = vadd.f32 %v6005_v9, %v6004_v33  ;;  %6134 = vmatprep.subr.bf16.mxu0 %v4043_v43  ;;  %6153 = vmatpush3.bf16.msra.mxu1 (!%p5684_p11), %v6434_v57 }
 0x581   : > { %6135 = vmatpush3.bf16.msra.mxu0 %v4043_v43  ;;  %6154 = vmatprep.subr.bf16.mxu1 (!%p5684_p11), %v6435_v44 }
 0x582   : > { %v4021_v2 = vadd.f32 %v6003_v46, %v3924_v23  ;;  %v3927_v14 = vadd.f32 %v5942_v35, %v8097_v18  ;;  %v5689_v23 = vld [vmem:[%s8438_s15] ss:$0 sm:$0xff] (!%p5684_p11) }
 0x584   : > { %v4024_v59 = vadd.f32 %v6006_v56, %v3927_v14  ;;  %v5943_v52 = vpop.f32.mrb[208].mxu0  ;;  %v6007_v22 = vpop.f32.mrb[200].mxu1  ;;  %6155 = vmatpush3.bf16.msra.mxu1 (!%p5684_p11), %v6435_v44 }
 0x585   : > { %v5944_v50 = vpop.f32.mrb[209].mxu0  ;;  %v6008_v51 = vpop.f32.mrb[201].mxu1 }
 0x586   : > { %v5945_v62 = vadd.f32 %v5944_v50, %v5943_v52  ;;  %v6009_v7 = vadd.f32 %v6008_v51, %v6007_v22  ;;  %v5946_v39 = vpop.f32.mrb[210].mxu0  ;;  %v6010_v58 = vpop.f32.mrb[202].mxu1  ;;  %v4044_v60 = vpack.c.bf16 %v4024_v59, %v4021_v2 }
 0x587   : > { %v5947_v24 = vpop.f32.mrb[211].mxu0  ;;  %v6011_v11 = vpop.f32.mrb[203].mxu1 }
 0x588   : > { %v3932_v16 = vadd.f32 %v5945_v62, %v8099_v31  ;;  %v5948_v27 = vadd.f32 %v5947_v24, %v5946_v39  ;;  %v6012_v49 = vadd.f32 %v6011_v11, %v6010_v58  ;;  %6136 = vmatprep.subr.bf16.mxu0 %v4044_v60  ;;  %v4035_v31 = vld [vmem:[#allocation4] sm:$0xff]  ;;  %v5695_v39 = vld [vmem:[%s8442_s19] ss:$0 sm:$0xff] (!%p5684_p11) }
 0x589   : > { %6137 = vmatpush3.bf16.msra.mxu0 %v4044_v60 }
 0x58a   : > { %v4029_v8 = vadd.f32 %v6009_v7, %v3932_v16  ;;  %v3935_v18 = vadd.f32 %v5948_v27, %v8101_v10 }
 0x58c   : > { %v4032_v38 = vadd.f32 %v6012_v49, %v3935_v18 }
 0x58e   : > { %v4045_v47 = vpack.c.bf16 %v4032_v38, %v4029_v8 }
 0x590   : > { %6138 = vmatprep.subr.bf16.mxu0 %v4045_v47 }
 0x591   : > { %6139 = vmatpush3.bf16.msra.mxu0 %v4045_v47  ;;  %v5690_v47 = vld [vmem:[%s8441_s18] ss:$0 sm:$0xff] (!%p5684_p11) }
 0x592   : > { %6144 = vmatprep.subr.bf16.mxu0 (!%p5684_p11), %v6430_v26 }
 0x594   : > { %6141 = vmatmul.mubr.msk.bf16.vlgmr.msra.gmra.mrb[212].mxu0 %vm5682_vm1, %v6545_v21  ;;  %v6431_v21 = vld [vmem:[%s8437_s14 + $0x8] sm:$0xff] (!%p5684_p11)  }
 0x595   : > { %6145 = vmatpush3.bf16.msra.mxu0 (!%p5684_p11), %v6430_v26  ;;  %6148 = vmatprep.mubr.msk.bf16.mxu0 (!%p5684_p11), %vm2466_vm11, %v4134_v3 }
 0x596   : > { %6146 = vmatprep.subr.bf16.mxu0 (!%p5684_p11), %v6431_v21 }
 0x599   : > { %6147 = vmatpush3.bf16.msra.mxu0 (!%p5684_p11), %v6431_v21 }
 0x59a   : > { %6160 = vmatprep.subr.bf16.mxu0 (!%p5684_p11), %v6432_v54 }
 0x59c   : > { %6149 = vmatmul.mubr.msk.bf16.vlgmr.msra.gmra.mrb[0].mxu0 (!%p5684_p11), %vm2466_vm11, %v4135_v0 }
 0x59d   : > { %6161 = vmatpush3.bf16.msra.mxu0 (!%p5684_p11), %v6432_v54  ;;  %6164 = vmatprep.mubr.msk.bf16.mxu0 (!%p5684_p11), %vm2466_vm11, %v4301_v45 }
 0x59e   : > { %6162 = vmatprep.subr.bf16.mxu0 (!%p5684_p11), %v6433_v25 }
 0x5a1   : > { %6163 = vmatpush3.bf16.msra.mxu0 (!%p5684_p11), %v6433_v25 }
 0x5a4   : > { %6165 = vmatmul.mubr.msk.bf16.vlgmr.msra.gmra.mrb[4].mxu0 (!%p5684_p11), %vm2466_vm11, %v4302_v40 }
 0x5f8   : > { %v4119_v36 = vpop.permute.xlu0 (!%p5684_p11), %4118 }
 0x5f9   : > { %v4129_v13 = vpop.permute.xlu1 (!%p5684_p11), %4128 }
 0x5fc   : > { %v4124_v33 = vpop.permute.xlu0 (!%p5684_p11), %4123 }
 0x667   : > { %v6142_v28 = vpop.f32.mrb[212].mxu0  ;;  %4103 = sbr.rel (%p5684_p11) target bundleno = 6742 (0x1a56), region = 144 }
 0x668   : > { %v4096_v41 = vadd.f32 %v6142_v28, %v4037_v30  ;;  %v4080_v4 = vpop.f32.mrb[213].mxu0 }
 0x669   : > { %v4094_v48 = vadd.f32 %v4080_v4, %v4035_v31  ;;  %v6143_v20 = vpop.f32.mrb[214].mxu0 }
 0x66a   : > { %4099 = vst.msk [vmem:[#allocation4 + $0x10] sm:$0xff] %vm2466_vm11, %v4096_v41  ;;  %v4083_v12 = vpop.f32.mrb[215].mxu0 }
 0x66b   : > { %4097 = vst.msk [vmem:[#allocation4] sm:$0xff] %vm2466_vm11, %v4094_v48  ;;  %v4095_v10 = vadd.f32 %v4083_v12, %v4036_v5 }
 0x66d   : > { %4098 = vst.msk [vmem:[#allocation4 + $0x8] sm:$0xff] %vm2466_vm11, %v4095_v10 }
 0x66e   : > { %vm6551_vm2 = vmmov (!%p5703_p12), 0   ;;  %s6553_s2 = smov (!%p5703_p12), 64   ;;  %s6554_s9 = smov (!%p5703_p12), 32   ;;  %vm4703_vm3 = vcmask (!%p5703_p12), 189440  }
 0x66f   : > { %v6150_v9 = vpop.f32.mrb[0].mxu0  ;;  %s8686_s10 = sld [smem:[#allocation112_spill]] (!%p5703_p12)  ;;  %s8688_s1 = sld [smem:[#allocation113_spill]] (!%p5703_p12) }
 0x670   : > { %v4192_v56 = vpop.f32.mrb[1].mxu0  ;;  %s8692_s30 = sld [smem:[#allocation116_spill]] (!%p5703_p12) }
 0x671   : > { %v4112_v42 = vld [vmem:[#allocation4 + $0x10] sm:$0xff]  ;;  %v6151_v59 = vpop.f32.mrb[2].mxu0 }
 0x672   : > { %v4110_v46 = vld [vmem:[#allocation4] sm:$0xff]  ;;  %v4133_v32 = vmul.f32 %v4129_v13, %v4112_v42  ;;  %v4195_v22 = vpop.f32.mrb[3].mxu0 }
 0x673   : > { %v4131_v55 = vmul.f32 %v4119_v36, %v4110_v46 }
 0x674   : > { %v4111_v43 = vld [vmem:[#allocation4 + $0x8] sm:$0xff]  ;;  %v4208_v35 = vadd.f32 %v6150_v9, %v4133_v32 }
 0x675   : > { %v4132_v2 = vmul.f32 %v4124_v33, %v4111_v43  ;;  %v4206_v14 = vadd.f32 %v4192_v56, %v4131_v55  ;;  %s8687_s27 = smov (!%p5703_p12), %s8686_s10 }
 0x676   : > { %v4218_v52 = vadd.f32 %v5689_v23, %v4208_v35 }
 0x677   : > { %v4207_v50 = vadd.f32 %v4195_v22, %v4132_v2  ;;  %v4216_v51 = vadd.f32 %v5689_v23, %v4206_v14  ;;  %v6166_v24 = vpop.f32.mrb[4].mxu0 }
 0x678   : > { %v4221_v7 = vmax.f32 %v4218_v52, 0.0  ;;  %v4366_v11 = vpop.f32.mrb[5].mxu0  ;;  %v4375_v37 = vadd.f32 %v6166_v24, %v5695_v39 }
 0x679   : > { %v4217_v62 = vadd.f32 %v5689_v23, %v4207_v50  ;;  %v4219_v58 = vmax.f32 %v4216_v51, 0.0  ;;  %v4367_v27 = vadd.f32 %v5695_v39, %v4366_v11  ;;  %v6167_v49 = vpop.f32.mrb[6].mxu0 }
 0x67a   : > { %v4223_v8 = vpack.c.bf16 %v4221_v7, %v4221_v7  ;;  %v4369_v18 = vpop.f32.mrb[7].mxu0  ;;  %v8206_v49 = vld [vmem:[%s8444_s21] sm:$0xff] (!%p5703_p12)  }
 0x67b   : > { %v4220_v60 = vmax.f32 %v4217_v62, 0.0  ;;  %4404 = vrot.lane.b32.xlu1 %v4367_v27, %s6547_s3  ;;  %v4370_v38 = vadd.f32 %v5695_v39, %v4369_v18  ;;  %v8213_v18 = vld [vmem:[%s8443_s20] sm:$0xff] (!%p5703_p12)  }
 0x67d   : > { %v4222_v16 = vpack.c.bf16 %v4220_v60, %v4219_v58  ;;  %4406 = vrot.lane.b32.xlu0 %v4370_v38, %s6547_s3 }
 0x67f   : > { %6156 = vmatprep.mubr.msk.bf16.mxu1 %vm2466_vm11, %v4222_v16  ;;  %4408 = vrot.lane.b32.xlu1 %v4375_v37, %s6547_s3 }
 0x680   : > { %6157 = vmatmul.mubr.msk.bf16.vlgmr.msra.gmra.mrb[0].mxu1 %vm2466_vm11, %v4223_v8  ;;  %v6550_v8 = vmov (!%p5703_p12), 0.0  }
 0x681   : > { %6168 = vmatprep.subr.bf16.mxu0 (!%p5703_p12), %v6550_v8  ;;  %6176 = vmatprep.subr.bf16.mxu1 (!%p5703_p12), %v6550_v8 }
 0x682   : > { %6169 = vmatpush3.bf16.msra.mxu0 (!%p5703_p12), %v8206_v49  ;;  %6172 = vmatprep.mubr.msk.bf16.mxu0 (!%p5703_p12), %vm6551_vm2, %v6550_v8 }
 0x683   : > { %6177 = vmatpush3.bf16.msra.mxu1 (!%p5703_p12), %v8213_v18  ;;  %6170 = vmatprep.subr.bf16.mxu0 (!%p5703_p12), %v6550_v8 }
 0x684   : > { %6178 = vmatprep.subr.bf16.mxu1 (!%p5703_p12), %v6550_v8  ;;  %6180 = vmatprep.mubr.msk.bf16.mxu1 (!%p5703_p12), %vm6551_vm2, %v6550_v8 }
 0x6ed   : > { %v4405_v54 = vpop.permute.xlu1 %4404 }
 0x6ef   : > { %v4407_v40 = vpop.permute.xlu0 %4406 }
 0x6f1   : > { %v4409_v57 = vpop.permute.xlu1 %4408 }
 0x753   : > { %v6158_v30 = vpop.f32.mrb[0].mxu1 }
 0x754   : > { %v4296_v31 = vadd.f32 %v6158_v30, %v5690_v47  ;;  %v4287_v28 = vpop.f32.mrb[1].mxu1 }
 0x755   : > { %v4288_v41 = vadd.f32 %v5690_v47, %v4287_v28  ;;  %v6159_v4 = vpop.f32.mrb[2].mxu1 }
 0x756   : > { %v4382_v5 = vadd.f32 %v4375_v37, %v4296_v31  ;;  %v4290_v48 = vpop.f32.mrb[3].mxu1  ;;  %v8219_v37 = vld [vmem:[%s8444_s21 + $0x8] sm:$0xff] (!%p5703_p12)  }
 0x757   : > { %v4380_v20 = vadd.f32 %v4367_v27, %v4288_v41  ;;  %v4291_v12 = vadd.f32 %v5690_v47, %v4290_v48  ;;  %6171 = vmatpush3.bf16.msra.mxu0 (!%p5703_p12), %v8219_v37  ;;  %v6552_v47 = vmov (!%p5703_p12), 0  }
 0x758   : > { %v5702_v10 = vmul.f32 -1.442695, %v4382_v5  ;;  %6184 = vmatprep.subr.bf16.mxu0 (!%p5703_p12), %v6550_v8 }
 0x759   : > { %v5700_v26 = vmul.f32 -1.442695, %v4380_v20  ;;  %v4381_v21 = vadd.f32 %v4370_v38, %v4291_v12  ;;  %v8228_v38 = vld [vmem:[%s8443_s20 + $0x8] sm:$0xff] (!%p5703_p12)  }
 0x75a   : > { %6436 = vpow2.f32 %v5702_v10  ;;  %6179 = vmatpush3.bf16.msra.mxu1 (!%p5703_p12), %v8228_v38  ;;  %6173 = vmatmul.mubr.bf16.vlgmr.msra.gmra.mrb[0].mxu0 (!%p5703_p12), %v6552_v47 }
 0x75b   : > { %6438 = vpow2.f32 %v5700_v26  ;;  %v5701_v15 = vmul.f32 -1.442695, %v4381_v21  ;;  %6192 = vmatprep.subr.bf16.mxu1 (!%p5703_p12), %v6550_v8  ;;  %6188 = vmatprep.mubr.msk.bf16.mxu0 (!%p5703_p12), %vm6551_vm2, %v6550_v8 }
 0x75d   : > { %6440 = vpow2.f32 %v5701_v15  ;;  %6181 = vmatmul.mubr.bf16.vlgmr.msra.gmra.mrb[0].mxu1 (!%p5703_p12), %v6552_v47 }
 0x75e   : > { %6196 = vmatprep.mubr.msk.bf16.mxu1 (!%p5703_p12), %vm6551_vm2, %v6550_v8 }
 0x764   : > { %v6437_v61 = vpop.eup %6436 }
 0x765   : > { %v6439_v17 = vpop.eup %6438  ;;  %v4394_v3 = vadd.f32 1.0, %v6437_v61 }
 0x766   : > { %v4392_v53 = vadd.f32 1.0, %v6439_v17 }
 0x767   : > { %v6441_v63 = vpop.eup %6440 }
 0x768   : > { %6442 = vrcp.f32 %v4392_v53  ;;  %v4393_v1 = vadd.f32 1.0, %v6441_v63 }
 0x769   : > { %6444 = vrcp.f32 %v4394_v3 }
 0x76a   : > { %6446 = vrcp.f32 %v4393_v1 }
 0x772   : > { %v6443_v19 = vpop.eup %6442 }
 0x773   : > { %v6445_v0 = vpop.eup %6444  ;;  %v4413_v45 = vmul.f32 %v6443_v19, %v4405_v54  ;;  %v4434_v2 = vsub.f32 1.0, %v6443_v19 }
 0x774   : > { %v6447_v25 = vpop.eup %6446  ;;  %v4415_v36 = vmul.f32 %v6445_v0, %v4409_v57  ;;  %v4436_v51 = vsub.f32 1.0, %v6445_v0 }
 0x775   : > { %v4414_v44 = vmul.f32 %v6447_v25, %v4407_v40  ;;  %4419 = vrot.lane.b32.xlu0 %v4413_v45, %s6547_s3  ;;  %v4435_v50 = vsub.f32 1.0, %v6447_v25 }
 0x777   : > { %4421 = vrot.lane.b32.xlu1 %v4414_v44, %s6547_s3 }
 0x779   : > { %4423 = vrot.lane.b32.xlu0 %v4415_v36, %s6547_s3  ;;  %s6555_s3 = smov (!%p5703_p12), 96  }
 0x77d   : > { %4455 = vrot.lane.b32.xlu0 %v8145_v34, %s6548_s24 }
 0x7e7   : > { %v4420_v13 = vpop.permute.xlu0 %4419 }
 0x7e8   : > { %v4428_v43 = vadd.f32 %v4420_v13, %v4288_v41 }
 0x7e9   : > { %v4422_v42 = vpop.permute.xlu1 %4421 }
 0x7ea   : > { %v4429_v46 = vadd.f32 %v4422_v42, %v4291_v12 }
 0x7eb   : > { %v4424_v32 = vpop.permute.xlu0 %4423 }
 0x7ec   : > { %6448 = vtanh.f32 %v4429_v46  ;;  %v4430_v33 = vadd.f32 %v4424_v32, %v4296_v31  ;;  %v8244_v31 = vld [vmem:[%s8445_s22] ss:$0 sm:$0xff] (!%p5703_p12) }
 0x7ee   : > { %6450 = vtanh.f32 %v4430_v33 }
 0x7ef   : > { %6452 = vtanh.f32 %v4428_v43  ;;  %v4456_v34 = vpop.permute.xlu0 %4455 }
 0x7f0   : > { %v4464_v52 = vmul.f32 %v6443_v19, %v4456_v34 }
 0x7f6   : > { %v6449_v55 = vpop.eup %6448 }
 0x7f7   : > { %4442 = vrot.lane.b32.xlu0 %v6449_v55, %s6549_s6  ;;  %v6556_v55 = vmov (!%p5703_p12), -1e+30  }
 0x7f8   : > { %v6451_v9 = vpop.eup %6450 }
 0x7f9   : > { %4444 = vrot.lane.b32.xlu1 %v6451_v9, %s6549_s6  ;;  %v6453_v23 = vpop.eup %6452 }
 0x7fb   : > { %4459 = vrot.lane.b32.xlu0 %v8156_v6, %s6548_s24 }
 0x7fd   : > { %4440 = vrot.lane.b32.xlu1 %v6453_v23, %s6549_s6 }
 0x801   : > { %4457 = vrot.lane.b32.xlu1 %v8147_v29, %s6548_s24  ;;  %s8685_s24 = sld [smem:[#allocation104_spill]] (!%p5703_p12) }
 0x807   : > { %v8295_v43 = vld [vmem:[%s8685_s24] sm:$0x3] (!%p5703_p12) }
 0x82d   : > { %v4561_v30 = vpop.f32.mrb[0].mxu0 (!%p5703_p12) }
 0x82e   : > { %v6174_v41 = vpop.f32.mrb[1].mxu0 (!%p5703_p12) }
 0x82f   : > { %v4564_v48 = vpop.f32.mrb[2].mxu0 (!%p5703_p12) }
 0x830   : > { %v4613_v28 = vpop.f32.mrb[0].mxu1 (!%p5703_p12)  ;;  %v6175_v12 = vpop.f32.mrb[3].mxu0 (!%p5703_p12) }
 0x831   : > { %v4614_v4 = vadd.f32 (!%p5703_p12), %v4613_v28, %v4561_v30  ;;  %v6182_v5 = vpop.f32.mrb[1].mxu1 (!%p5703_p12) }
 0x832   : > { %v4616_v20 = vpop.f32.mrb[2].mxu1 (!%p5703_p12) }
 0x833   : > { %v4619_v10 = vadd.f32 (!%p5703_p12), %v8244_v31, %v4614_v4  ;;  %v6183_v26 = vpop.f32.mrb[3].mxu1 (!%p5703_p12) }
 0x835   : > { %6464 = vtanh.f32 (!%p5703_p12), %v4619_v10  ;;  %v5709_v15 = vmul.f32 (!%p5703_p12), -1.442695, %v4619_v10 }
 0x837   : > { %6466 = vpow2.f32 (!%p5703_p12), %v5709_v15 }
 0x83f   : > { %v6465_v21 = vpop.eup (!%p5703_p12), %6464 }
 0x841   : > { %v6467_v61 = vpop.eup (!%p5703_p12), %6466 }
 0x842   : > { %v4623_v17 = vadd.f32 (!%p5703_p12), 1.0, %v6467_v61 }
 0x844   : > { %6468 = vrcp.f32 (!%p5703_p12), %v4623_v17 }
 0x84e   : > { %v6469_v3 = vpop.eup (!%p5703_p12), %6468 }
 0x84f   : > { %v4627_v54 = vmul.f32 (!%p5703_p12), 0.0, %v6469_v3 }
 0x869   : > { %v4443_v35 = vpop.permute.xlu0 %4442 }
 0x86a   : > { %v4450_v58 = vmul.f32 %v4443_v35, %v4435_v50 }
 0x86b   : > { %v4445_v56 = vpop.permute.xlu1 %4444 }
 0x86c   : > { %v4451_v6 = vmul.f32 %v4445_v56, %v4436_v51 }
 0x86d   : > { %v4460_v14 = vpop.permute.xlu0 %4459 }
 0x86e   : > { %v4466_v62 = vmul.f32 %v6445_v0, %v4460_v14 }
 0x86f   : > { %v4441_v59 = vpop.permute.xlu1 %4440 }
 0x870   : > { %v4449_v22 = vmul.f32 %v4441_v59, %v4434_v2  ;;  %v8190_v29 = vadd.f32 %v4466_v62, %v4451_v6 }
 0x872   : > { %v8187_v7 = vadd.f32 %v4464_v52, %v4449_v22  ;;  %v4493_v1 = vpack.c.bf16 (!%p5703_p12), %v8190_v29, %v8190_v29 }
 0x873   : > { %v4458_v39 = vpop.permute.xlu1 %4457 }
 0x874   : > { %v4465_v60 = vmul.f32 %v6447_v25, %v4458_v39  ;;  %4473 = vrot.lane.b32.xlu1 %v8187_v7, %s6549_s6 }
 0x876   : > { %v8192_v24 = vadd.f32 %v4465_v60, %v4450_v58 }
 0x878   : > { %4475 = vrot.lane.b32.xlu0 %v8192_v24, %s6549_s6  ;;  %4477 = vrot.lane.b32.xlu1 %v8190_v29, %s6549_s6  ;;  %v4492_v25 = vpack.c.bf16 (!%p5703_p12), %v8192_v24, %v8187_v7 }
 0x87c   : > { %4629 = vrot.lane.b32.xlu0 (!%p5703_p12), %v6465_v21, %s6553_s2 }
 0x8e6   : > { %v4474_v11 = vpop.permute.xlu1 %4473  ;;  %4491 = sbr.rel (%p5703_p12) target bundleno = 6742 (0x1a56), region = 148 }
 0x8e7   : > { %4482 = vst.msk [vmem:[#allocation2] sm:$0xff] %vm2466_vm11, %v4474_v11  ;;  %4485 = vst.msk [vmem:[#allocation3] sm:$0xff] %vm2466_vm11, %v4474_v11 }
 0x8ea   : > { %v4478_v16 = vpop.permute.xlu1 %4477  ;;  %v4476_v27 = vpop.permute.xlu0 %4475 }
 0x8eb   : > { %4484 = vst.msk [vmem:[#allocation2 + $0x10] sm:$0xff] %vm2466_vm11, %v4478_v16  ;;  %4487 = vst.msk [vmem:[#allocation3 + $0x10] sm:$0xff] %vm2466_vm11, %v4478_v16 }
 0x8ec   : > { %4483 = vst.msk [vmem:[#allocation2 + $0x8] sm:$0xff] %vm2466_vm11, %v4476_v27  ;;  %4486 = vst.msk [vmem:[#allocation3 + $0x8] sm:$0xff] %vm2466_vm11, %v4476_v27 }
 0x8ee   : > { %v4630_v53 = vpop.permute.xlu0 %4629 }
 0x8ef   : > { %v4632_v63 = vmul.f32 %v6469_v3, %v4630_v53 }
 0x8f1   : > { %4634 = vrot.lane.b32.xlu0 %v4632_v63, %s6554_s9 }
 0x8f5   : > { %4652 = vrot.lane.b32.xlu0 %v4493_v1, %s6555_s3 }
 0x963   : > { %v4635_v19 = vpop.permute.xlu0 %4634 }
 0x964   : > { %v8251_v0 = vadd.f32 %v4635_v19, %v4627_v54 }
 0x966   : > { %6470 = vtanh.f32 %v8251_v0 }
 0x967   : > { %v4653_v36 = vpop.permute.xlu0 %4652 }
 0x968   : > { %v8267_v46 = vsel %vm2261_vm8, %v4653_v36, 0  ;;  %v8274_v32 = vsel %vm2466_vm11, %v4653_v36, 0  ;;  %vm4495_vm8 = vcmp.gt.f32.partialorder %v8295_v43, 0.0 }
 0x969   : > { %v8298_v9 = vsel %vm4495_vm8, 0.0, %v6556_v55 }
 0x970   : > { %v6471_v45 = vpop.eup %6470 }
 0x971   : > { %4640 = vrot.lane.b32.xlu1 %v6471_v45, %s6553_s2 }
 0x975   : > { %4650 = vrot.lane.b32.xlu1 %v4492_v25, %s6555_s3  ;;  %s8689_s3 = sld [smem:[#allocation115_spill]] }
 0x97b   : > { %s8690_s25 = smov %s8689_s3 }
 0x9e3   : > { %v4641_v40 = vpop.permute.xlu1 %4640 }
 0x9e4   : > { %v4643_v57 = vmul.f32 %v6469_v3, %v4641_v40 }
 0x9e6   : > { %v4644_v44 = vpack.c.bf16 %v4643_v57, %v4643_v57 }
 0x9e7   : > { %v8257_v13 = vpop.permute.xlu1 %4650 }
 0x9e8   : > { %4646 = vrot.lane.b32.xlu1 %v4644_v44, %s6554_s9  ;;  %v8262_v42 = vsel %vm2466_vm11, %v8257_v13, 0  ;;  %6193 = vmatpush3.bf16.msra.mxu1 %v8257_v13 }
 0x9e9   : > { %6185 = vmatpush3.bf16.xpose.msra.mxu0 %v8262_v42  ;;  %6194 = vmatprep.subr.bf16.mxu1 %v6550_v8 }
 0x9ea   : > { %6186 = vmatprep.subr.bf16.mxu0 %v6550_v8 }
 0x9ec   : > { %6195 = vmatpush3.bf16.msra.mxu1 %v8267_v46 }
 0x9ed   : > { %6200 = vmatprep.subr.bf16.mxu1 %v6550_v8 }
 0x9f1   : > { %6187 = vmatpush3.bf16.xpose.msra.mxu0 %v8274_v32 }
 0x9f2   : > { %6208 = vmatprep.subr.bf16.mxu0 %v6550_v8 }
 0xa5a   : > { %v4647_v33 = vpop.permute.xlu1 %4646 }
 0xa5b   : > { %6189 = vmatmul.mubr.msk.bf16.vlgmr.msra.gmra.mrb[4].mxu0 %vm2466_vm11, %v4647_v33 }
 0xa5c   : > { %6209 = vmatpush3.bf16.msra.mxu0 %v8213_v18  ;;  %6212 = vmatprep.mubr.msk.bf16.mxu0 %vm6551_vm2, %v6550_v8 }
 0xa5d   : > { %6210 = vmatprep.subr.bf16.mxu0 %v6550_v8 }
 0xa60   : > { %6211 = vmatpush3.bf16.msra.mxu0 %v8228_v38 }
 0xa61   : > { %6224 = vmatprep.subr.bf16.mxu0 %v6550_v8 }
 0xa63   : > { %6213 = vmatmul.mubr.msk.bf16.vlgmr.msra.gmra.mrb[8].mxu0 %vm2466_vm11, %v4647_v33 }
 0xa64   : > { %6225 = vmatpush3.bf16.msra.mxu0 %v8257_v13  ;;  %6228 = vmatprep.mubr.msk.bf16.mxu0 %vm6551_vm2, %v6550_v8 }
 0xa65   : > { %6226 = vmatprep.subr.bf16.mxu0 %v6550_v8 }
 0xa68   : > { %6227 = vmatpush3.bf16.msra.mxu0 %v8267_v46 }
 0xa69   : > { %6232 = vmatprep.subr.bf16.mxu0 %v6550_v8 }
 0xb2e   : > { %v4697_v23 = vpop.f32.mrb[4].mxu0 }
 0xb2f   : > { %v4698_v34 = vadd.f32 %v4697_v23, %v8298_v9  ;;  %v6190_v35 = vpop.f32.mrb[5].mxu0 }
 0xb30   : > { %v4700_v56 = vpop.f32.mrb[6].mxu0 }
 0xb31   : > { %v6191_v2 = vpop.f32.mrb[7].mxu0  ;;  %v4704_v14 = vsel %vm4703_vm3, %v4698_v34, -inf }
 0xb32   : > { %4705 = vmax.xlane.f32.xlu0 %v4704_v14 }
 0xb36   : > { %v4842_v59 = vpop.f32.mrb[8].mxu0 }
 0xb37   : > { %v6214_v52 = vpop.f32.mrb[9].mxu0 }
 0xb38   : > { %v4845_v22 = vpop.f32.mrb[10].mxu0 }
 0xb39   : > { %v6215_v50 = vpop.f32.mrb[11].mxu0 }
 0xbbf   : > { %v4706_v51 = vpop.xlane.xlu0 %4705 }
 0xbc0   : > { %v4707_v62 = vsub.f32 %v4698_v34, %v4706_v51 }
 0xbc2   : > { %v4708_v7 = vmul.f32 1.442695, %v4707_v62 }
 0xbc4   : > { %6472 = vpow2.f32 %v4708_v7 }
 0xbce   : > { %v6473_v39 = vpop.eup %6472 }
 0xbcf   : > { %v4710_v58 = vmul.f32 %v6473_v39, %v8295_v43 }
 0xbd1   : > { %v4711_v6 = vsel %vm4703_vm3, %v4710_v58, 0.0 }
 0xbd2   : > { %4712 = vadd.xlane.f32.xlu1 %v4711_v6 }
 0xc5f   : > { %v4713_v60 = vpop.xlane.xlu1 %4712 }
 0xc60   : > { %v4714_v29 = vmax.f32 %v4713_v60, 1e-20 }
 0xc62   : > { %6474 = vrcp.f32 %v4714_v29 }
 0xc6c   : > { %v6475_v24 = vpop.eup %6474 }
 0xc6d   : > { %v4716_v11 = vmul.f32 %v6475_v24, %v4710_v58 }
 0xc6f   : > { %v4717_v16 = vpack.c.bf16 %v4716_v11, %v4716_v11 }
 0xc71   : > { %6197 = vmatmul.mubr.msk.bf16.vlgmr.msra.gmra.mrb[4].mxu1 %vm2236_vm13, %v4717_v16 }
 0xc72   : > { %6201 = vmatpush3.bf16.msra.mxu1 %v8206_v49  ;;  %6204 = vmatprep.mubr.msk.bf16.mxu1 %vm6551_vm2, %v6550_v8 }
 0xc73   : > { %6202 = vmatprep.subr.bf16.mxu1 %v6550_v8 }
 0xc76   : > { %6203 = vmatpush3.bf16.msra.mxu1 %v8219_v37 }
 0xc77   : > { %6216 = vmatprep.subr.bf16.mxu1 %v6550_v8 }
 0xd44   : > { %v4758_v27 = vpop.f32.mrb[4].mxu1 }
 0xd45   : > { %v4764_v47 = vpack.c.bf16 %v4758_v27, %v4758_v27  ;;  %v6198_v30 = vpop.f32.mrb[5].mxu1 }
 0xd46   : > { %v4761_v28 = vpop.f32.mrb[6].mxu1 }
 0xd47   : > { %v6199_v41 = vpop.f32.mrb[7].mxu1  ;;  %6205 = vmatmul.mubr.msk.bf16.vlgmr.msra.gmra.mrb[8].mxu1 %vm2466_vm11, %v4764_v47 }
 0xd48   : > { %6217 = vmatpush3.bf16.xpose.msra.mxu1 %v8262_v42  ;;  %6220 = vmatprep.mubr.msk.bf16.mxu1 %vm6551_vm2, %v6550_v8 }
 0xd49   : > { %6218 = vmatprep.subr.bf16.mxu1 %v6550_v8 }
 0xd50   : > { %6219 = vmatpush3.bf16.xpose.msra.mxu1 %v8274_v32 }
 0xd51   : > { %6240 = vmatprep.subr.bf16.mxu1 %v6550_v8 }
 0xe1a   : > { %v4802_v4 = vpop.f32.mrb[8].mxu1 }
 0xe1b   : > { %v4843_v5 = vadd.f32 %v4842_v59, %v4802_v4  ;;  %v6206_v48 = vpop.f32.mrb[9].mxu1 }
 0xe1c   : > { %v4805_v20 = vpop.f32.mrb[10].mxu1 }
 0xe1d   : > { %v4848_v12 = vadd.f32 %v8244_v31, %v4843_v5  ;;  %v6207_v10 = vpop.f32.mrb[11].mxu1 }
 0xe1f   : > { %6476 = vtanh.f32 %v4848_v12  ;;  %v5714_v21 = vmul.f32 -1.442695, %v4848_v12 }
 0xe21   : > { %6478 = vpow2.f32 %v5714_v21 }
 0xe29   : > { %v6477_v26 = vpop.eup %6476 }
 0xe2a   : > { %4858 = vrot.lane.b32.xlu0 %v6477_v26, %s6553_s2  ;;  %v6458_v26 = vld [vmem:[%s8686_s10] sm:$0xff]   ;;  %s8691_s10 = sld [smem:[#allocation114_spill]] }
 0xe2b   : > { %v6479_v15 = vpop.eup %6478 }
 0xe2c   : > { %v4852_v61 = vadd.f32 1.0, %v6479_v15  ;;  %v6459_v15 = vld [vmem:[%s8687_s27 + $0x8] sm:$0xff]  }
 0xe2e   : > { %6480 = vrcp.f32 %v4852_v61 }
 0xe38   : > { %v6481_v17 = vpop.eup %6480 }
 0xe39   : > { %v4856_v63 = vmul.f32 %v6481_v17, %v8251_v0 }
 0xe9c   : > { %v4859_v3 = vpop.permute.xlu0 %4858 }
 0xe9d   : > { %v4861_v53 = vmul.f32 %v6481_v17, %v4859_v3 }
 0xe9f   : > { %4863 = vrot.lane.b32.xlu1 %v4861_v53, %s6554_s9 }
 0xf11   : > { %v4864_v1 = vpop.permute.xlu1 %4863 }
 0xf12   : > { %v8322_v54 = vadd.f32 %v4864_v1, %v4856_v63 }
 0xf14   : > { %6482 = vtanh.f32 %v8322_v54 }
 0xf1e   : > { %v6483_v19 = vpop.eup %6482 }
 0xf1f   : > { %4869 = vrot.lane.b32.xlu0 %v6483_v19, %s6553_s2 }
 0xf91   : > { %v4870_v45 = vpop.permute.xlu0 %4869 }
 0xf92   : > { %v4872_v25 = vmul.f32 %v6481_v17, %v4870_v45 }
 0xf94   : > { %v4873_v40 = vpack.c.bf16 %v4872_v25, %v4872_v25 }
 0xf96   : > { %4875 = vrot.lane.b32.xlu1 %v4873_v40, %s6554_s9 }
0x1008   : > { %v4876_v57 = vpop.permute.xlu1 %4875 }
0x1009   : > { %6221 = vmatmul.mubr.msk.bf16.vlgmr.msra.gmra.mrb[12].mxu1 %vm2466_vm11, %v4876_v57 }
0x100a   : > { %6241 = vmatpush3.bf16.msra.mxu1 %v8213_v18  ;;  %6244 = vmatprep.mubr.msk.bf16.mxu1 %vm6551_vm2, %v6550_v8 }
0x100b   : > { %6242 = vmatprep.subr.bf16.mxu1 %v6550_v8 }
0x100e   : > { %6243 = vmatpush3.bf16.msra.mxu1 %v8228_v38 }
0x100f   : > { %6256 = vmatprep.subr.bf16.mxu1 %v6550_v8 }
0x1011   : > { %6245 = vmatmul.mubr.msk.bf16.vlgmr.msra.gmra.mrb[16].mxu1 %vm2466_vm11, %v4876_v57 }
0x1012   : > { %6257 = vmatpush3.bf16.msra.mxu1 %v8257_v13  ;;  %6260 = vmatprep.mubr.msk.bf16.mxu1 %vm6551_vm2, %v6550_v8 }
0x1013   : > { %6258 = vmatprep.subr.bf16.mxu1 %v6550_v8 }
0x1016   : > { %6259 = vmatpush3.bf16.msra.mxu1 %v8267_v46 }
0x1017   : > { %6264 = vmatprep.subr.bf16.mxu1 %v6550_v8 }
0x10dc   : > { %v4914_v18 = vpop.f32.mrb[12].mxu1 }
0x10dd   : > { %v4915_v0 = vadd.f32 %v4914_v18, %v8298_v9  ;;  %v6222_v44 = vpop.f32.mrb[13].mxu1 }
0x10de   : > { %v4917_v38 = vpop.f32.mrb[14].mxu1 }
0x10df   : > { %v6223_v36 = vpop.f32.mrb[15].mxu1  ;;  %v4920_v33 = vsel %vm4703_vm3, %v4915_v0, -inf }
0x10e0   : > { %4921 = vmax.xlane.f32.xlu0 %v4920_v33 }
0x10e4   : > { %v5055_v55 = vpop.f32.mrb[16].mxu1 }
0x10e5   : > { %v6246_v13 = vpop.f32.mrb[17].mxu1 }
0x10e6   : > { %v5058_v23 = vpop.f32.mrb[18].mxu1  ;;  %v6460_v13 = vld [vmem:[%s8688_s1] sm:$0xff]  }
0x10e7   : > { %v6247_v34 = vpop.f32.mrb[19].mxu1 }
0x116d   : > { %v4922_v35 = vpop.xlane.xlu0 %4921 }
0x116e   : > { %v4923_v56 = vsub.f32 %v4915_v0, %v4922_v35 }
0x1170   : > { %v4924_v2 = vmul.f32 1.442695, %v4923_v56 }
0x1172   : > { %6484 = vpow2.f32 %v4924_v2 }
0x117c   : > { %v6485_v46 = vpop.eup %6484 }
0x117d   : > { %v4926_v14 = vmul.f32 %v6485_v46, %v8295_v43 }
0x117f   : > { %v4927_v59 = vsel %vm4703_vm3, %v4926_v14, 0.0 }
0x1180   : > { %4928 = vadd.xlane.f32.xlu1 %v4927_v59  ;;  %v6463_v59 = vld [vmem:[%s8690_s25 + $0x8] sm:$0xff]  }
0x120d   : > { %v4929_v52 = vpop.xlane.xlu1 %4928 }
0x120e   : > { %v4930_v22 = vmax.f32 %v4929_v52, 1e-20 }
0x1210   : > { %6486 = vrcp.f32 %v4930_v22  ;;  %v5728_v22 = vld [vmem:[%s8691_s10] ss:$0 sm:$0xff] }
0x121a   : > { %v6487_v50 = vpop.eup %6486 }
0x121b   : > { %v4932_v51 = vmul.f32 %v6487_v50, %v4926_v14  ;;  %v6462_v14 = vld [vmem:[%s8689_s3] sm:$0xff]  }
0x121d   : > { %v4933_v62 = vpack.c.bf16 %v4932_v51, %v4932_v51 }
0x121f   : > { %6229 = vmatmul.mubr.msk.bf16.vlgmr.msra.gmra.mrb[12].mxu0 %vm2236_vm13, %v4933_v62 }
0x1220   : > { %6233 = vmatpush3.bf16.msra.mxu0 %v8206_v49  ;;  %6236 = vmatprep.mubr.msk.bf16.mxu0 %vm6551_vm2, %v6550_v8 }
0x1221   : > { %6234 = vmatprep.subr.bf16.mxu0 %v6550_v8 }
0x1224   : > { %6235 = vmatpush3.bf16.msra.mxu0 %v8219_v37 }
0x1225   : > { %6248 = vmatprep.subr.bf16.mxu0 %v6550_v8 }
0x12f2   : > { %v4971_v7 = vpop.f32.mrb[12].mxu0 }
0x12f3   : > { %v4977_v39 = vpack.c.bf16 %v4971_v7, %v4971_v7  ;;  %v6230_v58 = vpop.f32.mrb[13].mxu0 }
0x12f4   : > { %v4974_v6 = vpop.f32.mrb[14].mxu0 }
0x12f5   : > { %v6231_v60 = vpop.f32.mrb[15].mxu0  ;;  %6237 = vmatmul.mubr.msk.bf16.vlgmr.msra.gmra.mrb[16].mxu0 %vm2466_vm11, %v4977_v39 }
0x12f6   : > { %6249 = vmatpush3.bf16.xpose.msra.mxu0 %v8262_v42  ;;  %6252 = vmatprep.mubr.msk.bf16.mxu0 %vm6551_vm2, %v6550_v8 }
0x12f7   : > { %6250 = vmatprep.subr.bf16.mxu0 %v6550_v8 }
0x12fe   : > { %6251 = vmatpush3.bf16.xpose.msra.mxu0 %v8274_v32 }
0x12ff   : > { %6272 = vmatprep.subr.bf16.mxu0 %v6550_v8 }
0x13c8   : > { %v5015_v49 = vpop.f32.mrb[16].mxu0 }
0x13c9   : > { %v5056_v37 = vadd.f32 %v5055_v55, %v5015_v49  ;;  %v6238_v29 = vpop.f32.mrb[17].mxu0 }
0x13ca   : > { %v5018_v24 = vpop.f32.mrb[18].mxu0 }
0x13cb   : > { %v5061_v11 = vadd.f32 %v8244_v31, %v5056_v37  ;;  %v6239_v16 = vpop.f32.mrb[19].mxu0 }
0x13cd   : > { %6488 = vtanh.f32 %v5061_v11  ;;  %v5719_v42 = vmul.f32 -1.442695, %v5061_v11 }
0x13cf   : > { %6490 = vpow2.f32 %v5719_v42 }
0x13d7   : > { %v6489_v27 = vpop.eup %6488 }
0x13d8   : > { %5071 = vrot.lane.b32.xlu0 %v6489_v27, %s6553_s2 }
0x13d9   : > { %v6491_v47 = vpop.eup %6490 }
0x13da   : > { %v5065_v30 = vadd.f32 1.0, %v6491_v47 }
0x13dc   : > { %6492 = vrcp.f32 %v5065_v30 }
0x13e6   : > { %v6493_v28 = vpop.eup %6492 }
0x13e7   : > { %v5069_v4 = vmul.f32 %v6493_v28, %v8322_v54 }
0x144a   : > { %v5072_v32 = vpop.permute.xlu0 %5071 }
0x144b   : > { %v5074_v41 = vmul.f32 %v6493_v28, %v5072_v32 }
0x144d   : > { %5076 = vrot.lane.b32.xlu1 %v5074_v41, %s6554_s9 }
0x14bf   : > { %v5077_v5 = vpop.permute.xlu1 %5076 }
0x14c0   : > { %v5079_v48 = vadd.f32 %v5077_v5, %v5069_v4 }
0x14c2   : > { %6494 = vtanh.f32 %v5079_v48 }
0x14cc   : > { %v6495_v31 = vpop.eup %6494 }
0x14cd   : > { %5082 = vrot.lane.b32.xlu0 %v6495_v31, %s6553_s2 }
0x153f   : > { %v5083_v20 = vpop.permute.xlu0 %5082 }
0x1540   : > { %v5085_v12 = vmul.f32 %v6493_v28, %v5083_v20 }
0x1542   : > { %v5086_v10 = vpack.c.bf16 %v5085_v12, %v5085_v12 }
0x1544   : > { %5088 = vrot.lane.b32.xlu1 %v5086_v10, %s6554_s9 }
0x15b6   : > { %v5089_v21 = vpop.permute.xlu1 %5088 }
0x15b7   : > { %6253 = vmatmul.mubr.msk.bf16.vlgmr.msra.gmra.mrb[20].mxu0 %vm2466_vm11, %v5089_v21 }
0x15b8   : > { %6273 = vmatpush3.bf16.msra.mxu0 %v6458_v26  ;;  %6276 = vmatprep.mubr.msk.bf16.mxu0 %vm6551_vm2, %v6550_v8 }
0x15b9   : > { %6274 = vmatprep.subr.bf16.mxu0 %v6550_v8 }
0x15bc   : > { %6275 = vmatpush3.bf16.msra.mxu0 %v6459_v15 }
0x15bf   : > { %6277 = vmatmul.mubr.msk.bf16.vlgmr.msra.gmra.mrb[24].mxu0 %vm2466_vm11, %v5089_v21 }
0x168a   : > { %v5127_v61 = vpop.f32.mrb[20].mxu0 }
0x168b   : > { %v5128_v17 = vadd.f32 %v5127_v61, %v8298_v9  ;;  %v6254_v3 = vpop.f32.mrb[21].mxu0 }
0x168c   : > { %v5130_v53 = vpop.f32.mrb[22].mxu0 }
0x168d   : > { %v6255_v63 = vpop.f32.mrb[23].mxu0  ;;  %v5133_v1 = vsel %vm4703_vm3, %v5128_v17, -inf }
0x168e   : > { %5134 = vmax.xlane.f32.xlu0 %v5133_v1 }
0x1692   : > { %v5300_v54 = vpop.f32.mrb[24].mxu0 }
0x1693   : > { %v6278_v19 = vpop.f32.mrb[25].mxu0 }
0x1694   : > { %v5303_v45 = vpop.f32.mrb[26].mxu0 }
0x1695   : > { %v6279_v25 = vpop.f32.mrb[27].mxu0 }
0x171b   : > { %v5135_v40 = vpop.xlane.xlu0 %5134 }
0x171c   : > { %v5136_v57 = vsub.f32 %v5128_v17, %v5135_v40 }
0x171e   : > { %v5137_v18 = vmul.f32 1.442695, %v5136_v57 }
0x1720   : > { %6496 = vpow2.f32 %v5137_v18 }
0x172a   : > { %v6497_v0 = vpop.eup %6496 }
0x172b   : > { %v5139_v44 = vmul.f32 %v6497_v0, %v8295_v43  ;;  %v6461_v43 = vld [vmem:[%s8688_s1 + $0x8] sm:$0xff]  }
0x172d   : > { %v5140_v38 = vsel %vm4703_vm3, %v5139_v44, 0.0 }
0x172e   : > { %5141 = vadd.xlane.f32.xlu1 %v5140_v38 }
0x17bb   : > { %v5142_v9 = vpop.xlane.xlu1 %5141 }
0x17bc   : > { %v5143_v36 = vmax.f32 %v5142_v9, 1e-20 }
0x17be   : > { %6498 = vrcp.f32 %v5143_v36 }
0x17c8   : > { %v6499_v33 = vpop.eup %6498 }
0x17c9   : > { %v5145_v55 = vmul.f32 %v6499_v33, %v5139_v44 }
0x17cb   : > { %v5146_v23 = vpack.c.bf16 %v5145_v55, %v5145_v55 }
0x17cd   : > { %6261 = vmatmul.mubr.msk.bf16.vlgmr.msra.gmra.mrb[20].mxu1 %vm2236_vm13, %v5146_v23  ;;  %vm5382_vm13 = vcmask 1024  }
0x17ce   : > { %6265 = vmatpush3.bf16.msra.mxu1 %v6460_v13  ;;  %6268 = vmatprep.mubr.msk.bf16.mxu1 %vm6551_vm2, %v6550_v8 }
0x17cf   : > { %6266 = vmatprep.subr.bf16.mxu1 %v6550_v8 }
0x17d2   : > { %6267 = vmatpush3.bf16.msra.mxu1 %v6461_v43 }
0x17d3   : > { %6280 = vmatprep.subr.bf16.mxu1 %v6550_v8 }
0x18a0   : > { %v5184_v34 = vpop.f32.mrb[20].mxu1 }
0x18a1   : > { %v5194_v35 = vpack.c.bf16 %v5184_v34, %v5184_v34  ;;  %v6262_v56 = vpop.f32.mrb[21].mxu1 }
0x18a2   : > { %v5187_v2 = vpop.f32.mrb[22].mxu1 }
0x18a3   : > { %v6263_v46 = vpop.f32.mrb[23].mxu1  ;;  %6269 = vmatmul.mubr.msk.bf16.vlgmr.msra.gmra.mrb[24].mxu1 %vm2466_vm11, %v5194_v35 }
0x18a4   : > { %6284 = vmatprep.mubr.msk.bf16.mxu1 %vm6551_vm2, %v6550_v8  ;;  %6281 = vmatpush3.bf16.msra.mxu1 %v6462_v14 }
0x18a5   : > { %6282 = vmatprep.subr.bf16.mxu1 %v6550_v8  ;;  %v5729_v8 = vld [vmem:[#allocation5] ss:$0 sm:$0xff] }
0x18a8   : > { %6283 = vmatpush3.bf16.msra.mxu1 %v6463_v59 }
0x1976   : > { %v5248_v52 = vpop.f32.mrb[24].mxu1 }
0x1977   : > { %v5301_v50 = vadd.f32 %v5300_v54, %v5248_v52  ;;  %v6270_v51 = vpop.f32.mrb[25].mxu1 }
0x1978   : > { %v5251_v62 = vpop.f32.mrb[26].mxu1 }
0x1979   : > { %v5313_v7 = vadd.f32 %v5728_v22, %v5301_v50  ;;  %v6271_v39 = vpop.f32.mrb[27].mxu1 }
0x197b   : > { %v5314_v58 = vmax.f32 %v5313_v7, 0.0 }
0x197d   : > { %v5315_v6 = vpack.c.bf16 %v5314_v58, %v5314_v58 }
0x197f   : > { %6285 = vmatmul.mubr.msk.bf16.vlgmr.msra.gmra.mrb[28].mxu1 %vm2466_vm11, %v5315_v6 }
0x1a52   : > { %v5376_v60 = vpop.f32.mrb[28].mxu1 }
0x1a53   : > { %v5377_v49 = vadd.f32 %v5729_v8, %v5376_v60  ;;  %v6286_v37 = vpop.f32.mrb[29].mxu1 }
0x1a54   : > { %v5379_v29 = vpop.f32.mrb[30].mxu1 }
0x1a55   : > { %5383 = vst.msk [vmem:[%s8692_s30] sm:$0x3] %vm5382_vm13, %v5377_v49  ;;  %v6287_v24 = vpop.f32.mrb[31].mxu1 }
0x1a56 PF: > { %s8693_s29 = sld [smem:[#allocation8_spill]]  ;;  %s8694_s9 = sld [smem:[#allocation6_spill]] }
0x1a57   : > { %s8695_s30 = sld [smem:[#allocation7_spill]]  ;;  %s8696_s3 = sld [smem:[#allocation9_spill]] }
0x1a58   : > { %s8697_s6 = sld [smem:[#allocation10_spill]] }
0x1a5c   : > { %s40_s10 = sadd.s32 1, %s8693_s29  }
0x1a5d   : > { %p37_p13 = scmp.ge.s32.totalorder %s40_s10, 11  }
0x1a5f   :  { %39 = sbr.rel (!%p37_p13) target bundleno = 19 (0x13), region = 180 }

</bundles_post_ra>
